<compile_context>
chip_gen: v7x
topology: tpu7x:2x2x1
jax: 0.10.0
libtpu: 0.0.40
codegen_flags: <defaults>
</compile_context>

<pallas_src>
import functools

import jax
import jax.numpy as jnp
from jax.experimental import pallas as pl
from jax.experimental.pallas import tpu as pltpu

_LANE = 128  # pad the flattened im2col K dim to a multiple of this


def _round_up(x, m):
    return (x + m - 1) // m * m


# ---------------------------------------------------------------------------
# kernel
# ---------------------------------------------------------------------------
def _build_patch_3x3(read_tap, patch_ref, rows, W, C):
    """im2col for a 3x3 'same' conv, taps folded into the flattened K dim.

    read_tap(oy, ox) -> (rows, W, C) source window for tap (oy, ox); the source
    already carries the spatial halo, so no masking is needed here.
    patch_ref : (rows, W, Kp) VMEM scratch, Kp = round_up(9*C, 128); tap
                t = (oy+1)*3 + (ox+1) occupies lanes [t*C, (t+1)*C).
    Every slab write is a single dense, full-width store.
    """
    Kp = patch_ref.shape[2]
    t = 0
    for oy in (-1, 0, 1):
        for ox in (-1, 0, 1):
            patch_ref[:, :, t * C:(t + 1) * C] = read_tap(oy, ox)
            t += 1
    if Kp > 9 * C:
        # K-padding tail: matching weight rows are zero, but stale VMEM could be
        # NaN, so keep it zeroed.  Redone every grid step (tiny store) -> safe
        # when the parallel grid axes are megacore-partitioned.
        patch_ref[:, :, 9 * C:] = jnp.zeros((rows, W, Kp - 9 * C),
                                            patch_ref.dtype)


def _conv_block_kernel(xs_ref, w1_ref, sh1_ref, w2_ref, sh2_ref, o_ref,
                       patch1_ref, mid_ref, patch2_ref, *, H):
    """One (batch, row-strip) tile per grid step.

    xs_ref    : (1, R+4, W+2, Cin) bf16 input strip, 2-row + 1-col zero halo
    w1_ref    : (Kp1, Cmid) bf16  conv1 weights, BN1 scale folded, K flattened
    sh1_ref   : (1, Cmid)   f32   folded conv1 bias + BN1 shift
    w2_ref    : (Kp2, Cout) bf16  conv2 weights, BN2 scale folded
    sh2_ref   : (1, Cout)   f32
    o_ref     : (1, R, W, Cout) bf16 output strip (unpadded channels)
    patch1_ref: (R+2, W, Kp1)   bf16 im2col scratch for conv1
    mid_ref   : (R+2, W+2, Cmid) bf16 conv1 output + 1-row/1-col halo for conv2
    patch2_ref: (R, W, Kp2)     bf16 im2col scratch for conv2
    """
    R, W, Cout = o_ref.shape[1], o_ref.shape[2], o_ref.shape[3]
    Cin = xs_ref.shape[3]
    Cmid = w1_ref.shape[1]
    Kp1, Kp2 = patch1_ref.shape[2], patch2_ref.shape[2]
    s = pl.program_id(1)

    # ---- conv1 + BN1 + ReLU over R+2 rows (the extra row halo conv2 needs) ---
    _build_patch_3x3(
        lambda oy, ox: xs_ref[0, 1 + oy:3 + oy + R, 1 + ox:1 + ox + W, :],
        patch1_ref, R + 2, W, Cin)
    # NOTE: the (rows, W, Kp)->(rows*W, Kp) merge is layout-free for bf16 when W
    # is a multiple of 16 (true for typical U-Net sizes); otherwise Mosaic
    # inserts a relayout copy (correct, slower).
    acc1 = jnp.dot(patch1_ref[...].reshape((R + 2) * W, Kp1), w1_ref[...],
                   preferred_element_type=jnp.float32)
    y = jnp.maximum(acc1 + sh1_ref[...], 0.0).reshape(R + 2, W, Cmid)
    # Mid rows whose global row index lies outside the image are conv2's zero
    # padding, not ReLU(bias): mask them by global row index.
    grow = s * R - 1 + jax.lax.broadcasted_iota(jnp.int32, (R + 2, 1, 1), 0)
    y = jnp.where((grow >= 0) & (grow < H), y, 0.0)
    mid_ref[:, 1:1 + W, :] = y.astype(mid_ref.dtype)
    # 1-column zero halo for conv2's 'same' padding in W.
    mid_ref[:, 0:1, :] = jnp.zeros((R + 2, 1, Cmid), mid_ref.dtype)
    mid_ref[:, 1 + W:, :] = jnp.zeros((R + 2, 1, Cmid), mid_ref.dtype)

    # ---- conv2 + BN2 + ReLU over the strip's R output rows -------------------
    _build_patch_3x3(
        lambda oy, ox: mid_ref[1 + oy:1 + oy + R, 1 + ox:1 + ox + W, :],
        patch2_ref, R, W, Cmid)
    acc2 = jnp.dot(patch2_ref[...].reshape(R * W, Kp2), w2_ref[...],
                   preferred_element_type=jnp.float32)
    z = jnp.maximum(acc2 + sh2_ref[...], 0.0)
    o_ref[0] = z.reshape(R, W, Cout).astype(o_ref.dtype)


# ---------------------------------------------------------------------------
# wrapper
# ---------------------------------------------------------------------------
def _fold_bn_into_weights(w_oihw, bias, gamma, beta, mean, var, kp, eps=1e-5):
    """Fold eval-mode BN scale into the conv weights; flatten K = (ky, kx, cin).

    Returns:
      w_mat : (kp, cout) bf16, row k = (ky*3 + kx)*cin + c, zero-padded to kp
      shift : (1, cout) f32   = (conv_bias - running_mean)*scale + beta
    """
    cout, cin = w_oihw.shape[0], w_oihw.shape[1]
    scale = gamma / jnp.sqrt(var + eps)
    shift = (bias - mean) * scale + beta
    wk = jnp.transpose(w_oihw, (2, 3, 1, 0)) * scale          # (3,3,cin,cout)
    w_mat = wk.reshape(9 * cin, cout)
    w_mat = jnp.pad(w_mat, ((0, kp - 9 * cin), (0, 0))).astype(jnp.bfloat16)
    return w_mat, shift.reshape(1, cout).astype(jnp.float32)


def _vmem_bytes(R, W, Cin, Cmid, Cout, Kp1, Kp2):
    """Rough per-core VMEM footprint of one grid step."""
    blk = 2 * ((R + 4) * (W + 2) * Cin * 2      # input strip (x2 pipeline bufs)
               + R * W * Cout * 2               # output strip
               + (Kp1 * Cmid + Kp2 * Cout) * 2  # weights
               + (Cmid + Cout) * 4)             # shifts
    scr = ((R + 2) * W * Kp1 + (R + 2) * (W + 2) * Cmid + R * W * Kp2) * 2
    tmp = (((R + 2) * W * Cmid + R * W * Cout) * 4          # f32 matmul results
           + (R + 2) * W * max(Kp1, Kp2) * 2)                # relayout headroom
    return blk + scr + tmp


def _pick_rows_per_strip(H, W, Cin, Cmid, Cout, budget_bytes=44 << 20):
    """Strip height that divides H, fits the VMEM budget (sized for v7x's
    64 MiB/TC) and gives the MXU a reasonably full M dimension."""
    Kp1 = _round_up(9 * Cin, _LANE)
    Kp2 = _round_up(9 * Cmid, _LANE)
    divisors = [d for d in range(1, H + 1) if H % d == 0]
    fitting = [d for d in divisors
               if _vmem_bytes(d, W, Cin, Cmid, Cout, Kp1, Kp2) <= budget_bytes]
    if not fitting:
        return 1  # TODO(synk): add a W-tiling axis for images where even 1-row strips blow the budget.
    big = [d for d in fitting if d * W >= 1024]
    if big:
        aligned = [d for d in big if (d * W) % 256 == 0]   # fill the 256-wide MXU M dim
        return min(aligned) if aligned else min(big)
    return max(fitting)


def conv_block_forward_nhwc(x_nhwc, w1, b1, g1, be1, m1, v1,
                            w2, b2, g2, be2, m2, v2, *, rows_per_strip=None):
    """NHWC conv_block (eval mode).  Returns (N, H, W, Cout) bf16 so the next
    U-Net block can consume it without an NCHW/f32 round trip."""
    N, H, W, Cin = x_nhwc.shape
    Cmid, Cout = w1.shape[0], w2.shape[0]
    Kp1 = _round_up(9 * Cin, _LANE)
    Kp2 = _round_up(9 * Cmid, _LANE)

    if rows_per_strip is None:
        R = _pick_rows_per_strip(H, W, Cin, Cmid, Cout)
    else:
        R = max(d for d in range(1, H + 1) if H % d == 0 and d <= rows_per_strip)
    S = H // R

    w1m, sh1 = _fold_bn_into_weights(w1, b1, g1, be1, m1, v1, Kp1)
    w2m, sh2 = _fold_bn_into_weights(w2, b2, g2, be2, m2, v2, Kp2)

    # Overlapping row strips with a 2-row / 1-column zero halo (conv 'same'
    # padding + the extra row conv2 needs).  Cheap wrapper-side gather that
    # keeps the input on the normal BlockSpec pipeline.
    # TODO(synk): for very large images switch the input to memory_space=pl.ANY
    #             and DMA the halo'd rows manually to avoid the (R+4)/R copy.
    x = x_nhwc.astype(jnp.bfloat16)
    xp = jnp.pad(x, ((0, 0), (2, 2), (1, 1), (0, 0)))
    x_strips = jnp.stack([xp[:, s * R:s * R + R + 4] for s in range(S)], axis=1)
    x_strips = x_strips.reshape(N * S, R + 4, W + 2, Cin)

    vmem_limit = int(min(
        100 << 20,
        max(32 << 20, 2 * _vmem_bytes(R, W, Cin, Cmid, Cout, Kp1, Kp2))))

    return pl.pallas_call(
        functools.partial(_conv_block_kernel, H=H),
        out_shape=jax.ShapeDtypeStruct((N, H, W, Cout), jnp.bfloat16),
        grid_spec=pltpu.PrefetchScalarGridSpec(
            num_scalar_prefetch=0,
            grid=(N, S),
            in_specs=[
                pl.BlockSpec((1, R + 4, W + 2, Cin),
                             lambda n, s: (n * S + s, 0, 0, 0)),
                pl.BlockSpec((Kp1, Cmid), lambda n, s: (0, 0)),
                pl.BlockSpec((1, Cmid), lambda n, s: (0, 0)),
                pl.BlockSpec((Kp2, Cout), lambda n, s: (0, 0)),
                pl.BlockSpec((1, Cout), lambda n, s: (0, 0)),
            ],
            out_specs=pl.BlockSpec((1, R, W, Cout), lambda n, s: (n, s, 0, 0)),
            scratch_shapes=[
                pltpu.VMEM((R + 2, W, Kp1), jnp.bfloat16),      # im2col conv1
                pltpu.VMEM((R + 2, W + 2, Cmid), jnp.bfloat16),  # mid activation
                pltpu.VMEM((R, W, Kp2), jnp.bfloat16),           # im2col conv2
            ],
        ),
        compiler_params=pltpu.CompilerParams(
            dimension_semantics=("parallel", "parallel"),
            vmem_limit_bytes=vmem_limit),
    )(x_strips, w1m, sh1, w2m, sh2)
    # TODO(synk): if a bundle dump shows exposed DMA between strips, add
    #             pipeline_mode=pl.Buffered(3) on the input-strip BlockSpec.


@functools.partial(jax.jit, static_argnames=("rows_per_strip",))
def conv_block_forward(x_nchw, w1, b1, g1, be1, m1, v1,
                       w2, b2, g2, be2, m2, v2, *, rows_per_strip=None):
    """PyTorch-facing wrapper: NCHW f32 in / NCHW f32 out."""
    x = jnp.transpose(x_nchw, (0, 2, 3, 1))
    out = conv_block_forward_nhwc(x, w1, b1, g1, be1, m1, v1,
                                  w2, b2, g2, be2, m2, v2,
                                  rows_per_strip=rows_per_strip)
    return jnp.transpose(out, (0, 3, 1, 2)).astype(jnp.float32)


# ---------------------------------------------------------------------------
# pure-JAX reference (mirrors the PyTorch module in eval mode)
# ---------------------------------------------------------------------------
def _reference_forward(x, w1, b1, g1, be1, m1, v1, w2, b2, g2, be2, m2, v2,
                       eps=1e-5):
    def conv_bn_relu(x, w, b, g, be, mean, var):
        y = jax.lax.conv_general_dilated(
            x, w, window_strides=(1, 1), padding=((1, 1), (1, 1)),
            dimension_numbers=("NCHW", "OIHW", "NCHW"))
        y = y + b[None, :, None, None]
        y = (y - mean[None, :, None, None]) / jnp.sqrt(
            var[None, :, None, None] + eps)
        y = y * g[None, :, None, None] + be[None, :, None, None]
        return jnp.maximum(y, 0.0)

    y = conv_bn_relu(x, w1, b1, g1, be1, m1, v1)
    return conv_bn_relu(y, w2, b2, g2, be2, m2, v2)


if __name__ == "__main__":
    N, CIN, COUT, H, W = 2, 4, 8, 16, 16

    key = jax.random.PRNGKey(0)
    keys = jax.random.split(key, 12)

    x = jax.random.normal(keys[0], (N, CIN, H, W), jnp.float32)

    w1 = jax.random.normal(keys[1], (COUT, CIN, 3, 3), jnp.float32) * 0.1
    b1 = jax.random.normal(keys[2], (COUT,), jnp.float32) * 0.1
    g1 = 1.0 + 0.1 * jax.random.normal(keys[3], (COUT,), jnp.float32)
    be1 = 0.1 * jax.random.normal(keys[4], (COUT,), jnp.float32)
    m1 = 0.1 * jax.random.normal(keys[5], (COUT,), jnp.float32)
    v1 = jax.random.uniform(keys[6], (COUT,), jnp.float32, 0.5, 1.5)

    w2 = jax.random.normal(keys[7], (COUT, COUT, 3, 3), jnp.float32) * 0.1
    b2 = jax.random.normal(keys[8], (COUT,), jnp.float32) * 0.1
    g2 = 1.0 + 0.1 * jax.random.normal(keys[9], (COUT,), jnp.float32)
    be2 = 0.1 * jax.random.normal(keys[10], (COUT,), jnp.float32)
    m2 = 0.1 * jax.random.normal(keys[11], (COUT,), jnp.float32)
    v2 = jax.random.uniform(keys[0], (COUT,), jnp.float32, 0.5, 1.5)

    params = (w1, b1, g1, be1, m1, v1, w2, b2, g2, be2, m2, v2)

    ref = _reference_forward(x, *params)

    # Default strip choice (single strip at this toy size).
    out = jax.block_until_ready(conv_block_forward(x, *params))
    assert out.shape == (N, COUT, H, W), out.shape
    assert jnp.allclose(out, ref, atol=5e-2, rtol=5e-2), \
        float(jnp.max(jnp.abs(out - ref)))

    # Multi-strip path (2 strips of 8 rows) -- exercises the row-halo handling.
    out8 = jax.block_until_ready(conv_block_forward(x, *params,
                                                    rows_per_strip=8))
    assert jnp.allclose(out8, ref, atol=5e-2, rtol=5e-2), \
        float(jnp.max(jnp.abs(out8 - ref)))

    print("KERNEL_OK")
</pallas_src>

<mosaic_0001>
module attributes {stable_mosaic.version = 11 : i64} {
  func.func @_conv_block_kernel(%arg0: i32, %arg1: i32, %arg2: memref<1x20x18x4xbf16, #tpu.memory_space<vmem>>, %arg3: memref<128x8xbf16, #tpu.memory_space<vmem>>, %arg4: memref<1x8xf32, #tpu.memory_space<vmem>>, %arg5: memref<128x8xbf16, #tpu.memory_space<vmem>>, %arg6: memref<1x8xf32, #tpu.memory_space<vmem>>, %arg7: memref<1x16x16x8xbf16, #tpu.memory_space<vmem>>, %arg8: memref<18x16x128xbf16, #tpu.memory_space<vmem>>, %arg9: memref<18x18x8xbf16, #tpu.memory_space<vmem>>, %arg10: memref<16x16x128xbf16, #tpu.memory_space<vmem>>) attributes {dimension_semantics = [#tpu.dimension_semantics<parallel>, #tpu.dimension_semantics<parallel>], iteration_bounds = array<i64: 2, 1>, scalar_prefetch = 0 : i64, scratch_operands = 3 : i64, tpu.core_type = #tpu.core_type<tc>, window_params = [{transform_indices = @transform_0, window_bounds = array<i64: 1, 20, 18, 4>}, {pipeline_mode = #tpu.pipeline_mode<synchronous>, transform_indices = @transform_1, window_bounds = array<i64: 128, 8>}, {pipeline_mode = #tpu.pipeline_mode<synchronous>, transform_indices = @transform_2, window_bounds = array<i64: 1, 8>}, {pipeline_mode = #tpu.pipeline_mode<synchronous>, transform_indices = @transform_3, window_bounds = array<i64: 128, 8>}, {pipeline_mode = #tpu.pipeline_mode<synchronous>, transform_indices = @transform_4, window_bounds = array<i64: 1, 8>}, {transform_indices = @transform_5, window_bounds = array<i64: 1, 16, 16, 8>}]} {
    %c0 = arith.constant 0 : index
    %c0_0 = arith.constant 0 : index
    %c0_1 = arith.constant 0 : index
    %c0_2 = arith.constant 0 : index
    %0 = vector.load %arg2[%c0, %c0_0, %c0_1, %c0_2] : memref<1x20x18x4xbf16, #tpu.memory_space<vmem>>, vector<1x18x16x4xbf16>
    %1 = vector.shape_cast %0 : vector<1x18x16x4xbf16> to vector<18x16x4xbf16>
    %c0_3 = arith.constant 0 : index
    %c0_4 = arith.constant 0 : index
    %c0_5 = arith.constant 0 : index
    %2 = vector.load %arg8[%c0_3, %c0_4, %c0_5] : memref<18x16x128xbf16, #tpu.memory_space<vmem>>, vector<18x16x4xbf16>
    tpu.vector_store %arg8[%c0_3, %c0_4, %c0_5], %1 {strides = array<i32>} : memref<18x16x128xbf16, #tpu.memory_space<vmem>>, vector<18x16x4xbf16>,
    %c0_6 = arith.constant 0 : index
    %c0_7 = arith.constant 0 : index
    %c1 = arith.constant 1 : index
    %c0_8 = arith.constant 0 : index
    %3 = vector.load %arg2[%c0_6, %c0_7, %c1, %c0_8] : memref<1x20x18x4xbf16, #tpu.memory_space<vmem>>, vector<1x18x16x4xbf16>
    %4 = vector.shape_cast %3 : vector<1x18x16x4xbf16> to vector<18x16x4xbf16>
    %c0_9 = arith.constant 0 : index
    %c0_10 = arith.constant 0 : index
    %c4 = arith.constant 4 : index
    %5 = vector.load %arg8[%c0_9, %c0_10, %c4] : memref<18x16x128xbf16, #tpu.memory_space<vmem>>, vector<18x16x4xbf16>
    tpu.vector_store %arg8[%c0_9, %c0_10, %c4], %4 {strides = array<i32>} : memref<18x16x128xbf16, #tpu.memory_space<vmem>>, vector<18x16x4xbf16>,
    %c0_11 = arith.constant 0 : index
    %c0_12 = arith.constant 0 : index
    %c2 = arith.constant 2 : index
    %c0_13 = arith.constant 0 : index
    %6 = vector.load %arg2[%c0_11, %c0_12, %c2, %c0_13] : memref<1x20x18x4xbf16, #tpu.memory_space<vmem>>, vector<1x18x16x4xbf16>
    %7 = vector.shape_cast %6 : vector<1x18x16x4xbf16> to vector<18x16x4xbf16>
    %c0_14 = arith.constant 0 : index
    %c0_15 = arith.constant 0 : index
    %c8 = arith.constant 8 : index
    %8 = vector.load %arg8[%c0_14, %c0_15, %c8] : memref<18x16x128xbf16, #tpu.memory_space<vmem>>, vector<18x16x4xbf16>
    tpu.vector_store %arg8[%c0_14, %c0_15, %c8], %7 {strides = array<i32>} : memref<18x16x128xbf16, #tpu.memory_space<vmem>>, vector<18x16x4xbf16>,
    %c0_16 = arith.constant 0 : index
    %c1_17 = arith.constant 1 : index
    %c0_18 = arith.constant 0 : index
    %c0_19 = arith.constant 0 : index
    %9 = vector.load %arg2[%c0_16, %c1_17, %c0_18, %c0_19] : memref<1x20x18x4xbf16, #tpu.memory_space<vmem>>, vector<1x18x16x4xbf16>
    %10 = vector.shape_cast %9 : vector<1x18x16x4xbf16> to vector<18x16x4xbf16>
    %c0_20 = arith.constant 0 : index
    %c0_21 = arith.constant 0 : index
    %c12 = arith.constant 12 : index
    %11 = vector.load %arg8[%c0_20, %c0_21, %c12] : memref<18x16x128xbf16, #tpu.memory_space<vmem>>, vector<18x16x4xbf16>
    tpu.vector_store %arg8[%c0_20, %c0_21, %c12], %10 {strides = array<i32>} : memref<18x16x128xbf16, #tpu.memory_space<vmem>>, vector<18x16x4xbf16>,
    %c0_22 = arith.constant 0 : index
    %c1_23 = arith.constant 1 : index
    %c1_24 = arith.constant 1 : index
    %c0_25 = arith.constant 0 : index
    %12 = vector.load %arg2[%c0_22, %c1_23, %c1_24, %c0_25] : memref<1x20x18x4xbf16, #tpu.memory_space<vmem>>, vector<1x18x16x4xbf16>
    %13 = vector.shape_cast %12 : vector<1x18x16x4xbf16> to vector<18x16x4xbf16>
    %c0_26 = arith.constant 0 : index
    %c0_27 = arith.constant 0 : index
    %c16 = arith.constant 16 : index
    %14 = vector.load %arg8[%c0_26, %c0_27, %c16] : memref<18x16x128xbf16, #tpu.memory_space<vmem>>, vector<18x16x4xbf16>
    tpu.vector_store %arg8[%c0_26, %c0_27, %c16], %13 {strides = array<i32>} : memref<18x16x128xbf16, #tpu.memory_space<vmem>>, vector<18x16x4xbf16>,
    %c0_28 = arith.constant 0 : index
    %c1_29 = arith.constant 1 : index
    %c2_30 = arith.constant 2 : index
    %c0_31 = arith.constant 0 : index
    %15 = vector.load %arg2[%c0_28, %c1_29, %c2_30, %c0_31] : memref<1x20x18x4xbf16, #tpu.memory_space<vmem>>, vector<1x18x16x4xbf16>
    %16 = vector.shape_cast %15 : vector<1x18x16x4xbf16> to vector<18x16x4xbf16>
    %c0_32 = arith.constant 0 : index
    %c0_33 = arith.constant 0 : index
    %c20 = arith.constant 20 : index
    %17 = vector.load %arg8[%c0_32, %c0_33, %c20] : memref<18x16x128xbf16, #tpu.memory_space<vmem>>, vector<18x16x4xbf16>
    tpu.vector_store %arg8[%c0_32, %c0_33, %c20], %16 {strides = array<i32>} : memref<18x16x128xbf16, #tpu.memory_space<vmem>>, vector<18x16x4xbf16>,
    %c0_34 = arith.constant 0 : index
    %c2_35 = arith.constant 2 : index
    %c0_36 = arith.constant 0 : index
    %c0_37 = arith.constant 0 : index
    %18 = vector.load %arg2[%c0_34, %c2_35, %c0_36, %c0_37] : memref<1x20x18x4xbf16, #tpu.memory_space<vmem>>, vector<1x18x16x4xbf16>
    %19 = vector.shape_cast %18 : vector<1x18x16x4xbf16> to vector<18x16x4xbf16>
    %c0_38 = arith.constant 0 : index
    %c0_39 = arith.constant 0 : index
    %c24 = arith.constant 24 : index
    %20 = vector.load %arg8[%c0_38, %c0_39, %c24] : memref<18x16x128xbf16, #tpu.memory_space<vmem>>, vector<18x16x4xbf16>
    tpu.vector_store %arg8[%c0_38, %c0_39, %c24], %19 {strides = array<i32>} : memref<18x16x128xbf16, #tpu.memory_space<vmem>>, vector<18x16x4xbf16>,
    %c0_40 = arith.constant 0 : index
    %c2_41 = arith.constant 2 : index
    %c1_42 = arith.constant 1 : index
    %c0_43 = arith.constant 0 : index
    %21 = vector.load %arg2[%c0_40, %c2_41, %c1_42, %c0_43] : memref<1x20x18x4xbf16, #tpu.memory_space<vmem>>, vector<1x18x16x4xbf16>
    %22 = vector.shape_cast %21 : vector<1x18x16x4xbf16> to vector<18x16x4xbf16>
    %c0_44 = arith.constant 0 : index
    %c0_45 = arith.constant 0 : index
    %c28 = arith.constant 28 : index
    %23 = vector.load %arg8[%c0_44, %c0_45, %c28] : memref<18x16x128xbf16, #tpu.memory_space<vmem>>, vector<18x16x4xbf16>
    tpu.vector_store %arg8[%c0_44, %c0_45, %c28], %22 {strides = array<i32>} : memref<18x16x128xbf16, #tpu.memory_space<vmem>>, vector<18x16x4xbf16>,
    %c0_46 = arith.constant 0 : index
    %c2_47 = arith.constant 2 : index
    %c2_48 = arith.constant 2 : index
    %c0_49 = arith.constant 0 : index
    %24 = vector.load %arg2[%c0_46, %c2_47, %c2_48, %c0_49] : memref<1x20x18x4xbf16, #tpu.memory_space<vmem>>, vector<1x18x16x4xbf16>
    %25 = vector.shape_cast %24 : vector<1x18x16x4xbf16> to vector<18x16x4xbf16>
    %c0_50 = arith.constant 0 : index
    %c0_51 = arith.constant 0 : index
    %c32 = arith.constant 32 : index
    %26 = vector.load %arg8[%c0_50, %c0_51, %c32] : memref<18x16x128xbf16, #tpu.memory_space<vmem>>, vector<18x16x4xbf16>
    tpu.vector_store %arg8[%c0_50, %c0_51, %c32], %25 {strides = array<i32>} : memref<18x16x128xbf16, #tpu.memory_space<vmem>>, vector<18x16x4xbf16>,
    %cst = arith.constant 0.000000e+00 : bf16
    %27 = vector.broadcast %cst : bf16 to vector<18x16x92xbf16>
    %c0_52 = arith.constant 0 : index
    %c0_53 = arith.constant 0 : index
    %c36 = arith.constant 36 : index
    %28 = vector.load %arg8[%c0_52, %c0_53, %c36] : memref<18x16x128xbf16, #tpu.memory_space<vmem>>, vector<18x16x92xbf16>
    tpu.vector_store %arg8[%c0_52, %c0_53, %c36], %27 {strides = array<i32>} : memref<18x16x128xbf16, #tpu.memory_space<vmem>>, vector<18x16x92xbf16>,
    %c0_54 = arith.constant 0 : index
    %c0_55 = arith.constant 0 : index
    %c0_56 = arith.constant 0 : index
    %29 = vector.load %arg8[%c0_54, %c0_55, %c0_56] : memref<18x16x128xbf16, #tpu.memory_space<vmem>>, vector<18x16x128xbf16>
    %30 = vector.shape_cast %29 : vector<18x16x128xbf16> to vector<288x128xbf16>
    %c0_57 = arith.constant 0 : index
    %c0_58 = arith.constant 0 : index
    %31 = vector.load %arg3[%c0_57, %c0_58] : memref<128x8xbf16, #tpu.memory_space<vmem>>, vector<128x8xbf16>
    %cst_59 = arith.constant dense<0.000000e+00> : vector<288x8xf32>
    %32 = tpu.matmul %30, %31, %cst_59 {dimension_numbers = #tpu.dot_dimension_numbers<[1], [0], [0], [1], [0, 0, 1, 1], [], []>} : vector<288x128xbf16>, vector<128x8xbf16>, vector<288x8xf32> -> vector<288x8xf32>
    %c0_60 = arith.constant 0 : index
    %c0_61 = arith.constant 0 : index
    %33 = vector.load %arg4[%c0_60, %c0_61] : memref<1x8xf32, #tpu.memory_space<vmem>>, vector<1x8xf32>
    %34 = vector.broadcast %33 : vector<1x8xf32> to vector<288x8xf32>
    %35 = arith.addf %32, %34 : vector<288x8xf32>
    %cst_62 = arith.constant 0.000000e+00 : f32
    %36 = vector.broadcast %cst_62 : f32 to vector<288x8xf32>
    %37 = arith.maximumf %35, %36 : vector<288x8xf32>
    %38 = vector.shape_cast %37 : vector<288x8xf32> to vector<18x16x8xf32>
    %c16_i32 = arith.constant 16 : i32
    %39 = arith.muli %arg1, %c16_i32 : i32
    %c1_i32 = arith.constant 1 : i32
    %40 = arith.subi %39, %c1_i32 : i32
    %41 = tpu.iota {dimensions = array<i32: 0>} : vector<18x1x1xi32>
    %42 = vector.broadcast %40 : i32 to vector<18x1x1xi32>
    %43 = arith.addi %42, %41 : vector<18x1x1xi32>
    %c0_i32 = arith.constant 0 : i32
    %44 = vector.broadcast %c0_i32 : i32 to vector<18x1x1xi32>
    %45 = arith.cmpi sge, %43, %44 : vector<18x1x1xi32>
    %c16_i32_63 = arith.constant 16 : i32
    %46 = vector.broadcast %c16_i32_63 : i32 to vector<18x1x1xi32>
    %47 = arith.cmpi slt, %43, %46 : vector<18x1x1xi32>
    %48 = arith.andi %45, %47 : vector<18x1x1xi1>
    %cst_64 = arith.constant 0.000000e+00 : f32
    %49 = vector.shape_cast %48 : vector<18x1x1xi1> to vector<18x1x1xi1>
    %50 = vector.broadcast %49 : vector<18x1x1xi1> to vector<18x16x8xi1>
    %51 = vector.broadcast %cst_64 : f32 to vector<18x16x8xf32>
    %52 = arith.select %50, %38, %51 : vector<18x16x8xi1>, vector<18x16x8xf32>
    %53 = arith.truncf %52 : vector<18x16x8xf32> to vector<18x16x8xbf16>
    %c0_65 = arith.constant 0 : index
    %c1_66 = arith.constant 1 : index
    %c0_67 = arith.constant 0 : index
    %54 = vector.load %arg9[%c0_65, %c1_66, %c0_67] : memref<18x18x8xbf16, #tpu.memory_space<vmem>>, vector<18x16x8xbf16>
    tpu.vector_store %arg9[%c0_65, %c1_66, %c0_67], %53 {strides = array<i32>} : memref<18x18x8xbf16, #tpu.memory_space<vmem>>, vector<18x16x8xbf16>,
    %cst_68 = arith.constant 0.000000e+00 : bf16
    %55 = vector.broadcast %cst_68 : bf16 to vector<18x1x8xbf16>
    %c0_69 = arith.constant 0 : index
    %c0_70 = arith.constant 0 : index
    %c0_71 = arith.constant 0 : index
    %56 = vector.load %arg9[%c0_69, %c0_70, %c0_71] : memref<18x18x8xbf16, #tpu.memory_space<vmem>>, vector<18x1x8xbf16>
    tpu.vector_store %arg9[%c0_69, %c0_70, %c0_71], %55 {strides = array<i32>} : memref<18x18x8xbf16, #tpu.memory_space<vmem>>, vector<18x1x8xbf16>,
    %cst_72 = arith.constant 0.000000e+00 : bf16
    %57 = vector.broadcast %cst_72 : bf16 to vector<18x1x8xbf16>
    %c0_73 = arith.constant 0 : index
    %c17 = arith.constant 17 : index
    %c0_74 = arith.constant 0 : index
    %58 = vector.load %arg9[%c0_73, %c17, %c0_74] : memref<18x18x8xbf16, #tpu.memory_space<vmem>>, vector<18x1x8xbf16>
    tpu.vector_store %arg9[%c0_73, %c17, %c0_74], %57 {strides = array<i32>} : memref<18x18x8xbf16, #tpu.memory_space<vmem>>, vector<18x1x8xbf16>,
    %c0_75 = arith.constant 0 : index
    %c0_76 = arith.constant 0 : index
    %c0_77 = arith.constant 0 : index
    %59 = vector.load %arg9[%c0_75, %c0_76, %c0_77] : memref<18x18x8xbf16, #tpu.memory_space<vmem>>, vector<16x16x8xbf16>
    %c0_78 = arith.constant 0 : index
    %c0_79 = arith.constant 0 : index
    %c0_80 = arith.constant 0 : index
    %60 = vector.load %arg10[%c0_78, %c0_79, %c0_80] : memref<16x16x128xbf16, #tpu.memory_space<vmem>>, vector<16x16x8xbf16>
    tpu.vector_store %arg10[%c0_78, %c0_79, %c0_80], %59 {strides = array<i32>} : memref<16x16x128xbf16, #tpu.memory_space<vmem>>, vector<16x16x8xbf16>,
    %c0_81 = arith.constant 0 : index
    %c1_82 = arith.constant 1 : index
    %c0_83 = arith.constant 0 : index
    %61 = vector.load %arg9[%c0_81, %c1_82, %c0_83] : memref<18x18x8xbf16, #tpu.memory_space<vmem>>, vector<16x16x8xbf16>
    %c0_84 = arith.constant 0 : index
    %c0_85 = arith.constant 0 : index
    %c8_86 = arith.constant 8 : index
    %62 = vector.load %arg10[%c0_84, %c0_85, %c8_86] : memref<16x16x128xbf16, #tpu.memory_space<vmem>>, vector<16x16x8xbf16>
    tpu.vector_store %arg10[%c0_84, %c0_85, %c8_86], %61 {strides = array<i32>} : memref<16x16x128xbf16, #tpu.memory_space<vmem>>, vector<16x16x8xbf16>,
    %c0_87 = arith.constant 0 : index
    %c2_88 = arith.constant 2 : index
    %c0_89 = arith.constant 0 : index
    %63 = vector.load %arg9[%c0_87, %c2_88, %c0_89] : memref<18x18x8xbf16, #tpu.memory_space<vmem>>, vector<16x16x8xbf16>
    %c0_90 = arith.constant 0 : index
    %c0_91 = arith.constant 0 : index
    %c16_92 = arith.constant 16 : index
    %64 = vector.load %arg10[%c0_90, %c0_91, %c16_92] : memref<16x16x128xbf16, #tpu.memory_space<vmem>>, vector<16x16x8xbf16>
    tpu.vector_store %arg10[%c0_90, %c0_91, %c16_92], %63 {strides = array<i32>} : memref<16x16x128xbf16, #tpu.memory_space<vmem>>, vector<16x16x8xbf16>,
    %c1_93 = arith.constant 1 : index
    %c0_94 = arith.constant 0 : index
    %c0_95 = arith.constant 0 : index
    %65 = vector.load %arg9[%c1_93, %c0_94, %c0_95] : memref<18x18x8xbf16, #tpu.memory_space<vmem>>, vector<16x16x8xbf16>
    %c0_96 = arith.constant 0 : index
    %c0_97 = arith.constant 0 : index
    %c24_98 = arith.constant 24 : index
    %66 = vector.load %arg10[%c0_96, %c0_97, %c24_98] : memref<16x16x128xbf16, #tpu.memory_space<vmem>>, vector<16x16x8xbf16>
    tpu.vector_store %arg10[%c0_96, %c0_97, %c24_98], %65 {strides = array<i32>} : memref<16x16x128xbf16, #tpu.memory_space<vmem>>, vector<16x16x8xbf16>,
    %c1_99 = arith.constant 1 : index
    %c1_100 = arith.constant 1 : index
    %c0_101 = arith.constant 0 : index
    %67 = vector.load %arg9[%c1_99, %c1_100, %c0_101] : memref<18x18x8xbf16, #tpu.memory_space<vmem>>, vector<16x16x8xbf16>
    %c0_102 = arith.constant 0 : index
    %c0_103 = arith.constant 0 : index
    %c32_104 = arith.constant 32 : index
    %68 = vector.load %arg10[%c0_102, %c0_103, %c32_104] : memref<16x16x128xbf16, #tpu.memory_space<vmem>>, vector<16x16x8xbf16>
    tpu.vector_store %arg10[%c0_102, %c0_103, %c32_104], %67 {strides = array<i32>} : memref<16x16x128xbf16, #tpu.memory_space<vmem>>, vector<16x16x8xbf16>,
    %c1_105 = arith.constant 1 : index
    %c2_106 = arith.constant 2 : index
    %c0_107 = arith.constant 0 : index
    %69 = vector.load %arg9[%c1_105, %c2_106, %c0_107] : memref<18x18x8xbf16, #tpu.memory_space<vmem>>, vector<16x16x8xbf16>
    %c0_108 = arith.constant 0 : index
    %c0_109 = arith.constant 0 : index
    %c40 = arith.constant 40 : index
    %70 = vector.load %arg10[%c0_108, %c0_109, %c40] : memref<16x16x128xbf16, #tpu.memory_space<vmem>>, vector<16x16x8xbf16>
    tpu.vector_store %arg10[%c0_108, %c0_109, %c40], %69 {strides = array<i32>} : memref<16x16x128xbf16, #tpu.memory_space<vmem>>, vector<16x16x8xbf16>,
    %c2_110 = arith.constant 2 : index
    %c0_111 = arith.constant 0 : index
    %c0_112 = arith.constant 0 : index
    %71 = vector.load %arg9[%c2_110, %c0_111, %c0_112] : memref<18x18x8xbf16, #tpu.memory_space<vmem>>, vector<16x16x8xbf16>
    %c0_113 = arith.constant 0 : index
    %c0_114 = arith.constant 0 : index
    %c48 = arith.constant 48 : index
    %72 = vector.load %arg10[%c0_113, %c0_114, %c48] : memref<16x16x128xbf16, #tpu.memory_space<vmem>>, vector<16x16x8xbf16>
    tpu.vector_store %arg10[%c0_113, %c0_114, %c48], %71 {strides = array<i32>} : memref<16x16x128xbf16, #tpu.memory_space<vmem>>, vector<16x16x8xbf16>,
    %c2_115 = arith.constant 2 : index
    %c1_116 = arith.constant 1 : index
    %c0_117 = arith.constant 0 : index
    %73 = vector.load %arg9[%c2_115, %c1_116, %c0_117] : memref<18x18x8xbf16, #tpu.memory_space<vmem>>, vector<16x16x8xbf16>
    %c0_118 = arith.constant 0 : index
    %c0_119 = arith.constant 0 : index
    %c56 = arith.constant 56 : index
    %74 = vector.load %arg10[%c0_118, %c0_119, %c56] : memref<16x16x128xbf16, #tpu.memory_space<vmem>>, vector<16x16x8xbf16>
    tpu.vector_store %arg10[%c0_118, %c0_119, %c56], %73 {strides = array<i32>} : memref<16x16x128xbf16, #tpu.memory_space<vmem>>, vector<16x16x8xbf16>,
    %c2_120 = arith.constant 2 : index
    %c2_121 = arith.constant 2 : index
    %c0_122 = arith.constant 0 : index
    %75 = vector.load %arg9[%c2_120, %c2_121, %c0_122] : memref<18x18x8xbf16, #tpu.memory_space<vmem>>, vector<16x16x8xbf16>
    %c0_123 = arith.constant 0 : index
    %c0_124 = arith.constant 0 : index
    %c64 = arith.constant 64 : index
    %76 = vector.load %arg10[%c0_123, %c0_124, %c64] : memref<16x16x128xbf16, #tpu.memory_space<vmem>>, vector<16x16x8xbf16>
    tpu.vector_store %arg10[%c0_123, %c0_124, %c64], %75 {strides = array<i32>} : memref<16x16x128xbf16, #tpu.memory_space<vmem>>, vector<16x16x8xbf16>,
    %cst_125 = arith.constant 0.000000e+00 : bf16
    %77 = vector.broadcast %cst_125 : bf16 to vector<16x16x56xbf16>
    %c0_126 = arith.constant 0 : index
    %c0_127 = arith.constant 0 : index
    %c72 = arith.constant 72 : index
    %78 = vector.load %arg10[%c0_126, %c0_127, %c72] : memref<16x16x128xbf16, #tpu.memory_space<vmem>>, vector<16x16x56xbf16>
    tpu.vector_store %arg10[%c0_126, %c0_127, %c72], %77 {strides = array<i32>} : memref<16x16x128xbf16, #tpu.memory_space<vmem>>, vector<16x16x56xbf16>,
    %c0_128 = arith.constant 0 : index
    %c0_129 = arith.constant 0 : index
    %c0_130 = arith.constant 0 : index
    %79 = vector.load %arg10[%c0_128, %c0_129, %c0_130] : memref<16x16x128xbf16, #tpu.memory_space<vmem>>, vector<16x16x128xbf16>
    %80 = vector.shape_cast %79 : vector<16x16x128xbf16> to vector<256x128xbf16>
    %c0_131 = arith.constant 0 : index
    %c0_132 = arith.constant 0 : index
    %81 = vector.load %arg5[%c0_131, %c0_132] : memref<128x8xbf16, #tpu.memory_space<vmem>>, vector<128x8xbf16>
    %cst_133 = arith.constant dense<0.000000e+00> : vector<256x8xf32>
    %82 = tpu.matmul %80, %81, %cst_133 {dimension_numbers = #tpu.dot_dimension_numbers<[1], [0], [0], [1], [0, 0, 1, 1], [], []>} : vector<256x128xbf16>, vector<128x8xbf16>, vector<256x8xf32> -> vector<256x8xf32>
    %c0_134 = arith.constant 0 : index
    %c0_135 = arith.constant 0 : index
    %83 = vector.load %arg6[%c0_134, %c0_135] : memref<1x8xf32, #tpu.memory_space<vmem>>, vector<1x8xf32>
    %84 = vector.broadcast %83 : vector<1x8xf32> to vector<256x8xf32>
    %85 = arith.addf %82, %84 : vector<256x8xf32>
    %cst_136 = arith.constant 0.000000e+00 : f32
    %86 = vector.broadcast %cst_136 : f32 to vector<256x8xf32>
    %87 = arith.maximumf %85, %86 : vector<256x8xf32>
    %88 = vector.shape_cast %87 : vector<256x8xf32> to vector<16x16x8xf32>
    %89 = arith.truncf %88 : vector<16x16x8xf32> to vector<16x16x8xbf16>
    %c0_137 = arith.constant 0 : index
    %c0_138 = arith.constant 0 : index
    %c0_139 = arith.constant 0 : index
    %c0_140 = arith.constant 0 : index
    %90 = vector.load %arg7[%c0_137, %c0_138, %c0_139, %c0_140] : memref<1x16x16x8xbf16, #tpu.memory_space<vmem>>, vector<1x16x16x8xbf16>
    %91 = vector.shape_cast %90 : vector<1x16x16x8xbf16> to vector<16x16x8xbf16>
    %92 = vector.shape_cast %89 : vector<16x16x8xbf16> to vector<1x16x16x8xbf16>
    tpu.vector_store %arg7[%c0_137, %c0_138, %c0_139, %c0_140], %92 {strides = array<i32>} : memref<1x16x16x8xbf16, #tpu.memory_space<vmem>>, vector<1x16x16x8xbf16>,
    return
  }
  func.func @transform_0(%arg0: i32, %arg1: i32) -> (i32, i32, i32, i32) {
    %c1_i32 = arith.constant 1 : i32
    %0 = arith.muli %arg0, %c1_i32 : i32
    %1 = arith.addi %0, %arg1 : i32
    %c0_i32 = arith.constant 0 : i32
    %c0_i32_0 = arith.constant 0 : i32
    %c0_i32_1 = arith.constant 0 : i32
    %c0_i32_2 = arith.constant 0 : i32
    return %1, %c0_i32, %c0_i32_0, %c0_i32_1 : i32, i32, i32, i32
  }
  func.func @transform_1(%arg0: i32, %arg1: i32) -> (i32, i32) {
    %c0_i32 = arith.constant 0 : i32
    %c0_i32_0 = arith.constant 0 : i32
    %c0_i32_1 = arith.constant 0 : i32
    return %c0_i32, %c0_i32_0 : i32, i32
  }
  func.func @transform_2(%arg0: i32, %arg1: i32) -> (i32, i32) {
    %c0_i32 = arith.constant 0 : i32
    %c0_i32_0 = arith.constant 0 : i32
    %c0_i32_1 = arith.constant 0 : i32
    return %c0_i32, %c0_i32_0 : i32, i32
  }
  func.func @transform_3(%arg0: i32, %arg1: i32) -> (i32, i32) {
    %c0_i32 = arith.constant 0 : i32
    %c0_i32_0 = arith.constant 0 : i32
    %c0_i32_1 = arith.constant 0 : i32
    return %c0_i32, %c0_i32_0 : i32, i32
  }
  func.func @transform_4(%arg0: i32, %arg1: i32) -> (i32, i32) {
    %c0_i32 = arith.constant 0 : i32
    %c0_i32_0 = arith.constant 0 : i32
    %c0_i32_1 = arith.constant 0 : i32
    return %c0_i32, %c0_i32_0 : i32, i32
  }
  func.func @transform_5(%arg0: i32, %arg1: i32) -> (i32, i32, i32, i32) {
    %c0_i32 = arith.constant 0 : i32
    %c0_i32_0 = arith.constant 0 : i32
    %c0_i32_1 = arith.constant 0 : i32
    return %arg0, %arg1, %c0_i32, %c0_i32_0 : i32, i32, i32, i32
  }
}

</mosaic_0001>

<bundles_post_ra>
// kernel: conv_block_forward.1
= control target key start
LH: loop header
LB: loop body
LE: loop exit
PB: predicated region body
PF: predicated region fallthrough
CT: control target
= control target key end

     0   :  { %s9393_s18 = smov 0   ;;  %s9395_s19 = smov 0   ;;  %s11183_s0 = inlined_call_operand.vmem [shape: bf16[2,20,18,4], index: 0, kind: input, shape index: {}]   ;;  %s11184_s1 = inlined_call_operand.vmem [shape: bf16[128,8], index: 1, kind: input, shape index: {}]   ;;  %s11185_s2 = inlined_call_operand.vmem [shape: f32[1,8], index: 2, kind: input, shape index: {}]   ;;  %s11186_s3 = inlined_call_operand.vmem [shape: bf16[128,8], index: 3, kind: input, shape index: {}]   ;;  %s11187_s4 = inlined_call_operand.vmem [shape: f32[1,8], index: 4, kind: input, shape index: {}]   ;;  %s11188_s5 = inlined_call_operand.vmem [shape: bf16[2,16,16,8], index: 5, kind: output, shape index: {}]  }
   0x1   :  { %s9397_s20 = smov 0  }
   0x2 LB: > { %s27_s21 = sadd.s32 1, %s9343_s19  ;;  %p7653_p0 = scmp.ge.s32.totalorder %s9347_s20, 1  ;;  %s9347_s20 = sphi %s9397_s20, %s15_s20   ;;  %s9343_s19 = sphi %s9395_s19, %s11355_s19   ;;  %s9339_s18 = sphi %s9393_s18, %s11354_s18  }
   0x3   : > { %p29_p1 = scmp.ge.s32.totalorder %s27_s21, 2  ;;  %p205_p2 = scmp.lt.s32.totalorder %s9347_s20, 3 }
   0x5   : > { %s11357_s21 = smov (%p29_p1, %s27_s21), 0  ;;  %p206_p3 = pnand %p7653_p0, %p205_p2 }
   0x6   : > { %p240_p4 = scmp.lt.s32.totalorder (!%p206_p3), %s9339_s18, 1  ;;  %vm11189_vm0 = vcmask (!%p206_p3), 1046528   ;;  %s9349_s26 = smov (!%p206_p3), 12   ;;  %vm11190_vm1 = vsmask.f32 (!%p206_p3), 7424  ;;  %vm402_vm2 = vcmask (!%p206_p3), 31744  }
   0x7   : > { %209 = sbr.rel (%p206_p3) target bundleno = 1083 (0x43b), region = 40  ;;  %s9350_s27 = smov (!%p206_p3), 20   ;;  %vm890_vm3 = vcmask (!%p206_p3), 64544   ;;  %vm1216_vm4 = vcmask (!%p206_p3), 97344   ;;  %vm1416_vm5 = vcmask (!%p206_p3), 130144   ;;  %vm1903_vm6 = vcmask (!%p206_p3), 162944  }
   0x8   : > { %s9351_s28 = smov (!%p206_p3), 8   ;;  %s9352_s29 = smov (!%p206_p3), 4   ;;  %vm11191_vm7 = vcmask (!%p206_p3), 195744   ;;  %vm2428_vm8 = vcmask (!%p206_p3), 228544   ;;  %vm2915_vm9 = vcmask (!%p206_p3), 261344   ;;  %vm3240_vm10 = vcmask (!%p206_p3), 294144  }
   0x9   : > { %s9353_s30 = smov (!%p206_p3), 16   ;;  %s9354_s6 = smov (!%p206_p3), 24   ;;  %vm3259_vm11 = vcmask (!%p206_p3), 1047840   ;;  %vm11192_vm12 = vcmask (!%p206_p3), 60416   ;;  %vm3834_vm13 = vsmask.f32 (!%p206_p3), 256 }
   0xa   : > { %s9355_s7 = smov (!%p206_p3), 28   ;;  %s9356_s8 = smov (!%p206_p3), 32   ;;  %vm4198_vm14 = vsmask.f32 (!%p206_p3), 7938  ;;  %vm4205_vm15 = vcmask (!%p206_p3), 57344  }
   0xb   : > { %s9362_s13 = smov (!%p206_p3), 56  }
   0xe   : > { %s11359_s18 = smov (!%p240_p4, %s9339_s18), 1 }
   0xf   : > { %s8758_s22 = smul.u32 240, %s11359_s18 }
  0x11   : > { %s9417_s25 = scalar_lea.vmem %s11183_s0, %s8758_s22 }
  0x12   : > { %v8797_v0 = vld [vmem:[%s9417_s25 + $0x18] sm:$0xff]   ;;  %v8798_v1 = vld [vmem:[%s9417_s25 + $0xc] sm:$0xff]   ;;  %v8800_v3 = vld [vmem:[%s9417_s25 + $0x14] ss:$0 sps:$4 sm:$0x11]  }
  0x13   : > { %1364 = vrot.lane.b32.xlu1 %v8797_v0, %s9349_s26  ;;  %1362 = vrot.lane.b32.xlu0 %v8798_v1, %s9349_s26  ;;  %v8799_v2 = vld [vmem:[%s9417_s25 + $0xc] sm:$0xfe]   ;;  %v8805_v4 = vld [vmem:[%s9417_s25] sm:$0xff]   ;;  %v2121_v6 = vrot.slane %v8800_v3, 1 }
  0x14   : > { %v2120_v5 = vrot.slane %v8799_v2, 1  ;;  %v8801_v7 = vld [vmem:[%s9417_s25] sm:$0xfe]   ;;  %v8802_v8 = vld [vmem:[%s9417_s25 + $0x8] ss:$0 sps:$4 sm:$0x11]  }
  0x15   : > { %v621_v9 = vshrl.u32 %v8805_v4, 16  ;;  %v1108_v11 = vrot.slane %v8801_v7, 1  ;;  %v8803_v12 = vld [vmem:[%s9417_s25 + $0xc] sm:$0xfe]   ;;  %v623_v13 = vshll.u32 %v8805_v4, 16  ;;  %v1109_v14 = vrot.slane %v8802_v8, 1 }
  0x16   : > { %v2122_v10 = vsel %vm11189_vm0, %v2120_v5, %v2121_v6  ;;  %v8804_v15 = vld [vmem:[%s9417_s25 + $0x14] ss:$0 sps:$4 sm:$0x11]   ;;  %v1111_v16 = vrot.slane %v8803_v12, 1  ;;  %v8807_v21 = vld [vmem:[%s9417_s25 + $0x18] sm:$0xfe]  }
  0x17   : > { %2174 = vrot.lane.b32.xlu0 %v2122_v10, %s9350_s27  ;;  %v625_v17 = vrot.slane %v623_v13, 1  ;;  %v1110_v18 = vsel %vm11189_vm0, %v1108_v11, %v1109_v14  ;;  %v1112_v19 = vrot.slane %v8804_v15, 1  ;;  %v8806_v20 = vld [vmem:[%s9417_s25 + $0x8] ss:$0 sps:$4 sm:$0x11]   ;;  %v2123_v26 = vrot.slane %v8807_v21, 1 }
  0x18   : > { %1162 = vrot.lane.b32.xlu1 %v1110_v18, %s9351_s28  ;;  %v628_v24 = vshll.u32 %v8806_v20, 16  ;;  %v8808_v25 = vld [vmem:[%s9417_s25 + $0x20] ss:$0 sps:$4 sm:$0x11]   ;;  %v8809_v27 = vld [vmem:[%s9417_s25 + $0xc] sm:$0xff]   ;;  %v8811_v31 = vld [vmem:[%s9417_s25 + $0x18] sm:$0xff]  }
  0x19   : > { %v1113_v22 = vsel %vm11189_vm0, %v1111_v16, %v1112_v19  ;;  %v626_v23 = vor.u32 %v625_v17, %v621_v9  ;;  %v2124_v29 = vrot.slane %v8808_v25, 1  ;;  %v8810_v30 = vld [vmem:[%s9417_s25 + $0x14] ss:$0 sps:$4 sm:$0x11]   ;;  %v633_v32 = vshrl.u32 %v8809_v27, 16  ;;  %v8813_v41 = vld [vmem:[%s9417_s25 + $0xc] sm:$0xff]  }
  0x1a   : > { %v630_v28 = vrot.slane %v628_v24, 1  ;;  %v635_v33 = vshll.u32 %v8809_v27, 16  ;;  %v640_v36 = vshll.u32 %v8810_v30, 16  ;;  %v8812_v37 = vld [vmem:[%s9417_s25 + $0x20] ss:$0 sps:$4 sm:$0x11]  }
  0x1b   : > { %v2125_v35 = vsel %vm11189_vm0, %v2123_v26, %v2124_v29  ;;  %v1646_v39 = vshrl.u32 %v8811_v31, 16  ;;  %v1648_v40 = vshll.u32 %v8811_v31, 16  ;;  %v1653_v43 = vshll.u32 %v8812_v37, 16  ;;  %v8814_v46 = vld [vmem:[%s9417_s25 + $0x14] ss:$0 sps:$4 sm:$0x11]  }
  0x1c   : > { %1164 = vrot.lane.b32.xlu1 %v1113_v22, %s9351_s28  ;;  %v631_v34 = vsel %vm11190_vm1, %v626_v23, %v630_v28  ;;  %v637_v38 = vrot.slane %v635_v33, 1  ;;  %v642_v42 = vrot.slane %v640_v36, 1  ;;  %v1634_v47 = vshrl.u32 %v8813_v41, 16  ;;  %v8816_v54 = vld [vmem:[%s9417_s25 + $0x24] sm:$0xff]   ;;  %v8817_v58 = vld [vmem:[%s9417_s25 + $0x18] sm:$0xff]  }
  0x1d   : > { %836 = vrot.lane.b32.xlu0 %v631_v34, %s9352_s29  ;;  %v1650_v45 = vrot.slane %v1648_v40, 1  ;;  %v1636_v48 = vshll.u32 %v8813_v41, 16  ;;  %v1655_v49 = vrot.slane %v1653_v43, 1  ;;  %v1641_v53 = vshll.u32 %v8814_v46, 16  ;;  %v8815_v59 = vld [vmem:[%s9417_s25 + $0x18] sm:$0xff]   ;;  %v8819_v61 = vld [vmem:[%s9417_s25 + $0x24] sm:$0xff]  }
  0x1e   : > { %v638_v44 = vor.u32 %v637_v38, %v633_v32  ;;  %v8818_v60 = vld [vmem:[%s9417_s25 + $0x20] ss:$0 sps:$4 sm:$0x11]   ;;  %v2646_v63 = vshrl.u32 %v8817_v58, 16  ;;  %v2648_v0 = vshll.u32 %v8817_v58, 16  ;;  %v2658_v3 = vshrl.u32 %v8819_v61, 16 }
  0x1f   : > { %v1651_v51 = vor.u32 %v1650_v45, %v1646_v39  ;;  %v1638_v52 = vrot.slane %v1636_v48, 1  ;;  %v1643_v57 = vrot.slane %v1641_v53, 1  ;;  %v2653_v1 = vshll.u32 %v8818_v60, 16  ;;  %v8820_v2 = vld [vmem:[%s9417_s25 + $0x2c] ss:$0 sps:$4 sm:$0x11]  }
  0x20   : > { %2176 = vrot.lane.b32.xlu1 %v2125_v35, %s9350_s27  ;;  %v643_v50 = vsel %vm11190_vm1, %v638_v44, %v642_v42  ;;  %v2660_v4 = vshll.u32 %v8819_v61, 16  ;;  %v2650_v5 = vrot.slane %v2648_v0, 1  ;;  %v8823_v6 = vld [vmem:[%s9417_s25 + $0x18] sm:$0xff]   ;;  %v2665_v9 = vshll.u32 %v8820_v2, 16  ;;  %v8827_v11 = vld [vmem:[%s9417_s25 + $0x24] sm:$0xff]   ;;  %v8834_v58 = vld [vmem:[%s9417_s25 + $0x30] sm:$0xff]  }
  0x21   : > { %838 = vrot.lane.b32.xlu0 %v643_v50, %s9352_s29  ;;  %v1656_v55 = vsel %vm11190_vm1, %v1651_v51, %v1655_v49  ;;  %v1639_v56 = vor.u32 %v1638_v52, %v1634_v47  ;;  %v2655_v7 = vrot.slane %v2653_v1, 1  ;;  %v8821_v10 = vld [vmem:[%s9417_s25 + $0x18] sm:$0xfe]   ;;  %v8822_v13 = vld [vmem:[%s9417_s25 + $0x20] ss:$0 sps:$4 sm:$0x11]  }
  0x22   : > { %v2662_v8 = vrot.slane %v2660_v4, 1  ;;  %v2651_v12 = vor.u32 %v2650_v5, %v2646_v63  ;;  %v645_v14 = vshrl.u32 %v8823_v6, 16  ;;  %v2667_v16 = vrot.slane %v2665_v9, 1  ;;  %v8824_v20 = vld [vmem:[%s9417_s25 + $0x20] ss:$0 sps:$4 sm:$0x11]  }
  0x23   : > { %v1644_v62 = vsel %vm11190_vm1, %v1639_v56, %v1643_v57  ;;  %v3132_v17 = vrot.slane %v8821_v10, 1  ;;  %v3133_v19 = vrot.slane %v8822_v13, 1  ;;  %v647_v21 = vshll.u32 %v8823_v6, 16  ;;  %v8825_v26 = vld [vmem:[%s9417_s25 + $0x24] sm:$0xfe]   ;;  %v8837_v50 = vld [vmem:[%s9417_s25 + $0x30] sm:$0xff]  }
  0x24   : > { %1851 = vrot.lane.b32.xlu1 %v1656_v55, %s9353_s30  ;;  %v2663_v15 = vor.u32 %v2662_v8, %v2658_v3  ;;  %v2656_v18 = vsel %vm11190_vm1, %v2651_v12, %v2655_v7  ;;  %v657_v22 = vshrl.u32 %v8827_v11, 16  ;;  %v652_v25 = vshll.u32 %v8824_v20, 16  ;;  %v8826_v27 = vld [vmem:[%s9417_s25 + $0x2c] ss:$0 sps:$4 sm:$0x11]   ;;  %v8835_v47 = vld [vmem:[%s9417_s25 + $0x24] sm:$0xff]  }
  0x25   : > { %1849 = vrot.lane.b32.xlu0 %v1644_v62, %s9353_s30  ;;  %v649_v24 = vrot.slane %v647_v21, 1  ;;  %v659_v28 = vshll.u32 %v8827_v11, 16  ;;  %v3134_v29 = vsel %vm11189_vm0, %v3132_v17, %v3133_v19  ;;  %v3135_v32 = vrot.slane %v8825_v26, 1  ;;  %v8828_v34 = vld [vmem:[%s9417_s25 + $0x2c] ss:$0 sps:$4 sm:$0x11]  }
  0x26   : > { %v2668_v23 = vsel %vm11190_vm1, %v2663_v15, %v2667_v16  ;;  %v654_v31 = vrot.slane %v652_v25, 1  ;;  %v3136_v33 = vrot.slane %v8826_v27, 1  ;;  %v8829_v37 = vld [vmem:[%s9417_s25 + $0x18] sm:$0xfe]   ;;  %v664_v39 = vshll.u32 %v8828_v34, 16  ;;  %v8845_v16 = vld [vmem:[%s9417_s25 + $0x30] sm:$0xff]  }
  0x27   : > { %v650_v30 = vor.u32 %v649_v24, %v645_v14  ;;  %v661_v35 = vrot.slane %v659_v28, 1  ;;  %v8830_v40 = vld [vmem:[%s9417_s25 + $0x20] ss:$0 sps:$4 sm:$0x11]   ;;  %v1114_v42 = vrot.slane %v8829_v37, 1  ;;  %v1658_v53 = vshrl.u32 %v8835_v47, 16 }
  0x28   : > { %2376 = vrot.lane.b32.xlu1 %v8816_v54, %s9354_s6  ;;  %v3137_v41 = vsel %vm11189_vm0, %v3135_v32, %v3136_v33  ;;  %v666_v43 = vrot.slane %v664_v39, 1  ;;  %v1115_v44 = vrot.slane %v8830_v40, 1  ;;  %v8831_v45 = vld [vmem:[%s9417_s25 + $0x24] sm:$0xfe]   ;;  %v1660_v56 = vshll.u32 %v8835_v47, 16  ;;  %v8847_v21 = vld [vmem:[%s9417_s25 + $0x3c] sm:$0xff]  }
  0x29   : > { %2374 = vrot.lane.b32.xlu0 %v8815_v59, %s9354_s6  ;;  %v655_v36 = vsel %vm11190_vm1, %v650_v30, %v654_v31  ;;  %v662_v38 = vor.u32 %v661_v35, %v657_v22  ;;  %v8832_v46 = vld [vmem:[%s9417_s25 + $0x2c] ss:$0 sps:$4 sm:$0x11]   ;;  %v1117_v49 = vrot.slane %v8831_v45, 1  ;;  %v8833_v54 = vld [vmem:[%s9417_s25 + $0x24] sm:$0xff]   ;;  %v1670_v62 = vshrl.u32 %v8837_v50, 16 }
  0x2a   : > { %v1116_v51 = vsel %vm11189_vm0, %v1114_v42, %v1115_v44  ;;  %v1118_v52 = vrot.slane %v8832_v46, 1  ;;  %v8836_v55 = vld [vmem:[%s9417_s25 + $0x2c] ss:$0 sps:$4 sm:$0x11]   ;;  %v1662_v59 = vrot.slane %v1660_v56, 1  ;;  %v1672_v63 = vshll.u32 %v8837_v50, 16 }
  0x2b   : > { %v667_v48 = vsel %vm11190_vm1, %v662_v38, %v666_v43  ;;  %v1665_v60 = vshll.u32 %v8836_v55, 16  ;;  %v8838_v61 = vld [vmem:[%s9417_s25 + $0x38] ss:$0 sps:$4 sm:$0x11]   ;;  %v8839_v3 = vld [vmem:[%s9417_s25 + $0x24] sm:$0xfe]  }
  0x2c   : > { %2863 = vrot.lane.b32.xlu1 %v2668_v23, %s9355_s7  ;;  %v1119_v57 = vsel %vm11189_vm0, %v1117_v49, %v1118_v52  ;;  %v1663_v0 = vor.u32 %v1662_v59, %v1658_v53  ;;  %v1677_v2 = vshll.u32 %v8838_v61, 16  ;;  %v1674_v4 = vrot.slane %v1672_v63, 1  ;;  %v8840_v5 = vld [vmem:[%s9417_s25 + $0x2c] ss:$0 sps:$4 sm:$0x11]   ;;  %v8843_v23 = vld [vmem:[%s9417_s25 + $0x30] sm:$0xff]  }
  0x2d   : > { %2861 = vrot.lane.b32.xlu0 %v2656_v18, %s9355_s7  ;;  %v1667_v1 = vrot.slane %v1665_v60, 1  ;;  %v2126_v7 = vrot.slane %v8839_v3, 1  ;;  %v2127_v10 = vrot.slane %v8840_v5, 1  ;;  %v8841_v11 = vld [vmem:[%s9417_s25 + $0x30] sm:$0xfe]   ;;  %v2670_v19 = vshrl.u32 %v8845_v16, 16 }
  0x2e   : > { %v1679_v6 = vrot.slane %v1677_v2, 1  ;;  %v1675_v9 = vor.u32 %v1674_v4, %v1670_v62  ;;  %v8842_v12 = vld [vmem:[%s9417_s25 + $0x38] ss:$0 sps:$4 sm:$0x11]   ;;  %v2129_v14 = vrot.slane %v8841_v11, 1  ;;  %v2672_v20 = vshll.u32 %v8845_v16, 16 }
  0x2f   : > { %v1668_v8 = vsel %vm11190_vm1, %v1663_v0, %v1667_v1  ;;  %v2130_v15 = vrot.slane %v8842_v12, 1  ;;  %v2128_v17 = vsel %vm11189_vm0, %v2126_v7, %v2127_v10  ;;  %v8846_v18 = vld [vmem:[%s9417_s25 + $0x38] ss:$0 sps:$4 sm:$0x11]   ;;  %v8844_v24 = vld [vmem:[%s9417_s25 + $0x3c] sm:$0xff]   ;;  %v2682_v28 = vshrl.u32 %v8847_v21, 16 }
  0x30   : > { %840 = vrot.lane.b32.xlu1 %v655_v36, %s9352_s29  ;;  %v1680_v13 = vsel %vm11190_vm1, %v1675_v9, %v1679_v6  ;;  %v2674_v25 = vrot.slane %v2672_v20, 1  ;;  %v2677_v26 = vshll.u32 %v8846_v18, 16  ;;  %v8848_v27 = vld [vmem:[%s9417_s25 + $0x44] ss:$0 sps:$4 sm:$0x11]   ;;  %v8851_v30 = vld [vmem:[%s9417_s25 + $0x30] sm:$0xff]  }
  0x31   : > { %3186 = vrot.lane.b32.xlu0 %v3134_v29, %s9356_s8  ;;  %v2131_v22 = vsel %vm11189_vm0, %v2129_v14, %v2130_v15  ;;  %v2684_v29 = vshll.u32 %v8847_v21, 16  ;;  %v2689_v33 = vshll.u32 %v8848_v27, 16  ;;  %v8849_v34 = vld [vmem:[%s9417_s25 + $0x30] sm:$0xfe]   ;;  %v669_v42 = vshrl.u32 %v8851_v30, 16  ;;  %v8855_v50 = vld [vmem:[%s9417_s25 + $0x3c] sm:$0xff]  }
  0x32   : > { %v2675_v31 = vor.u32 %v2674_v25, %v2670_v19  ;;  %v2679_v32 = vrot.slane %v2677_v26, 1  ;;  %v8850_v36 = vld [vmem:[%s9417_s25 + $0x38] ss:$0 sps:$4 sm:$0x11]   ;;  %v3138_v38 = vrot.slane %v8849_v34, 1  ;;  %v671_v43 = vshll.u32 %v8851_v30, 16 }
  0x33   : > { %v2686_v35 = vrot.slane %v2684_v29, 1  ;;  %v2691_v37 = vrot.slane %v2689_v33, 1  ;;  %v3139_v40 = vrot.slane %v8850_v36, 1  ;;  %v8854_v49 = vld [vmem:[%s9417_s25 + $0x44] ss:$0 sps:$4 sm:$0x11]  }
  0x34   : > { %842 = vrot.lane.b32.xlu1 %v667_v48, %s9352_s29  ;;  %v2680_v44 = vsel %vm11190_vm1, %v2675_v31, %v2679_v32  ;;  %v673_v46 = vrot.slane %v671_v43, 1  ;;  %v8853_v48 = vld [vmem:[%s9417_s25 + $0x3c] sm:$0xfe]   ;;  %v3142_v55 = vrot.slane %v8854_v49, 1  ;;  %v8857_v60 = vld [vmem:[%s9417_s25 + $0x30] sm:$0xfe]  }
  0x35   : > { %3188 = vrot.lane.b32.xlu0 %v3137_v41, %s9356_s8  ;;  %v2687_v39 = vor.u32 %v2686_v35, %v2682_v28  ;;  %v8852_v41 = vld [vmem:[%s9417_s25 + $0x38] ss:$0 sps:$4 sm:$0x11]   ;;  %v3141_v53 = vrot.slane %v8853_v48, 1  ;;  %v1120_v0 = vrot.slane %v8857_v60, 1  ;;  %v8863_v7 = vld [vmem:[%s9417_s25 + $0x3c] sm:$0xff]  }
  0x36   : > { %v676_v47 = vshll.u32 %v8852_v41, 16  ;;  %v8856_v56 = vld [vmem:[%s9417_s25 + $0x44] ss:$0 sps:$4 sm:$0x11]   ;;  %v8859_v5 = vld [vmem:[%s9417_s25 + $0x3c] sm:$0xfe]  }
  0x37   : > { %v2692_v45 = vsel %vm11190_vm1, %v2687_v39, %v2691_v37  ;;  %v688_v62 = vshll.u32 %v8856_v56, 16  ;;  %v8858_v63 = vld [vmem:[%s9417_s25 + $0x38] ss:$0 sps:$4 sm:$0x11]   ;;  %v3143_v1 = vsel %vm11189_vm0, %v3141_v53, %v3142_v55  ;;  %v1123_v9 = vrot.slane %v8859_v5, 1  ;;  %v8865_v10 = vld [vmem:[%s9417_s25 + $0x48] sm:$0xff]  }
  0x38   : > { %1168 = vrot.lane.b32.xlu1 %v1119_v57, %s9351_s28  ;;  %v678_v52 = vrot.slane %v676_v47, 1  ;;  %v681_v57 = vshrl.u32 %v8855_v50, 16  ;;  %v1121_v4 = vrot.slane %v8858_v63, 1  ;;  %v8860_v6 = vld [vmem:[%s9417_s25 + $0x44] ss:$0 sps:$4 sm:$0x11]  }
  0x39   : > { %1166 = vrot.lane.b32.xlu0 %v1116_v51, %s9351_s28  ;;  %v674_v51 = vor.u32 %v673_v46, %v669_v42  ;;  %v690_v3 = vrot.slane %v688_v62, 1  ;;  %v1124_v11 = vrot.slane %v8860_v6, 1  ;;  %v1682_v12 = vshrl.u32 %v8863_v7, 16  ;;  %v8861_v19 = vld [vmem:[%s9417_s25 + $0x3c] sm:$0xff]   ;;  %v8862_v21 = vld [vmem:[%s9417_s25 + $0x48] sm:$0xff]   ;;  %v8875_v48 = vld [vmem:[%s9417_s25 + $0x54] sm:$0xff]  }
  0x3a   : > { %v1684_v14 = vshll.u32 %v8863_v7, 16  ;;  %v1694_v15 = vshrl.u32 %v8865_v10, 16  ;;  %v1696_v18 = vshll.u32 %v8865_v10, 16  ;;  %v8867_v29 = vld [vmem:[%s9417_s25 + $0x3c] sm:$0xfe]   ;;  %v8873_v31 = vld [vmem:[%s9417_s25 + $0x48] sm:$0xff]  }
  0x3b   : > { %v679_v59 = vsel %vm11190_vm1, %v674_v51, %v678_v52  ;;  %v1125_v16 = vsel %vm11189_vm0, %v1123_v9, %v1124_v11  ;;  %v8868_v30 = vld [vmem:[%s9417_s25 + $0x44] ss:$0 sps:$4 sm:$0x11]   ;;  %v2132_v33 = vrot.slane %v8867_v29, 1  ;;  %v8869_v34 = vld [vmem:[%s9417_s25 + $0x48] sm:$0xfe]  }
  0x3c   : > { %1368 = vrot.lane.b32.xlu1 %v8834_v58, %s9349_s26  ;;  %v683_v58 = vshll.u32 %v8855_v50, 16  ;;  %v1686_v20 = vrot.slane %v1684_v14, 1  ;;  %v2133_v36 = vrot.slane %v8868_v30, 1  ;;  %v8870_v37 = vld [vmem:[%s9417_s25 + $0x50] ss:$0 sps:$4 sm:$0x11]  }
  0x3d   : > { %1366 = vrot.lane.b32.xlu0 %v8833_v54, %s9349_s26  ;;  %v3140_v54 = vsel %vm11189_vm0, %v3138_v38, %v3139_v40  ;;  %v2135_v39 = vrot.slane %v8869_v34, 1  ;;  %v2694_v40 = vshrl.u32 %v8873_v31, 16  ;;  %v2136_v41 = vrot.slane %v8870_v37, 1  ;;  %v8871_v47 = vld [vmem:[%s9417_s25 + $0x48] sm:$0xff]   ;;  %v8872_v50 = vld [vmem:[%s9417_s25 + $0x54] sm:$0xff]  }
  0x3e   : > { %v685_v61 = vrot.slane %v683_v58, 1  ;;  %v1687_v25 = vor.u32 %v1686_v20, %v1682_v12  ;;  %v2696_v42 = vshll.u32 %v8873_v31, 16  ;;  %v2134_v43 = vsel %vm11189_vm0, %v2132_v33, %v2133_v36  ;;  %v8876_v49 = vld [vmem:[%s9417_s25 + $0x5c] ss:$0 sps:$4 sm:$0x11]   ;;  %v8879_v55 = vld [vmem:[%s9417_s25 + $0x48] sm:$0xff]  }
  0x3f   : > { %v2137_v46 = vsel %vm11189_vm0, %v2135_v39, %v2136_v41  ;;  %v2706_v52 = vshrl.u32 %v8875_v48, 16  ;;  %v2708_v53 = vshll.u32 %v8875_v48, 16  ;;  %v8877_v58 = vld [vmem:[%s9417_s25 + $0x48] sm:$0xfe]   ;;  %v8881_v6 = vld [vmem:[%s9417_s25 + $0x54] sm:$0xfe]  }
  0x40   : > { %1855 = vrot.lane.b32.xlu1 %v1680_v13, %s9353_s30  ;;  %v686_v2 = vor.u32 %v685_v61, %v681_v57  ;;  %v1122_v13 = vsel %vm11189_vm0, %v1120_v0, %v1121_v4  ;;  %v3144_v62 = vrot.slane %v8877_v58, 1  ;;  %v693_v0 = vshrl.u32 %v8879_v55, 16  ;;  %v8882_v10 = vld [vmem:[%s9417_s25 + $0x5c] ss:$0 sps:$4 sm:$0x11]   ;;  %v8891_v31 = vld [vmem:[%s9417_s25 + $0x54] sm:$0xff]  }
  0x41   : > { %1853 = vrot.lane.b32.xlu0 %v1668_v8, %s9353_s30  ;;  %v2710_v60 = vrot.slane %v2708_v53, 1  ;;  %v695_v4 = vshll.u32 %v8879_v55, 16  ;;  %v3147_v12 = vrot.slane %v8881_v6, 1  ;;  %v8888_v30 = vld [vmem:[%s9417_s25 + $0x5c] ss:$0 sps:$4 sm:$0x11]  }
  0x42   : > { %v691_v8 = vsel %vm11190_vm1, %v686_v2, %v690_v3  ;;  %v8880_v3 = vld [vmem:[%s9417_s25 + $0x50] ss:$0 sps:$4 sm:$0x11]   ;;  %v8893_v33 = vld [vmem:[%s9417_s25 + $0x60] sm:$0xff]   ;;  %v1706_v36 = vshrl.u32 %v8891_v31, 16  ;;  %v1708_v39 = vshll.u32 %v8891_v31, 16 }
  0x43   : > { %v2711_v2 = vor.u32 %v2710_v60, %v2706_v52  ;;  %v700_v9 = vshll.u32 %v8880_v3, 16  ;;  %v1718_v41 = vshrl.u32 %v8893_v33, 16  ;;  %v8895_v52 = vld [vmem:[%s9417_s25 + $0x54] sm:$0xfe]   ;;  %v8901_v55 = vld [vmem:[%s9417_s25 + $0x60] sm:$0xff]   ;;  %v8903_v3 = vld [vmem:[%s9417_s25 + $0x6c] sm:$0xff]  }
  0x44   : > { %2180 = vrot.lane.b32.xlu1 %v2131_v22, %s9350_s27  ;;  %v8898_v60 = vld [vmem:[%s9417_s25 + $0x68] ss:$0 sps:$4 sm:$0x11]  }
  0x45   : > { %2178 = vrot.lane.b32.xlu0 %v2128_v17, %s9350_s27  ;;  %v8864_v17 = vld [vmem:[%s9417_s25 + $0x44] ss:$0 sps:$4 sm:$0x11]   ;;  %v8909_v31 = vld [vmem:[%s9417_s25 + $0x68] ss:$0 sps:$4 sm:$0x11]  }
  0x46   : > { %v1689_v22 = vshll.u32 %v8864_v17, 16 }
  0x48   : > { %2380 = vrot.lane.b32.xlu1 %v8844_v24, %s9354_s6  ;;  %v1698_v24 = vrot.slane %v1696_v18, 1  ;;  %v1691_v26 = vrot.slane %v1689_v22, 1  ;;  %v8884_v18 = vld [vmem:[%s9417_s25 + $0x5c] ss:$0 sps:$4 sm:$0x11]  }
  0x49   : > { %2378 = vrot.lane.b32.xlu0 %v8843_v23, %s9354_s6  ;;  %v8866_v23 = vld [vmem:[%s9417_s25 + $0x50] ss:$0 sps:$4 sm:$0x11]  }
  0x4a   : > { %v1699_v27 = vor.u32 %v1698_v24, %v1694_v15  ;;  %v1701_v28 = vshll.u32 %v8866_v23, 16  ;;  %v1692_v35 = vsel %vm11190_vm1, %v1687_v25, %v1691_v26  ;;  %v702_v15 = vrot.slane %v700_v9, 1  ;;  %v8886_v24 = vld [vmem:[%s9417_s25 + $0x50] ss:$0 sps:$4 sm:$0x11]  }
  0x4b   : > { %v712_v23 = vshll.u32 %v8884_v18, 16  ;;  %v8887_v26 = vld [vmem:[%s9417_s25 + $0x54] sm:$0xfe]   ;;  %v1127_v29 = vrot.slane %v8886_v24, 1 }
  0x4c   : > { %2867 = vrot.lane.b32.xlu1 %v2692_v45, %s9355_s7  ;;  %v1703_v32 = vrot.slane %v1701_v28, 1  ;;  %v2698_v45 = vrot.slane %v2696_v42, 1  ;;  %v1720_v42 = vshll.u32 %v8893_v33, 16  ;;  %v8910_v33 = vld [vmem:[%s9417_s25 + $0xc] sm:$0xff]  }
  0x4d   : > { %2865 = vrot.lane.b32.xlu0 %v2680_v44, %s9355_s7  ;;  %v8874_v44 = vld [vmem:[%s9417_s25 + $0x50] ss:$0 sps:$4 sm:$0x11]   ;;  %v714_v28 = vrot.slane %v712_v23, 1  ;;  %404 = vst.msk [vmem:[#allocation2 + $0x8] sm:$0xff] %vm402_vm2, %v8910_v33 }
  0x4e   : > { %v1704_v38 = vsel %vm11190_vm1, %v1699_v27, %v1703_v32  ;;  %v2701_v51 = vshll.u32 %v8874_v44, 16  ;;  %v2699_v56 = vor.u32 %v2698_v45, %v2694_v40  ;;  %v1129_v32 = vrot.slane %v8887_v26, 1 }
  0x4f   : > { %v1710_v44 = vrot.slane %v1708_v39, 1  ;;  %v1722_v48 = vrot.slane %v1720_v42, 1  ;;  %v8911_v39 = vld [vmem:[%s9417_s25 + $0x6c] sm:$0xfe]  }
  0x50   : > { %844 = vrot.lane.b32.xlu1 %v679_v59, %s9352_s29  ;;  %v2703_v57 = vrot.slane %v2701_v51, 1  ;;  %v8878_v59 = vld [vmem:[%s9417_s25 + $0x50] ss:$0 sps:$4 sm:$0x11]  }
  0x51   : > { %3190 = vrot.lane.b32.xlu0 %v3140_v54, %s9356_s8  ;;  %v2713_v54 = vshll.u32 %v8876_v49, 16  ;;  %v3145_v63 = vrot.slane %v8878_v59, 1  ;;  %v1711_v49 = vor.u32 %v1710_v44, %v1706_v36  ;;  %v1723_v53 = vor.u32 %v1722_v48, %v1718_v41  ;;  %v8897_v59 = vld [vmem:[%s9417_s25 + $0x60] sm:$0xfe]   ;;  %v8914_v44 = vld [vmem:[%s9417_s25 + $0x6c] sm:$0xff]  }
  0x52   : > { %v2704_v5 = vsel %vm11190_vm1, %v2699_v56, %v2703_v57  ;;  %v2138_v57 = vrot.slane %v8895_v52, 1  ;;  %v8913_v41 = vld [vmem:[%s11184_s1] sm:$0xff]   ;;  %v731_v52 = vshll.u32 %v8914_v44, 16 }
  0x53   : > { %v2715_v61 = vrot.slane %v2713_v54, 1  ;;  %v3146_v17 = vsel %vm11189_vm0, %v3144_v62, %v3145_v63  ;;  %v8896_v54 = vld [vmem:[%s9417_s25 + $0x5c] ss:$0 sps:$4 sm:$0x11]   ;;  %v2141_v63 = vrot.slane %v8897_v59, 1  ;;  %8658 = vmatprep.subr.bf16.mxu0 %v8913_v41 }
  0x54   : > { %846 = vrot.lane.b32.xlu1 %v691_v8, %s9352_s29  ;;  %v697_v8 = vrot.slane %v695_v4, 1  ;;  %v2139_v58 = vrot.slane %v8896_v54, 1  ;;  %8659 = vmatpush3.bf16.msra.mxu0 %v8913_v41  ;;  %v8917_v59 = vld [vmem:[%s9417_s25 + $0x68] ss:$0 sps:$4 sm:$0x11]  }
  0x55   : > { %3192 = vrot.lane.b32.xlu0 %v3143_v1, %s9356_s8  ;;  %v8883_v1 = vld [vmem:[%s9417_s25 + $0x54] sm:$0xff]   ;;  %v2716_v7 = vsel %vm11190_vm1, %v2711_v2, %v2715_v61  ;;  %v8902_v2 = vld [vmem:[%s9417_s25 + $0x68] ss:$0 sps:$4 sm:$0x11]  }
  0x56   : > { %v705_v11 = vshrl.u32 %v8883_v1, 16  ;;  %v698_v14 = vor.u32 %v697_v8, %v693_v0  ;;  %v2142_v0 = vrot.slane %v8898_v60, 1  ;;  %v2140_v4 = vsel %vm11189_vm0, %v2138_v57, %v2139_v58  ;;  %v8916_v57 = vld [vmem:[%s9417_s25 + $0x60] sm:$0xfe]  }
  0x58   : > { %1172 = vrot.lane.b32.xlu1 %v1125_v16, %s9351_s28  ;;  %v3148_v16 = vrot.slane %v8882_v10, 1  ;;  %v703_v20 = vsel %vm11190_vm1, %v698_v14, %v702_v15  ;;  %v2143_v9 = vsel %vm11189_vm0, %v2141_v63, %v2142_v0  ;;  %v8899_v10 = vld [vmem:[%s9417_s25 + $0x60] sm:$0xff]   ;;  %v2732_v14 = vshll.u32 %v8903_v3, 16  ;;  %v8900_v15 = vld [vmem:[%s9417_s25 + $0x6c] sm:$0xff]  }
  0x59   : > { %1170 = vrot.lane.b32.xlu0 %v1122_v13, %s9351_s28  ;;  %v707_v13 = vshll.u32 %v8883_v1, 16  ;;  %v2720_v1 = vshll.u32 %v8901_v55, 16  ;;  %v1132_v63 = vrot.slane %v8916_v57, 1  ;;  %v8919_v0 = vld [vmem:[%s9417_s25 + $0x6c] sm:$0xfe]  }
  0x5a   : > { %v3149_v27 = vsel %vm11189_vm0, %v3147_v12, %v3148_v16  ;;  %v8904_v12 = vld [vmem:[%s9417_s25 + $0x74] ss:$0 sps:$4 sm:$0x11]   ;;  %v8905_v16 = vld [vmem:[%s9417_s25] sm:$0xff]   ;;  %v2734_v18 = vrot.slane %v2732_v14, 1  ;;  %v8923_v14 = vld [vmem:[%s9417_s25 + $0x78] sm:$0xff]  }
  0x5b   : > { %v2722_v8 = vrot.slane %v2720_v1, 1  ;;  %403 = vst.msk [vmem:[#allocation2] sm:$0xff] %vm402_vm2, %v8905_v16  ;;  %v1133_v1 = vrot.slane %v8917_v59, 1  ;;  %v8941_v59 = vld [vmem:[%s11184_s1 + $0x30] sm:$0xff]  }
  0x5c   : > { %1372 = vrot.lane.b32.xlu1 %v8862_v21, %s9349_s26  ;;  %v8885_v21 = vld [vmem:[%s9417_s25 + $0x48] sm:$0xfe]  }
  0x5d   : > { %1370 = vrot.lane.b32.xlu0 %v8861_v19, %s9349_s26  ;;  %v709_v19 = vrot.slane %v707_v13, 1  ;;  %v1126_v25 = vrot.slane %v8885_v21, 1  ;;  %v2730_v13 = vshrl.u32 %v8903_v3, 16 }
  0x5f   : > { %v710_v22 = vor.u32 %v709_v19, %v705_v11  ;;  %v1128_v37 = vsel %vm11189_vm0, %v1126_v25, %v1127_v29  ;;  %v2725_v11 = vshll.u32 %v8902_v2, 16  ;;  %v2737_v19 = vshll.u32 %v8904_v12, 16  ;;  %v8907_v25 = vld [vmem:[%s9417_s25 + $0x68] ss:$0 sps:$4 sm:$0x11]   ;;  %v8924_v12 = vld [vmem:[%s9417_s25 + $0x6c] sm:$0xff]  }
  0x60   : > { %1859 = vrot.lane.b32.xlu1 %v1704_v38, %s9353_s30  ;;  %v8892_v38 = vld [vmem:[%s9417_s25 + $0x5c] ss:$0 sps:$4 sm:$0x11]   ;;  %v2735_v23 = vor.u32 %v2734_v18, %v2730_v13  ;;  %v8920_v2 = vld [vmem:[%s9417_s25 + $0x74] ss:$0 sps:$4 sm:$0x11]  }
  0x61   : > { %1857 = vrot.lane.b32.xlu0 %v1692_v35, %s9353_s30  ;;  %v715_v34 = vsel %vm11190_vm1, %v710_v22, %v714_v28  ;;  %v1130_v35 = vrot.slane %v8888_v30, 1  ;;  %v1713_v45 = vshll.u32 %v8892_v38, 16  ;;  %v8906_v22 = vld [vmem:[%s9417_s25 + $0x60] sm:$0xfe]   ;;  %v2739_v24 = vrot.slane %v2737_v19, 1 }
  0x62   : > { %v3150_v28 = vrot.slane %v8906_v22, 1  ;;  %v3151_v30 = vrot.slane %v8907_v25, 1  ;;  %v1732_v18 = vshll.u32 %v8924_v12, 16 }
  0x63   : > { %v1131_v40 = vsel %vm11189_vm0, %v1129_v32, %v1130_v35  ;;  %v2740_v35 = vsel %vm11190_vm1, %v2735_v23, %v2739_v24  ;;  %v8928_v23 = vld [vmem:[%s9417_s25 + $0x80] ss:$0 sps:$4 sm:$0x11]   ;;  %v8929_v24 = vld [vmem:[%s9417_s25 + $0x18] sm:$0xff]  }
  0x64   : > { %2184 = vrot.lane.b32.xlu1 %v2137_v46, %s9350_s27  ;;  %v8894_v46 = vld [vmem:[%s9417_s25 + $0x68] ss:$0 sps:$4 sm:$0x11]   ;;  %v1734_v22 = vrot.slane %v1732_v18, 1  ;;  %405 = vst.msk [vmem:[#allocation2 + $0x10] sm:$0xff] %vm402_vm2, %v8929_v24 }
  0x65   : > { %2182 = vrot.lane.b32.xlu0 %v2134_v43, %s9350_s27  ;;  %v8889_v43 = vld [vmem:[%s9417_s25 + $0x54] sm:$0xff]   ;;  %v1725_v51 = vshll.u32 %v8894_v46, 16  ;;  %v3152_v46 = vsel %vm11189_vm0, %v3150_v28, %v3151_v30  ;;  %v8932_v28 = vld [vmem:[%s11184_s1 + $0x20] sm:$0xff]   ;;  %v1749_v30 = vshll.u32 %v8928_v23, 16 }
  0x66   : > { %v8948_v23 = vld [vmem:[%s9417_s25 + $0x80] ss:$0 sps:$4 sm:$0x11]  }
  0x67   : > { %v1727_v56 = vrot.slane %v1725_v51, 1  ;;  %v729_v51 = vshrl.u32 %v8914_v44, 16  ;;  %v8934_v44 = vld [vmem:[%s9417_s25 + $0x80] ss:$0 sps:$4 sm:$0x11]  }
  0x68   : > { %2384 = vrot.lane.b32.xlu1 %v8872_v50, %s9354_s6  ;;  %v1715_v50 = vrot.slane %v1713_v45, 1 }
  0x69   : > { %2382 = vrot.lane.b32.xlu0 %v8871_v47, %s9354_s6  ;;  %v8890_v47 = vld [vmem:[%s9417_s25 + $0x60] sm:$0xff]   ;;  %v1728_v62 = vsel %vm11190_vm1, %v1723_v53, %v1727_v56  ;;  %v8918_v53 = vld [vmem:[%s11184_s1 + $0x8] sm:$0xff]  }
  0x6a   : > { %v1716_v61 = vsel %vm11190_vm1, %v1711_v49, %v1715_v50  ;;  %v8915_v50 = vld [vmem:[%s9417_s25 + $0x74] ss:$0 sps:$4 sm:$0x11]   ;;  %8660 = vmatprep.subr.bf16.mxu0 %v8918_v53 }
  0x6b   : > { %v736_v56 = vshll.u32 %v8915_v50, 16  ;;  %8661 = vmatpush3.bf16.msra.mxu0 %v8918_v53  ;;  %v8936_v50 = vld [vmem:[%s9417_s25 + $0x78] sm:$0xff]   ;;  %v9357_v53 = vmov 0  }
  0x6c   : > { %2871 = vrot.lane.b32.xlu1 %v2716_v7, %s9355_s7  ;;  %v2718_v7 = vshrl.u32 %v8901_v55, 16  ;;  %v733_v55 = vrot.slane %v731_v52, 1  ;;  %v8939_v52 = vld [vmem:[%s9417_s25 + $0x78] sm:$0xff]  }
  0x6d   : > { %2869 = vrot.lane.b32.xlu0 %v2704_v5, %s9355_s7  ;;  %v2742_v57 = vshrl.u32 %v8939_v52, 16 }
  0x6e   : > { %v2723_v21 = vor.u32 %v2722_v8, %v2718_v7  ;;  %v8922_v7 = vld [vmem:[%s11184_s1 + $0x10] sm:$0xff]   ;;  %v1134_v8 = vsel %vm11189_vm0, %v1132_v63, %v1133_v1  ;;  %v8946_v1 = vld [vmem:[%s11184_s1 + $0x38] sm:$0xff]  }
  0x6f   : > { %8662 = vmatprep.subr.bf16.mxu0 %v8922_v7 }
  0x70   : > { %848 = vrot.lane.b32.xlu1 %v703_v20, %s9352_s29  ;;  %v8908_v20 = vld [vmem:[%s9417_s25 + $0x60] sm:$0xff]   ;;  %8663 = vmatpush3.bf16.msra.mxu0 %v8922_v7 }
  0x71   : > { %3194 = vrot.lane.b32.xlu0 %v3146_v17, %s9356_s8  ;;  %v2727_v17 = vrot.slane %v2725_v11, 1  ;;  %v717_v29 = vshrl.u32 %v8908_v20, 16  ;;  %v719_v32 = vshll.u32 %v8908_v20, 16  ;;  %v8921_v11 = vld [vmem:[%s9417_s25 + $0x6c] sm:$0xff]   ;;  %v8927_v20 = vld [vmem:[%s9417_s25 + $0x78] sm:$0xff]  }
  0x73   : > { %v721_v36 = vrot.slane %v719_v32, 1 }
  0x74   : > { %850 = vrot.lane.b32.xlu1 %v715_v34, %s9352_s29  ;;  %v2728_v34 = vsel %vm11190_vm1, %v2723_v21, %v2727_v17  ;;  %v1730_v17 = vshrl.u32 %v8924_v12, 16 }
  0x75   : > { %3196 = vrot.lane.b32.xlu0 %v3149_v27, %s9356_s8  ;;  %v722_v42 = vor.u32 %v721_v36, %v717_v29  ;;  %v1751_v36 = vrot.slane %v1749_v30, 1  ;;  %v748_v30 = vshll.u32 %v8948_v23, 16 }
  0x76   : > { %v1735_v29 = vor.u32 %v1734_v22, %v1730_v17 }
  0x78   : > { %1176 = vrot.lane.b32.xlu1 %v1131_v40, %s9351_s28  ;;  %v8912_v40 = vld [vmem:[%s9417_s25 + $0x74] ss:$0 sps:$4 sm:$0x11]  }
  0x79   : > { %1174 = vrot.lane.b32.xlu0 %v1128_v37, %s9351_s28  ;;  %v724_v37 = vshll.u32 %v8909_v31, 16  ;;  %v3154_v48 = vrot.slane %v8912_v40, 1  ;;  %v8935_v31 = vld [vmem:[%s9417_s25 + $0x24] sm:$0xff]  }
  0x7a   : > { %406 = vst.msk [vmem:[#allocation2 + $0x18] sm:$0xff] %vm402_vm2, %v8935_v31  ;;  %v8949_v31 = vld [vmem:[%s9417_s25 + $0x84] sm:$0xfe]  }
  0x7c   : > { %1376 = vrot.lane.b32.xlu1 %v8890_v47, %s9349_s26  ;;  %v3153_v47 = vrot.slane %v8911_v39, 1 }
  0x7d   : > { %1374 = vrot.lane.b32.xlu0 %v8889_v43, %s9349_s26  ;;  %v726_v43 = vrot.slane %v724_v37, 1  ;;  %v8930_v37 = vld [vmem:[%s9417_s25 + $0x6c] sm:$0xfe]  }
  0x7e   : > { %v3155_v58 = vsel %vm11189_vm0, %v3153_v47, %v3154_v48  ;;  %v2144_v40 = vrot.slane %v8930_v37, 1 }
  0x7f   : > { %v727_v49 = vsel %vm11190_vm1, %v722_v42, %v726_v43  ;;  %v8933_v42 = vld [vmem:[%s9417_s25 + $0x78] sm:$0xfe]  }
  0x80   : > { %1863 = vrot.lane.b32.xlu1 %v1728_v62, %s9353_s30  ;;  %v738_v62 = vrot.slane %v736_v56, 1  ;;  %v8940_v56 = vld [vmem:[%s9417_s25 + $0x80] ss:$0 sps:$4 sm:$0x11]  }
  0x81   : > { %1861 = vrot.lane.b32.xlu0 %v1716_v61, %s9353_s30  ;;  %v734_v61 = vor.u32 %v733_v55, %v729_v51  ;;  %v2148_v51 = vrot.slane %v8934_v44, 1  ;;  %v2749_v63 = vshll.u32 %v8940_v56, 16  ;;  %v8956_v56 = vld [vmem:[%s9417_s25 + $0x8c] ss:$0 sps:$4 sm:$0x11]  }
  0x83   : > { %v739_v3 = vsel %vm11190_vm1, %v734_v61, %v738_v62 }
  0x84   : > { %2188 = vrot.lane.b32.xlu1 %v2143_v9, %s9350_s27  ;;  %v1136_v9 = vrot.slane %v8920_v2, 1  ;;  %v8943_v2 = vld [vmem:[%s9417_s25 + $0x8c] ss:$0 sps:$4 sm:$0x11]  }
  0x85   : > { %v9623_v5 = vpop.permute.xlu1 %1364  ;;  %v9625_v6 = vpop.permute.xlu0 %1362  ;;  %2186 = vrot.lane.b32.xlu0 %v2140_v4, %s9350_s27 }
  0x88   : > { %2388 = vrot.lane.b32.xlu1 %v8900_v15, %s9354_s6  ;;  %v8926_v15 = vld [vmem:[%s11184_s1 + $0x18] sm:$0xff]  }
  0x89   : > { %v9638_v26 = vpop.permute.xlu0 %2174  ;;  %2386 = vrot.lane.b32.xlu0 %v8899_v10, %s9354_s6  ;;  %8664 = vmatprep.subr.bf16.mxu0 %v8926_v15 }
  0x8a   : > { %v1163_v27 = vpop.permute.xlu1 %1162  ;;  %8665 = vmatpush3.bf16.msra.mxu0 %v8926_v15  ;;  %v8945_v15 = vld [vmem:[%s9417_s25 + $0x80] ss:$0 sps:$4 sm:$0x11]  }
  0x8b   : > { %8666 = vmatprep.subr.bf16.mxu0 %v8932_v28 }
  0x8c   : > { %2875 = vrot.lane.b32.xlu1 %v2740_v35, %s9355_s7 }
  0x8d   : > { %2873 = vrot.lane.b32.xlu0 %v2728_v34, %s9355_s7 }
  0x8e   : > { %v1165_v38 = vpop.permute.xlu1 %1164  ;;  %8667 = vmatpush3.bf16.msra.mxu0 %v8932_v28 }
  0x8f   : > { %v837_v45 = vpop.permute.xlu0 %836 }
  0x90   : > { %891 = vst.msk [vmem:[#allocation2] sm:$0xff] %vm890_vm3, %v837_v45  ;;  %852 = vrot.lane.b32.xlu1 %v727_v49, %s9352_s29  ;;  %v8937_v45 = vld [vmem:[%s11184_s1 + $0x28] sm:$0xff]   ;;  %v2147_v49 = vrot.slane %v8933_v42, 1 }
  0x91   : > { %1217 = vst.msk [vmem:[#allocation2] sm:$0xff] %vm1216_vm4, %v1163_v27  ;;  %3198 = vrot.lane.b32.xlu0 %v3152_v46, %s9356_s8  ;;  %v1744_v27 = vshll.u32 %v8927_v20, 16  ;;  %8668 = vmatprep.subr.bf16.mxu0 %v8937_v45 }
  0x92   : > { %v2177_v54 = vpop.permute.xlu1 %2176  ;;  %1417 = vst.msk [vmem:[#allocation2] sm:$0xff] %vm1416_vm5, %v9625_v6  ;;  %v1135_v6 = vrot.slane %v8919_v0, 1  ;;  %8669 = vmatpush3.bf16.msra.mxu0 %v8937_v45  ;;  %v2149_v55 = vsel %vm11189_vm0, %v2147_v49, %v2148_v51  ;;  %v8942_v0 = vld [vmem:[%s9417_s25 + $0x84] sm:$0xff]   ;;  %v8953_v45 = vld [vmem:[%s9417_s25 + $0x78] sm:$0xfe]  }
  0x93   : > { %v839_v60 = vpop.permute.xlu0 %838  ;;  %v1746_v33 = vrot.slane %v1744_v27, 1  ;;  %8670 = vmatprep.subr.bf16.mxu0 %v8941_v59  ;;  %v2754_v7 = vshrl.u32 %v8942_v0, 16 }
  0x94   : > { %892 = vst.msk [vmem:[#allocation2 + $0x8] sm:$0xff] %vm890_vm3, %v839_v60  ;;  %854 = vrot.lane.b32.xlu1 %v739_v3, %s9352_s29  ;;  %v1137_v13 = vsel %vm11189_vm0, %v1135_v6, %v1136_v9  ;;  %v8947_v3 = vld [vmem:[%s9417_s25 + $0x78] sm:$0xff]   ;;  %v2751_v6 = vrot.slane %v2749_v63, 1 }
  0x95   : > { %1218 = vst.msk [vmem:[#allocation2 + $0x8] sm:$0xff] %vm1216_vm4, %v1165_v38  ;;  %3200 = vrot.lane.b32.xlu0 %v3155_v58, %s9356_s8  ;;  %v8931_v38 = vld [vmem:[%s9417_s25 + $0x74] ss:$0 sps:$4 sm:$0x11]   ;;  %v2744_v58 = vshll.u32 %v8939_v52, 16  ;;  %v741_v12 = vshrl.u32 %v8947_v3, 16 }
  0x96   : > { %v1852_v4 = vpop.permute.xlu1 %1851  ;;  %1418 = vst.msk [vmem:[#allocation2 + $0x8] sm:$0xff] %vm1416_vm5, %v9623_v5  ;;  %v8925_v5 = vld [vmem:[%s9417_s25 + $0x74] ss:$0 sps:$4 sm:$0x11]   ;;  %v2145_v41 = vrot.slane %v8931_v38, 1  ;;  %8671 = vmatpush3.bf16.msra.mxu0 %v8941_v59 }
  0x97   : > { %1905 = vst.msk [vmem:[#allocation2 + $0x8] sm:$0xff] %vm1903_vm6, %v1852_v4  ;;  %v1850_v10 = vpop.permute.xlu0 %1849  ;;  %v1737_v19 = vshll.u32 %v8925_v5, 16  ;;  %v2746_v62 = vrot.slane %v2744_v58, 1  ;;  %8672 = vmatprep.subr.bf16.mxu0 %v8946_v1  ;;  %v8952_v38 = vld [vmem:[%s9417_s25 + $0x8c] ss:$0 sps:$4 sm:$0x11]  }
  0x98   : > { %1904 = vst.msk [vmem:[#allocation2] sm:$0xff] %vm1903_vm6, %v1850_v10  ;;  %1180 = vrot.lane.b32.xlu1 %v1137_v13, %s9351_s28  ;;  %v2146_v48 = vsel %vm11189_vm0, %v2144_v40, %v2145_v41  ;;  %v2761_v10 = vshll.u32 %v8943_v2, 16  ;;  %v760_v44 = vshll.u32 %v8952_v38, 16  ;;  %v8960_v2 = vld [vmem:[%s9417_s25 + $0x8c] ss:$0 sps:$4 sm:$0x11]  }
  0x99   : > { %2230 = vst.msk [vmem:[#allocation2 + $0x8] sm:$0xff] %vm11191_vm7, %v2177_v54  ;;  %1178 = vrot.lane.b32.xlu0 %v1134_v8, %s9351_s28  ;;  %2229 = vst.msk [vmem:[#allocation2] sm:$0xff] %vm11191_vm7, %v9638_v26  ;;  %v1739_v25 = vrot.slane %v1737_v19, 1  ;;  %v1742_v26 = vshrl.u32 %v8927_v20, 16  ;;  %v8938_v54 = vld [vmem:[%s9417_s25 + $0x84] sm:$0xff]   ;;  %v2747_v4 = vor.u32 %v2746_v62, %v2742_v57  ;;  %v2756_v8 = vshll.u32 %v8942_v0, 16 }
  0x9a   : > { %v2377_v16 = vpop.permute.xlu1 %2376  ;;  %v2763_v17 = vrot.slane %v2761_v10, 1  ;;  %8673 = vmatpush3.bf16.msra.mxu0 %v8946_v1  ;;  %v3157_v20 = vrot.slane %v8945_v15, 1  ;;  %v8959_v62 = vld [vmem:[%s9417_s25 + $0x84] sm:$0xff]  }
  0x9b   : > { %2430 = vst.msk [vmem:[#allocation2 + $0x8] sm:$0xff] %vm2428_vm8, %v2377_v16  ;;  %v2375_v21 = vpop.permute.xlu0 %2374  ;;  %v1740_v35 = vsel %vm11190_vm1, %v1735_v29, %v1739_v25  ;;  %v1747_v39 = vor.u32 %v1746_v33, %v1742_v26  ;;  %v2758_v5 = vrot.slane %v2756_v8, 1  ;;  %v8951_v16 = vld [vmem:[%s9417_s25 + $0x84] sm:$0xff]   ;;  %v1761_v8 = vshll.u32 %v8960_v2, 16 }
  0x9c   : > { %2429 = vst.msk [vmem:[#allocation2] sm:$0xff] %vm2428_vm8, %v2375_v21  ;;  %1380 = vrot.lane.b32.xlu1 %v8923_v14, %s9349_s26  ;;  %v2752_v14 = vsel %vm11190_vm1, %v2747_v4, %v2751_v6  ;;  %v743_v21 = vshll.u32 %v8947_v3, 16  ;;  %v753_v29 = vshrl.u32 %v8951_v16, 16  ;;  %v755_v40 = vshll.u32 %v8951_v16, 16  ;;  %v8958_v4 = vld [vmem:[%s9417_s25 + $0x90] sm:$0xff]  }
  0x9d   : > { %1378 = vrot.lane.b32.xlu0 %v8921_v11, %s9349_s26  ;;  %v1752_v43 = vsel %vm11190_vm1, %v1747_v39, %v1751_v36  ;;  %v8944_v11 = vld [vmem:[%s9417_s25 + $0x78] sm:$0xfe]   ;;  %v2759_v19 = vor.u32 %v2758_v5, %v2754_v7  ;;  %v3159_v36 = vrot.slane %v8949_v31, 1  ;;  %v1754_v3 = vshrl.u32 %v8959_v62, 16  ;;  %v8961_v7 = vld [vmem:[%s9417_s25 + $0x90] sm:$0xff]  }
  0x9e   : > { %v2864_v32 = vpop.permute.xlu1 %2863  ;;  %v3156_v18 = vrot.slane %v8944_v11, 1  ;;  %v745_v28 = vrot.slane %v743_v21, 1  ;;  %v1756_v6 = vshll.u32 %v8959_v62, 16  ;;  %v1763_v15 = vrot.slane %v1761_v8, 1  ;;  %v8964_v21 = vld [vmem:[%s9417_s25 + $0x84] sm:$0xfe]  }
  0x9f   : > { %v2862_v34 = vpop.permute.xlu0 %2861  ;;  %2917 = vst.msk [vmem:[#allocation2 + $0x8] sm:$0xff] %vm2915_vm9, %v2864_v32  ;;  %v2764_v25 = vsel %vm11190_vm1, %v2759_v19, %v2763_v17  ;;  %v8950_v32 = vld [vmem:[%s9417_s25 + $0x8c] ss:$0 sps:$4 sm:$0x11]   ;;  %v8968_v19 = vld [vmem:[%s9417_s25 + $0x3c] sm:$0xff]  }
  0xa0   : > { %2916 = vst.msk [vmem:[#allocation2] sm:$0xff] %vm2915_vm9, %v2862_v34  ;;  %1867 = vrot.lane.b32.xlu1 %v1752_v43, %s9353_s30  ;;  %v3158_v27 = vsel %vm11189_vm0, %v3156_v18, %v3157_v20  ;;  %v746_v33 = vor.u32 %v745_v28, %v741_v12  ;;  %v750_v34 = vrot.slane %v748_v30, 1  ;;  %v3160_v37 = vrot.slane %v8950_v32, 1  ;;  %v8967_v31 = vld [vmem:[%s9417_s25 + $0x98] ss:$0 sps:$4 sm:$0x11]  }
  0xa1   : > { %1865 = vrot.lane.b32.xlu0 %v1740_v35, %s9353_s30  ;;  %v1758_v11 = vrot.slane %v1756_v6, 1  ;;  %v1766_v12 = vshrl.u32 %v8961_v7, 16  ;;  %408 = vst.msk [vmem:[#allocation2 + $0x28] sm:$0xff] %vm402_vm2, %v8968_v19  ;;  %v8978_v6 = vld [vmem:[%s9417_s25 + $0x98] ss:$0 sps:$4 sm:$0x11]  }
  0xa2   : > { %v841_v47 = vpop.permute.xlu1 %840  ;;  %v751_v42 = vsel %vm11190_vm1, %v746_v33, %v750_v34  ;;  %v3161_v43 = vsel %vm11189_vm0, %v3159_v36, %v3160_v37  ;;  %v8969_v34 = vld [vmem:[%s9417_s25 + $0x90] sm:$0xff]  }
  0xa3   : > { %v3187_v46 = vpop.permute.xlu0 %3186  ;;  %893 = vst.msk [vmem:[#allocation2 + $0x10] sm:$0xff] %vm890_vm3, %v841_v47  ;;  %v8954_v47 = vld [vmem:[%s9417_s25 + $0x80] ss:$0 sps:$4 sm:$0x11]   ;;  %v1759_v17 = vor.u32 %v1758_v11, %v1754_v3  ;;  %v8971_v37 = vld [vmem:[%s9417_s25 + $0x90] sm:$0xff]  }
  0xa4   : > { %3241 = vst.msk [vmem:[#allocation2] sm:$0xff] %vm3240_vm10, %v3187_v46  ;;  %2192 = vrot.lane.b32.xlu1 %v2149_v55, %s9350_s27  ;;  %v757_v46 = vrot.slane %v755_v40, 1  ;;  %v8955_v55 = vld [vmem:[%s9417_s25 + $0x84] sm:$0xfe]   ;;  %v8970_v40 = vld [vmem:[%s9417_s25 + $0x9c] sm:$0xff]  }
  0xa5   : > { %3260 = vst.msk [vmem:[#allocation2] sm:$0xff] %vm3259_vm11, %v9357_v53  ;;  %2190 = vrot.lane.b32.xlu0 %v2146_v48, %s9350_s27  ;;  %v762_v48 = vrot.slane %v760_v44, 1  ;;  %v1141_v59 = vrot.slane %v8955_v55, 1  ;;  %v1764_v23 = vsel %vm11190_vm1, %v1759_v17, %v1763_v15  ;;  %v8973_v44 = vld [vmem:[%s9417_s25 + $0x9c] sm:$0xff]  }
  0xa6   : > { %v843_v61 = vpop.permute.xlu1 %842  ;;  %v758_v51 = vor.u32 %v757_v46, %v753_v29  ;;  %v8966_v29 = vld [vmem:[%s9417_s25 + $0x90] sm:$0xfe]   ;;  %v8979_v11 = vld [vmem:[%s9417_s25 + $0x9c] sm:$0xfe]  }
  0xa7   : > { %v3189_v60 = vpop.permute.xlu0 %3188  ;;  %894 = vst.msk [vmem:[#allocation2 + $0x18] sm:$0xff] %vm890_vm3, %v843_v61  ;;  %v8957_v61 = vld [vmem:[%s9417_s25 + $0x84] sm:$0xff]   ;;  %v2153_v33 = vrot.slane %v8966_v29, 1  ;;  %v8981_v17 = vld [vmem:[%s9417_s25 + $0x9c] sm:$0xff]  }
  0xa8   : > { %3242 = vst.msk [vmem:[#allocation2 + $0x8] sm:$0xff] %vm3240_vm10, %v3189_v60  ;;  %2392 = vrot.lane.b32.xlu1 %v8938_v54, %s9354_s6  ;;  %v1139_v54 = vrot.slane %v8954_v47, 1  ;;  %v763_v57 = vsel %vm11190_vm1, %v758_v51, %v762_v48  ;;  %v1142_v60 = vrot.slane %v8956_v56, 1  ;;  %v8974_v48 = vld [vmem:[%s9417_s25 + $0xa4] ss:$0 sps:$4 sm:$0x11]  }
  0xa9   : > { %3261 = vst.msk [vmem:[#allocation2 + $0x8] sm:$0xff] %vm3259_vm11, %v9357_v53  ;;  %2390 = vrot.lane.b32.xlu0 %v8936_v50, %s9354_s6  ;;  %v1138_v50 = vrot.slane %v8953_v45, 1  ;;  %v2780_v51 = vshll.u32 %v8973_v44, 16  ;;  %v2785_v56 = vshll.u32 %v8974_v48, 16 }
  0xaa   : > { %v1169_v13 = vpop.permute.xlu1 %1168  ;;  %v1143_v0 = vsel %vm11189_vm0, %v1141_v59, %v1142_v60  ;;  %v8976_v59 = vld [vmem:[%s9417_s25 + $0x98] ss:$0 sps:$4 sm:$0x11]  }
  0xab   : > { %v1167_v9 = vpop.permute.xlu0 %1166  ;;  %1220 = vst.msk [vmem:[#allocation2 + $0x18] sm:$0xff] %vm1216_vm4, %v1169_v13  ;;  %v1140_v58 = vsel %vm11189_vm0, %v1138_v50, %v1139_v54  ;;  %v1768_v13 = vshll.u32 %v8961_v7, 16  ;;  %v3163_v2 = vrot.slane %v8976_v59, 1 }
  0xac   : > { %1219 = vst.msk [vmem:[#allocation2 + $0x10] sm:$0xff] %vm1216_vm4, %v1167_v9  ;;  %v3278_v24 = vld [vmem:[#allocation2] sm:$0xff]  ;;  %2879 = vrot.lane.b32.xlu1 %v2764_v25, %s9355_s7  ;;  %v8962_v9 = vld [vmem:[%s9417_s25 + $0x98] ss:$0 sps:$4 sm:$0x11]  }
  0xad   : > { %2877 = vrot.lane.b32.xlu0 %v2752_v14, %s9355_s7  ;;  %8674 = vmatprep.mubr.bf16.mxu0 %v3278_v24  ;;  %v8963_v14 = vld [vmem:[%s9417_s25 + $0x30] sm:$0xff]   ;;  %v1773_v16 = vshll.u32 %v8962_v9, 16  ;;  %v1770_v18 = vrot.slane %v1768_v13, 1 }
  0xae   : > { %v1369_v26 = vpop.permute.xlu1 %1368  ;;  %407 = vst.msk [vmem:[#allocation2 + $0x20] sm:$0xff] %vm402_vm2, %v8963_v14  ;;  %v8980_v14 = vld [vmem:[%s9417_s25 + $0xa4] ss:$0 sps:$4 sm:$0x11]  }
  0xaf   : > { %v1367_v22 = vpop.permute.xlu0 %1366  ;;  %1420 = vst.msk [vmem:[#allocation2 + $0x18] sm:$0xff] %vm1416_vm5, %v1369_v26  ;;  %v1775_v20 = vrot.slane %v1773_v16, 1  ;;  %v1771_v24 = vor.u32 %v1770_v18, %v1766_v12  ;;  %v772_v12 = vshll.u32 %v8978_v6, 16  ;;  %v3165_v16 = vrot.slane %v8979_v11, 1 }
  0xb0   : > { %1419 = vst.msk [vmem:[#allocation2 + $0x10] sm:$0xff] %vm1416_vm5, %v1367_v22  ;;  %v3279_v41 = vld [vmem:[#allocation2 + $0x8] sm:$0xff]  ;;  %856 = vrot.lane.b32.xlu1 %v751_v42, %s9352_s29  ;;  %v2766_v42 = vshrl.u32 %v8971_v37, 16  ;;  %v3166_v19 = vrot.slane %v8980_v14, 1 }
  0xb1   : > { %3202 = vrot.lane.b32.xlu0 %v3158_v27, %s9356_s8  ;;  %8675 = vmatmul.mubr.bf16.vlgmr.msra.gmra.mrb[0].mxu0 %v3279_v41  ;;  %v8965_v22 = vld [vmem:[%s9417_s25 + $0x8c] ss:$0 sps:$4 sm:$0x11]   ;;  %v2150_v27 = vrot.slane %v8964_v21, 1  ;;  %v1776_v30 = vsel %vm11190_vm1, %v1771_v24, %v1775_v20  ;;  %v774_v18 = vrot.slane %v772_v12, 1 }
  0xb2   : > { %v1856_v39 = vpop.permute.xlu1 %1855  ;;  %v2151_v28 = vrot.slane %v8965_v22, 1  ;;  %v8972_v41 = vld [vmem:[%s9417_s25 + $0x98] ss:$0 sps:$4 sm:$0x11]   ;;  %v777_v22 = vshrl.u32 %v8981_v17, 16  ;;  %v3167_v24 = vsel %vm11189_vm0, %v3165_v16, %v3166_v19  ;;  %v8999_v19 = vld [vmem:[%s9417_s25 + $0xa8] sm:$0xff]  }
  0xb3   : > { %v1854_v35 = vpop.permute.xlu0 %1853  ;;  %1907 = vst.msk [vmem:[#allocation2 + $0x18] sm:$0xff] %vm1903_vm6, %v1856_v39  ;;  %v2773_v47 = vshll.u32 %v8972_v41, 16  ;;  %v8982_v20 = vld [vmem:[%s9417_s25 + $0xa4] ss:$0 sps:$4 sm:$0x11]  }
  0xb4   : > { %1906 = vst.msk [vmem:[#allocation2 + $0x10] sm:$0xff] %vm1903_vm6, %v1854_v35  ;;  %858 = vrot.lane.b32.xlu1 %v763_v57, %s9352_s29  ;;  %v2152_v32 = vsel %vm11189_vm0, %v2150_v27, %v2151_v28  ;;  %v2154_v35 = vrot.slane %v8967_v31, 1  ;;  %v8975_v57 = vld [vmem:[%s9417_s25 + $0x90] sm:$0xfe]   ;;  %v8989_v28 = vld [vmem:[%s9417_s25 + $0x9c] sm:$0xff]  }
  0xb5   : > { %3204 = vrot.lane.b32.xlu0 %v3161_v43, %s9356_s8  ;;  %v2768_v43 = vshll.u32 %v8971_v37, 16  ;;  %v2775_v55 = vrot.slane %v2773_v47, 1  ;;  %v8983_v27 = vld [vmem:[%s9417_s25 + $0x90] sm:$0xfe]   ;;  %v8985_v37 = vld [vmem:[%s9417_s25 + $0x9c] sm:$0xfe]  }
  0xb6   : > { %v2181_v52 = vpop.permute.xlu1 %2180  ;;  %v2155_v39 = vsel %vm11189_vm0, %v2153_v33, %v2154_v35  ;;  %v1780_v47 = vshll.u32 %v8989_v28, 16  ;;  %v8997_v14 = vld [vmem:[%s9417_s25 + $0xb0] ss:$0 sps:$4 sm:$0x11]  }
  0xb7   : > { %v2179_v49 = vpop.permute.xlu0 %2178  ;;  %2232 = vst.msk [vmem:[#allocation2 + $0x18] sm:$0xff] %vm11191_vm7, %v2181_v52  ;;  %v2770_v46 = vrot.slane %v2768_v43, 1  ;;  %v1147_v43 = vrot.slane %v8985_v37, 1 }
  0xb8   : > { %2231 = vst.msk [vmem:[#allocation2 + $0x10] sm:$0xff] %vm11191_vm7, %v2179_v49  ;;  %1184 = vrot.lane.b32.xlu1 %v1143_v0, %s9351_s28  ;;  %v2778_v49 = vshrl.u32 %v8973_v44, 16 }
  0xb9   : > { %1182 = vrot.lane.b32.xlu0 %v1140_v58, %s9351_s28  ;;  %v2771_v54 = vor.u32 %v2770_v46, %v2766_v42  ;;  %v2782_v58 = vrot.slane %v2780_v51, 1  ;;  %v1778_v46 = vshrl.u32 %v8989_v28, 16  ;;  %v8988_v51 = vld [vmem:[%s9417_s25 + $0xa8] sm:$0xff]  }
  0xba   : > { %v2381_v1 = vpop.permute.xlu1 %2380 }
  0xbb   : > { %v2379_v63 = vpop.permute.xlu0 %2378  ;;  %2432 = vst.msk [vmem:[#allocation2 + $0x18] sm:$0xff] %vm2428_vm8, %v2381_v1  ;;  %v2776_v60 = vsel %vm11190_vm1, %v2771_v54, %v2775_v55  ;;  %v2783_v0 = vor.u32 %v2782_v58, %v2778_v49  ;;  %v8990_v49 = vld [vmem:[%s9417_s25 + $0xa4] ss:$0 sps:$4 sm:$0x11]   ;;  %v1782_v54 = vrot.slane %v1780_v47, 1  ;;  %v8993_v55 = vld [vmem:[%s9417_s25 + $0x48] sm:$0xff]  }
  0xbc   : > { %2431 = vst.msk [vmem:[#allocation2 + $0x10] sm:$0xff] %vm2428_vm8, %v2379_v63  ;;  %1384 = vrot.lane.b32.xlu1 %v8958_v4, %s9349_s26  ;;  %v3162_v63 = vrot.slane %v8975_v57, 1  ;;  %v8977_v4 = vld [vmem:[%s9417_s25 + $0x90] sm:$0xff]   ;;  %v1785_v57 = vshll.u32 %v8990_v49, 16 }
  0xbd   : > { %1382 = vrot.lane.b32.xlu0 %v8957_v61, %s9349_s26  ;;  %v2787_v61 = vrot.slane %v2785_v56, 1  ;;  %v765_v9 = vshrl.u32 %v8977_v4, 16  ;;  %v8992_v58 = vld [vmem:[%s9417_s25 + $0xb0] ss:$0 sps:$4 sm:$0x11]   ;;  %409 = vst.msk [vmem:[#allocation2 + $0x30] sm:$0xff] %vm402_vm2, %v8993_v55 }
  0xbe   : > { %v2868_v5 = vpop.permute.xlu1 %2867  ;;  %v3164_v8 = vsel %vm11189_vm0, %v3162_v63, %v3163_v2 }
  0xbf   : > { %v2866_v10 = vpop.permute.xlu0 %2865  ;;  %2919 = vst.msk [vmem:[#allocation2 + $0x18] sm:$0xff] %vm2915_vm9, %v2868_v5  ;;  %v2788_v7 = vsel %vm11190_vm1, %v2783_v0, %v2787_v61  ;;  %v1783_v61 = vor.u32 %v1782_v54, %v1778_v46  ;;  %v1797_v0 = vshll.u32 %v8992_v58, 16  ;;  %v9006_v46 = vld [vmem:[%s9417_s25 + $0xb0] ss:$0 sps:$4 sm:$0x11]  }
  0xc0   : > { %2918 = vst.msk [vmem:[#allocation2 + $0x10] sm:$0xff] %vm2915_vm9, %v2866_v10  ;;  %1871 = vrot.lane.b32.xlu1 %v1776_v30, %s9353_s30  ;;  %v767_v10 = vshll.u32 %v8977_v4, 16 }
  0xc1   : > { %1869 = vrot.lane.b32.xlu0 %v1764_v23, %s9353_s30  ;;  %v779_v23 = vshll.u32 %v8981_v17, 16  ;;  %v2160_v17 = vrot.slane %v8997_v14, 1 }
  0xc2   : > { %v845_v26 = vpop.permute.xlu1 %844  ;;  %v769_v5 = vrot.slane %v767_v10, 1 }
  0xc3   : > { %v3191_v25 = vpop.permute.xlu0 %3190  ;;  %895 = vst.msk [vmem:[#allocation2 + $0x20] sm:$0xff] %vm890_vm3, %v845_v26  ;;  %v781_v30 = vrot.slane %v779_v23, 1  ;;  %v9001_v23 = vld [vmem:[%s9417_s25 + $0xa8] sm:$0xff]  }
  0xc4   : > { %3243 = vst.msk [vmem:[#allocation2 + $0x10] sm:$0xff] %vm3240_vm10, %v3191_v25  ;;  %2196 = vrot.lane.b32.xlu1 %v2155_v39, %s9350_s27  ;;  %v770_v21 = vor.u32 %v769_v5, %v765_v9  ;;  %v784_v25 = vshll.u32 %v8982_v20, 16  ;;  %v8995_v9 = vld [vmem:[%s9417_s25 + $0xa4] ss:$0 sps:$4 sm:$0x11]   ;;  %v2792_v28 = vshll.u32 %v9001_v23, 16 }
  0xc5   : > { %3262 = vst.msk [vmem:[#allocation2 + $0x10] sm:$0xff] %vm3259_vm11, %v9357_v53  ;;  %2194 = vrot.lane.b32.xlu0 %v2152_v32, %s9350_s27  ;;  %v8984_v32 = vld [vmem:[%s9417_s25 + $0x98] ss:$0 sps:$4 sm:$0x11]   ;;  %v782_v35 = vor.u32 %v781_v30, %v777_v22  ;;  %v2157_v12 = vrot.slane %v8995_v9, 1 }
  0xc6   : > { %v847_v38 = vpop.permute.xlu1 %846  ;;  %v775_v29 = vsel %vm11190_vm1, %v770_v21, %v774_v18  ;;  %v786_v33 = vrot.slane %v784_v25, 1  ;;  %v9000_v21 = vld [vmem:[%s9417_s25 + $0xb4] sm:$0xff]   ;;  %v9004_v30 = vld [vmem:[%s9417_s25 + $0xbc] ss:$0 sps:$4 sm:$0x11]  }
  0xc7   : > { %v3193_v36 = vpop.permute.xlu0 %3192  ;;  %896 = vst.msk [vmem:[#allocation2 + $0x28] sm:$0xff] %vm890_vm3, %v847_v38  ;;  %v8986_v38 = vld [vmem:[%s9417_s25 + $0xa4] ss:$0 sps:$4 sm:$0x11]   ;;  %v2809_v37 = vshll.u32 %v9004_v30, 16 }
  0xc8   : > { %3244 = vst.msk [vmem:[#allocation2 + $0x18] sm:$0xff] %vm3240_vm10, %v3193_v36  ;;  %2396 = vrot.lane.b32.xlu1 %v8970_v40, %s9354_s6  ;;  %v1145_v36 = vrot.slane %v8984_v32, 1  ;;  %v8987_v40 = vld [vmem:[%s9417_s25 + $0x9c] sm:$0xff]   ;;  %v787_v41 = vsel %vm11190_vm1, %v782_v35, %v786_v33  ;;  %v1148_v44 = vrot.slane %v8986_v38, 1  ;;  %v2794_v35 = vrot.slane %v2792_v28, 1 }
  0xc9   : > { %3263 = vst.msk [vmem:[#allocation2 + $0x18] sm:$0xff] %vm3259_vm11, %v9357_v53  ;;  %2394 = vrot.lane.b32.xlu0 %v8969_v34, %s9354_s6  ;;  %v1144_v34 = vrot.slane %v8983_v27, 1  ;;  %v2790_v27 = vshrl.u32 %v9001_v23, 16 }
  0xca   : > { %v1173_v50 = vpop.permute.xlu1 %1172  ;;  %v1149_v48 = vsel %vm11189_vm0, %v1147_v43, %v1148_v44 }
  0xcb   : > { %v1171_v45 = vpop.permute.xlu0 %1170  ;;  %1222 = vst.msk [vmem:[#allocation2 + $0x28] sm:$0xff] %vm1216_vm4, %v1173_v50  ;;  %v1146_v42 = vsel %vm11189_vm0, %v1144_v34, %v1145_v36  ;;  %v8991_v50 = vld [vmem:[%s9417_s25 + $0xa8] sm:$0xff]   ;;  %v2795_v44 = vor.u32 %v2794_v35, %v2790_v27  ;;  %v9021_v27 = vld [vmem:[%s9417_s25 + $0xc0] sm:$0xff]  }
  0xcc   : > { %1221 = vst.msk [vmem:[#allocation2 + $0x20] sm:$0xff] %vm1216_vm4, %v1171_v45  ;;  %v3280_v52 = vld [vmem:[#allocation2 + $0x10] sm:$0xff]  ;;  %2883 = vrot.lane.b32.xlu1 %v2788_v7, %s9355_s7  ;;  %v1790_v59 = vshrl.u32 %v8991_v50, 16  ;;  %v1799_v7 = vrot.slane %v1797_v0, 1  ;;  %v9007_v34 = vld [vmem:[%s9417_s25 + $0xa8] sm:$0xff]   ;;  %v9018_v35 = vld [vmem:[%s9417_s25 + $0xc0] sm:$0xff]  }
  0xcd   : > { %8678 = vmatprep.mubr.bf16.mxu0 %v3280_v52  ;;  %2881 = vrot.lane.b32.xlu0 %v2776_v60, %s9355_s7  ;;  %v1792_v60 = vshll.u32 %v8991_v50, 16  ;;  %v789_v49 = vshrl.u32 %v9007_v34, 16  ;;  %v791_v54 = vshll.u32 %v9007_v34, 16 }
  0xce   : > { %v1373_v1 = vpop.permute.xlu1 %1372 }
  0xcf   : > { %v1371_v62 = vpop.permute.xlu0 %1370  ;;  %1422 = vst.msk [vmem:[#allocation2 + $0x28] sm:$0xff] %vm1416_vm5, %v1373_v1  ;;  %v1794_v63 = vrot.slane %v1792_v60, 1  ;;  %v8998_v1 = vld [vmem:[%s9417_s25 + $0x54] sm:$0xff]   ;;  %v793_v60 = vrot.slane %v791_v54, 1 }
  0xd0   : > { %1421 = vst.msk [vmem:[#allocation2 + $0x20] sm:$0xff] %vm1416_vm5, %v1371_v62  ;;  %v3281_v3 = vld [vmem:[#allocation2 + $0x18] sm:$0xff]  ;;  %860 = vrot.lane.b32.xlu1 %v775_v29, %s9352_s29  ;;  %v1787_v62 = vrot.slane %v1785_v57, 1 }
  0xd1   : > { %8679 = vmatmul.mubr.bf16.gmra.mrb[4].mxu0 %v3281_v3  ;;  %3206 = vrot.lane.b32.xlu0 %v3164_v8, %s9356_s8  ;;  %v8994_v3 = vld [vmem:[%s9417_s25 + $0x9c] sm:$0xfe]   ;;  %v1795_v6 = vor.u32 %v1794_v63, %v1790_v59  ;;  %410 = vst.msk [vmem:[#allocation2 + $0x38] sm:$0xff] %vm402_vm2, %v8998_v1  ;;  %v9010_v63 = vld [vmem:[%s9417_s25 + $0xbc] ss:$0 sps:$4 sm:$0x11]   ;;  %v794_v1 = vor.u32 %v793_v60, %v789_v49 }
  0xd2   : > { %v1860_v15 = vpop.permute.xlu1 %1859  ;;  %v1788_v4 = vsel %vm11190_vm1, %v1783_v61, %v1787_v62  ;;  %v2156_v10 = vrot.slane %v8994_v3, 1  ;;  %v9009_v62 = vld [vmem:[%s9417_s25 + $0xb4] sm:$0xfe]   ;;  %v9028_v49 = vld [vmem:[%s9417_s25 + $0x6c] sm:$0xff]  }
  0xd3   : > { %v1858_v13 = vpop.permute.xlu0 %1857  ;;  %1909 = vst.msk [vmem:[#allocation2 + $0x28] sm:$0xff] %vm1903_vm6, %v1860_v15  ;;  %v1800_v11 = vsel %vm11190_vm1, %v1795_v6, %v1799_v7  ;;  %v3171_v3 = vrot.slane %v9009_v62, 1  ;;  %v3172_v6 = vrot.slane %v9010_v63, 1  ;;  %v9012_v7 = vld [vmem:[%s9417_s25 + $0xbc] ss:$0 sps:$4 sm:$0x11]  }
  0xd4   : > { %1908 = vst.msk [vmem:[#allocation2 + $0x20] sm:$0xff] %vm1903_vm6, %v1858_v13  ;;  %862 = vrot.lane.b32.xlu1 %v787_v41, %s9352_s29  ;;  %v8996_v13 = vld [vmem:[%s9417_s25 + $0xa8] sm:$0xfe]   ;;  %v2158_v15 = vsel %vm11189_vm0, %v2156_v10, %v2157_v12  ;;  %v808_v14 = vshll.u32 %v9012_v7, 16 }
  0xd5   : > { %3208 = vrot.lane.b32.xlu0 %v3167_v24, %s9356_s8  ;;  %v2159_v16 = vrot.slane %v8996_v13, 1  ;;  %v9002_v24 = vld [vmem:[%s9417_s25 + $0xb0] ss:$0 sps:$4 sm:$0x11]   ;;  %v3173_v12 = vsel %vm11189_vm0, %v3171_v3, %v3172_v6  ;;  %412 = vst.msk [vmem:[#allocation2 + $0x48] sm:$0xff] %vm402_vm2, %v9028_v49  ;;  %v9031_v6 = vld [vmem:[%s9417_s25 + $0xc0] sm:$0xff]  }
  0xd6   : > { %v2185_v31 = vpop.permute.xlu1 %2184  ;;  %v2797_v29 = vshll.u32 %v9002_v24, 16  ;;  %v9030_v7 = vld [vmem:[%s9417_s25 + $0xcc] sm:$0xff]  }
  0xd7   : > { %v2183_v26 = vpop.permute.xlu0 %2182  ;;  %2234 = vst.msk [vmem:[#allocation2 + $0x28] sm:$0xff] %vm11191_vm7, %v2185_v31  ;;  %v2161_v20 = vsel %vm11189_vm0, %v2159_v16, %v2160_v17  ;;  %v810_v17 = vrot.slane %v808_v14, 1 }
  0xd8   : > { %2233 = vst.msk [vmem:[#allocation2 + $0x20] sm:$0xff] %vm11191_vm7, %v2183_v26  ;;  %1188 = vrot.lane.b32.xlu1 %v1149_v48, %s9351_s28  ;;  %v9003_v26 = vld [vmem:[%s9417_s25 + $0xb4] sm:$0xff]   ;;  %v2799_v36 = vrot.slane %v2797_v29, 1 }
  0xd9   : > { %1186 = vrot.lane.b32.xlu0 %v1146_v42, %s9351_s28  ;;  %v2802_v31 = vshrl.u32 %v9003_v26, 16  ;;  %v2804_v32 = vshll.u32 %v9003_v26, 16  ;;  %v9005_v42 = vld [vmem:[%s9417_s25 + $0xa8] sm:$0xfe]   ;;  %v9017_v26 = vld [vmem:[%s9417_s25 + $0xb4] sm:$0xff]  }
  0xda   : > { %v2385_v45 = vpop.permute.xlu1 %2384  ;;  %v3168_v48 = vrot.slane %v9005_v42, 1  ;;  %v2800_v50 = vsel %vm11190_vm1, %v2795_v44, %v2799_v36  ;;  %v9023_v42 = vld [vmem:[%s9417_s25 + $0x60] sm:$0xff]  }
  0xdb   : > { %v2383_v39 = vpop.permute.xlu0 %2382  ;;  %2434 = vst.msk [vmem:[#allocation2 + $0x28] sm:$0xff] %vm2428_vm8, %v2385_v45  ;;  %v2811_v45 = vrot.slane %v2809_v37, 1 }
  0xdc   : > { %2433 = vst.msk [vmem:[#allocation2 + $0x20] sm:$0xff] %vm2428_vm8, %v2383_v39  ;;  %1388 = vrot.lane.b32.xlu1 %v8988_v51, %s9349_s26  ;;  %v9011_v39 = vld [vmem:[%s9417_s25 + $0xb4] sm:$0xff]   ;;  %v3169_v51 = vrot.slane %v9006_v46, 1 }
  0xdd   : > { %1386 = vrot.lane.b32.xlu0 %v8987_v40, %s9349_s26  ;;  %v2806_v40 = vrot.slane %v2804_v32, 1  ;;  %v803_v0 = vshll.u32 %v9011_v39, 16  ;;  %v9020_v32 = vld [vmem:[%s9417_s25 + $0xbc] ss:$0 sps:$4 sm:$0x11]   ;;  %411 = vst.msk [vmem:[#allocation2 + $0x40] sm:$0xff] %vm402_vm2, %v9023_v42 }
  0xde   : > { %v2872_v56 = vpop.permute.xlu1 %2871  ;;  %v3170_v59 = vsel %vm11189_vm0, %v3168_v48, %v3169_v51  ;;  %v1809_v37 = vshll.u32 %v9020_v32, 16  ;;  %v9024_v48 = vld [vmem:[%s9417_s25 + $0xb4] sm:$0xfe]  }
  0xdf   : > { %v2870_v52 = vpop.permute.xlu0 %2869  ;;  %2921 = vst.msk [vmem:[#allocation2 + $0x28] sm:$0xff] %vm2915_vm9, %v2872_v56  ;;  %v2807_v47 = vor.u32 %v2806_v40, %v2802_v31  ;;  %v801_v56 = vshrl.u32 %v9011_v39, 16  ;;  %v1814_v39 = vshrl.u32 %v9021_v27, 16  ;;  %v1816_v40 = vshll.u32 %v9021_v27, 16 }
  0xe0   : > { %2920 = vst.msk [vmem:[#allocation2 + $0x20] sm:$0xff] %vm2915_vm9, %v2870_v52  ;;  %1875 = vrot.lane.b32.xlu1 %v1800_v11, %s9353_s30  ;;  %v9008_v52 = vld [vmem:[%s9417_s25 + $0xb0] ss:$0 sps:$4 sm:$0x11]   ;;  %v9013_v11 = vld [vmem:[%s9417_s25 + $0xa8] sm:$0xfe]  }
  0xe1   : > { %1873 = vrot.lane.b32.xlu0 %v1788_v4, %s9353_s30  ;;  %v2812_v57 = vsel %vm11190_vm1, %v2807_v47, %v2811_v45  ;;  %v796_v61 = vshll.u32 %v9008_v52, 16  ;;  %v1811_v44 = vrot.slane %v1809_v37, 1  ;;  %v1818_v47 = vrot.slane %v1816_v40, 1  ;;  %v9025_v52 = vld [vmem:[%s9417_s25 + $0xbc] ss:$0 sps:$4 sm:$0x11]  }
  0xe2   : > { %v849_v8 = vpop.permute.xlu1 %848  ;;  %v9039_v40 = vld [vmem:[%s9417_s25 + $0xcc] sm:$0xfe]  }
  0xe3   : > { %v3195_v2 = vpop.permute.xlu0 %3194  ;;  %897 = vst.msk [vmem:[#allocation2 + $0x30] sm:$0xff] %vm890_vm3, %v849_v8  ;;  %v805_v8 = vrot.slane %v803_v0, 1  ;;  %v1819_v54 = vor.u32 %v1818_v47, %v1814_v39 }
  0xe4   : > { %3245 = vst.msk [vmem:[#allocation2 + $0x20] sm:$0xff] %vm3240_vm10, %v3195_v2  ;;  %2200 = vrot.lane.b32.xlu1 %v2161_v20, %s9350_s27  ;;  %v798_v2 = vrot.slane %v796_v61, 1 }
  0xe5   : > { %3264 = vst.msk [vmem:[#allocation2 + $0x20] sm:$0xff] %vm3259_vm11, %v9357_v53  ;;  %2198 = vrot.lane.b32.xlu0 %v2158_v15, %s9350_s27  ;;  %v806_v13 = vor.u32 %v805_v8, %v801_v56  ;;  %v1150_v15 = vrot.slane %v9013_v11, 1  ;;  %v9032_v8 = vld [vmem:[%s9417_s25 + $0xc8] ss:$0 sps:$4 sm:$0x11]   ;;  %v2816_v11 = vshll.u32 %v9031_v6, 16 }
  0xe6   : > { %v851_v18 = vpop.permute.xlu1 %850  ;;  %v799_v10 = vsel %vm11190_vm1, %v794_v1, %v798_v2  ;;  %v9029_v1 = vld [vmem:[%s9417_s25 + $0xc0] sm:$0xff]  }
  0xe7   : > { %v3197_v5 = vpop.permute.xlu0 %3196  ;;  %898 = vst.msk [vmem:[#allocation2 + $0x38] sm:$0xff] %vm890_vm3, %v851_v18  ;;  %v811_v23 = vsel %vm11190_vm1, %v806_v13, %v810_v17  ;;  %v9034_v13 = vld [vmem:[%s9417_s25 + $0xd4] ss:$0 sps:$4 sm:$0x11]  }
  0xe8   : > { %3246 = vst.msk [vmem:[#allocation2 + $0x28] sm:$0xff] %vm3240_vm10, %v3197_v5  ;;  %2400 = vrot.lane.b32.xlu1 %v9000_v21, %s9354_s6  ;;  %v9014_v5 = vld [vmem:[%s9417_s25 + $0xb0] ss:$0 sps:$4 sm:$0x11]  }
  0xe9   : > { %3265 = vst.msk [vmem:[#allocation2 + $0x28] sm:$0xff] %vm3259_vm11, %v9357_v53  ;;  %2398 = vrot.lane.b32.xlu0 %v8999_v19, %s9354_s6  ;;  %v1151_v18 = vrot.slane %v9014_v5, 1  ;;  %v9015_v19 = vld [vmem:[%s9417_s25 + $0xb4] sm:$0xfe]  }
  0xea   : > { %v1177_v25 = vpop.permute.xlu1 %1176  ;;  %v9016_v21 = vld [vmem:[%s9417_s25 + $0xbc] ss:$0 sps:$4 sm:$0x11]  }
  0xeb   : > { %v1175_v22 = vpop.permute.xlu0 %1174  ;;  %1224 = vst.msk [vmem:[#allocation2 + $0x38] sm:$0xff] %vm1216_vm4, %v1177_v25  ;;  %v1152_v24 = vsel %vm11189_vm0, %v1150_v15, %v1151_v18  ;;  %v1153_v25 = vrot.slane %v9015_v19, 1  ;;  %v1154_v28 = vrot.slane %v9016_v21, 1  ;;  %v2833_v21 = vshll.u32 %v9034_v13, 16 }
  0xec   : > { %1223 = vst.msk [vmem:[#allocation2 + $0x30] sm:$0xff] %vm1216_vm4, %v1175_v22  ;;  %v3282_v33 = vld [vmem:[#allocation2 + $0x20] sm:$0xff]  ;;  %2887 = vrot.lane.b32.xlu1 %v2812_v57, %s9355_s7  ;;  %v9019_v22 = vld [vmem:[%s9417_s25 + $0xb4] sm:$0xff]   ;;  %v2163_v57 = vrot.slane %v9025_v52, 1 }
  0xed   : > { %8682 = vmatprep.mubr.bf16.mxu0 %v3282_v33  ;;  %2885 = vrot.lane.b32.xlu0 %v2800_v50, %s9355_s7  ;;  %v1802_v30 = vshrl.u32 %v9019_v22, 16  ;;  %v1804_v33 = vshll.u32 %v9019_v22, 16  ;;  %v1155_v34 = vsel %vm11189_vm0, %v1153_v25, %v1154_v28  ;;  %v9036_v25 = vld [vmem:[%s9417_s25 + $0xc8] ss:$0 sps:$4 sm:$0x11]   ;;  %v2835_v28 = vrot.slane %v2833_v21, 1 }
  0xee   : > { %v1377_v41 = vpop.permute.xlu1 %1376  ;;  %v3175_v32 = vrot.slane %v9036_v25, 1  ;;  %v9042_v52 = vld [vmem:[%s9417_s25 + $0xd4] ss:$0 sps:$4 sm:$0x11]  }
  0xef   : > { %v1375_v38 = vpop.permute.xlu0 %1374  ;;  %1424 = vst.msk [vmem:[#allocation2 + $0x38] sm:$0xff] %vm1416_vm5, %v1377_v41  ;;  %v1806_v36 = vrot.slane %v1804_v33, 1 }
  0xf0   : > { %1423 = vst.msk [vmem:[#allocation2 + $0x30] sm:$0xff] %vm1416_vm5, %v1375_v38  ;;  %v3283_v43 = vld [vmem:[#allocation2 + $0x28] sm:$0xff]  ;;  %864 = vrot.lane.b32.xlu1 %v799_v10, %s9352_s29  ;;  %v2814_v10 = vshrl.u32 %v9031_v6, 16 }
  0xf1   : > { %8683 = vmatmul.mubr.bf16.gmra.mrb[8].mxu0 %v3283_v43  ;;  %3210 = vrot.lane.b32.xlu0 %v3170_v59, %s9356_s8  ;;  %v9022_v38 = vld [vmem:[%s9417_s25 + $0xc8] ss:$0 sps:$4 sm:$0x11]   ;;  %v1807_v43 = vor.u32 %v1806_v36, %v1802_v30 }
  0xf2   : > { %v1864_v58 = vpop.permute.xlu1 %1863  ;;  %v1821_v45 = vshll.u32 %v9022_v38, 16  ;;  %v9027_v59 = vld [vmem:[%s9417_s25 + $0xc8] ss:$0 sps:$4 sm:$0x11]  }
  0xf3   : > { %v1862_v55 = vpop.permute.xlu0 %1861  ;;  %1911 = vst.msk [vmem:[#allocation2 + $0x38] sm:$0xff] %vm1903_vm6, %v1864_v58  ;;  %v1812_v50 = vsel %vm11190_vm1, %v1807_v43, %v1811_v44  ;;  %v9026_v58 = vld [vmem:[%s9417_s25 + $0xc0] sm:$0xfe]   ;;  %v2166_v0 = vrot.slane %v9027_v59, 1 }
  0xf4   : > { %1910 = vst.msk [vmem:[#allocation2 + $0x30] sm:$0xff] %vm1903_vm6, %v1862_v55  ;;  %866 = vrot.lane.b32.xlu1 %v811_v23, %s9352_s29  ;;  %v1823_v51 = vrot.slane %v1821_v45, 1  ;;  %v2162_v55 = vrot.slane %v9024_v48, 1  ;;  %v2165_v63 = vrot.slane %v9026_v58, 1 }
  0xf5   : > { %3212 = vrot.lane.b32.xlu0 %v3173_v12, %s9356_s8  ;;  %v2821_v12 = vshll.u32 %v9032_v8, 16  ;;  %v9038_v36 = vld [vmem:[%s9417_s25 + $0xc8] ss:$0 sps:$4 sm:$0x11]  }
  0xf6   : > { %v2189_v9 = vpop.permute.xlu1 %2188  ;;  %v1824_v61 = vsel %vm11190_vm1, %v1819_v54, %v1823_v51  ;;  %v2164_v62 = vsel %vm11189_vm0, %v2162_v55, %v2163_v57  ;;  %v2167_v3 = vsel %vm11189_vm0, %v2165_v63, %v2166_v0  ;;  %v820_v42 = vshll.u32 %v9038_v36, 16  ;;  %v9040_v43 = vld [vmem:[%s9417_s25 + $0xd4] ss:$0 sps:$4 sm:$0x11]   ;;  %v9043_v57 = vld [vmem:[%s9417_s25 + $0xc0] sm:$0xfe]  }
  0xf7   : > { %v2187_v4 = vpop.permute.xlu0 %2186  ;;  %2236 = vst.msk [vmem:[#allocation2 + $0x38] sm:$0xff] %vm11191_vm7, %v2189_v9  ;;  %v9033_v9 = vld [vmem:[%s9417_s25 + $0xcc] sm:$0xff]   ;;  %v2823_v19 = vrot.slane %v2821_v12, 1 }
  0xf8   : > { %2235 = vst.msk [vmem:[#allocation2 + $0x30] sm:$0xff] %vm11191_vm7, %v2187_v4  ;;  %1192 = vrot.lane.b32.xlu1 %v1155_v34, %s9351_s28  ;;  %v2826_v14 = vshrl.u32 %v9033_v9, 16  ;;  %v2828_v5 = vshll.u32 %v9033_v9, 16  ;;  %v9041_v34 = vld [vmem:[%s9417_s25 + $0xcc] sm:$0xff]   ;;  %v822_v49 = vrot.slane %v820_v42, 1  ;;  %v9051_v9 = vld [vmem:[%s9417_s25 + $0xd8] sm:$0xff]  }
  0xf9   : > { %1190 = vrot.lane.b32.xlu0 %v1152_v24, %s9351_s28  ;;  %v9035_v24 = vld [vmem:[%s9417_s25 + $0xc0] sm:$0xfe]   ;;  %v825_v44 = vshrl.u32 %v9041_v34, 16  ;;  %v827_v47 = vshll.u32 %v9041_v34, 16  ;;  %v9045_v63 = vld [vmem:[%s9417_s25 + $0xcc] sm:$0xfe]  }
  0xfa   : > { %v2389_v20 = vpop.permute.xlu1 %2388  ;;  %v1159_v6 = vrot.slane %v9045_v63, 1  ;;  %v9055_v34 = vld [vmem:[%s9417_s25 + $0xd4] ss:$0 sps:$4 sm:$0x11]   ;;  %v9058_v42 = vld [vmem:[%s9417_s25 + $0x84] sm:$0xff]  }
  0xfb   : > { %v2387_v16 = vpop.permute.xlu0 %2386  ;;  %2436 = vst.msk [vmem:[#allocation2 + $0x38] sm:$0xff] %vm2428_vm8, %v2389_v20  ;;  %v2830_v20 = vrot.slane %v2828_v5, 1  ;;  %v829_v54 = vrot.slane %v827_v47, 1  ;;  %v1838_v5 = vshrl.u32 %v9051_v9, 16 }
  0xfc   : > { %2435 = vst.msk [vmem:[#allocation2 + $0x30] sm:$0xff] %vm2428_vm8, %v2387_v16  ;;  %1392 = vrot.lane.b32.xlu1 %v9018_v35, %s9349_s26  ;;  %v2818_v16 = vrot.slane %v2816_v11, 1 }
  0xfd   : > { %1390 = vrot.lane.b32.xlu0 %v9017_v26, %s9349_s26  ;;  %v9037_v26 = vld [vmem:[%s9417_s25 + $0xc0] sm:$0xff]   ;;  %v2831_v27 = vor.u32 %v2830_v20, %v2826_v14  ;;  %v830_v59 = vor.u32 %v829_v54, %v825_v44  ;;  %414 = vst.msk [vmem:[#allocation2 + $0x58] sm:$0xff] %vm402_vm2, %v9058_v42  ;;  %v9061_v54 = vld [vmem:[%s9417_s25 + $0xd8] sm:$0xff]  }
  0xfe   : > { %v2876_v31 = vpop.permute.xlu1 %2875  ;;  %v2819_v23 = vor.u32 %v2818_v16, %v2814_v10  ;;  %v813_v33 = vshrl.u32 %v9037_v26, 16  ;;  %v815_v37 = vshll.u32 %v9037_v26, 16  ;;  %v9050_v16 = vld [vmem:[%s9417_s25 + $0xd4] ss:$0 sps:$4 sm:$0x11]  }
  0xff   : > { %v2874_v29 = vpop.permute.xlu0 %2873  ;;  %2923 = vst.msk [vmem:[#allocation2 + $0x38] sm:$0xff] %vm2915_vm9, %v2876_v31  ;;  %v3174_v31 = vrot.slane %v9035_v24, 1  ;;  %v2836_v35 = vsel %vm11190_vm1, %v2831_v27, %v2835_v28  ;;  %v9052_v24 = vld [vmem:[%s9417_s25 + $0xe0] ss:$0 sps:$4 sm:$0x11]  }
 0x100   : > { %2922 = vst.msk [vmem:[#allocation2 + $0x30] sm:$0xff] %vm2915_vm9, %v2874_v29  ;;  %1879 = vrot.lane.b32.xlu1 %v1824_v61, %s9353_s30  ;;  %v2824_v30 = vsel %vm11190_vm1, %v2819_v23, %v2823_v19  ;;  %v9044_v61 = vld [vmem:[%s9417_s25 + $0xc8] ss:$0 sps:$4 sm:$0x11]   ;;  %v1833_v23 = vshll.u32 %v9050_v16, 16  ;;  %v1845_v28 = vshll.u32 %v9052_v24, 16 }
 0x101   : > { %1877 = vrot.lane.b32.xlu0 %v1812_v50, %s9353_s30  ;;  %v3176_v39 = vsel %vm11189_vm0, %v3174_v31, %v3175_v32  ;;  %v3178_v50 = vrot.slane %v9040_v43, 1  ;;  %v9067_v16 = vld [vmem:[%s9417_s25 + $0xe4] sm:$0xfe]  }
 0x102   : > { %v853_v46 = vpop.permute.xlu1 %852  ;;  %v1835_v27 = vrot.slane %v1833_v23, 1  ;;  %v1847_v32 = vrot.slane %v1845_v28, 1  ;;  %v9071_v23 = vld [vmem:[%s9417_s25 + $0xa8] sm:$0xff]  }
 0x103   : > { %v3199_v41 = vpop.permute.xlu0 %3198  ;;  %899 = vst.msk [vmem:[#allocation2 + $0x40] sm:$0xff] %vm890_vm3, %v853_v46  ;;  %v3177_v46 = vrot.slane %v9039_v40, 1  ;;  %v9057_v40 = vld [vmem:[%s9417_s25 + $0xe0] ss:$0 sps:$4 sm:$0x11]  }
 0x104   : > { %3247 = vst.msk [vmem:[#allocation2 + $0x30] sm:$0xff] %vm3240_vm10, %v3199_v41  ;;  %2204 = vrot.lane.b32.xlu1 %v2167_v3, %s9350_s27  ;;  %v817_v41 = vrot.slane %v815_v37, 1  ;;  %v9046_v3 = vld [vmem:[%s9417_s25 + $0xd4] ss:$0 sps:$4 sm:$0x11]   ;;  %v2172_v44 = vrot.slane %v9057_v40, 1 }
 0x105   : > { %3266 = vst.msk [vmem:[#allocation2 + $0x30] sm:$0xff] %vm3259_vm11, %v9357_v53  ;;  %2202 = vrot.lane.b32.xlu0 %v2164_v62, %s9350_s27  ;;  %v1156_v62 = vrot.slane %v9043_v57, 1  ;;  %v1160_v12 = vrot.slane %v9046_v3, 1  ;;  %v9056_v37 = vld [vmem:[%s9417_s25 + $0xd8] sm:$0xfe]  }
 0x106   : > { %v855_v60 = vpop.permute.xlu1 %854  ;;  %v818_v48 = vor.u32 %v817_v41, %v813_v33  ;;  %v2171_v41 = vrot.slane %v9056_v37, 1  ;;  %417 = vst.msk [vmem:[#allocation2 + $0x70] sm:$0xff] %vm402_vm2, %v9071_v23 }
 0x107   : > { %v3201_v56 = vpop.permute.xlu0 %3200  ;;  %900 = vst.msk [vmem:[#allocation2 + $0x48] sm:$0xff] %vm890_vm3, %v855_v60  ;;  %v832_v60 = vshll.u32 %v9042_v52, 16  ;;  %v9060_v52 = vld [vmem:[%s9417_s25 + $0xe4] sm:$0xff]  }
 0x108   : > { %3248 = vst.msk [vmem:[#allocation2 + $0x38] sm:$0xff] %vm3240_vm10, %v3201_v56  ;;  %2404 = vrot.lane.b32.xlu1 %v9030_v7, %s9354_s6  ;;  %v823_v55 = vsel %vm11190_vm1, %v818_v48, %v822_v49  ;;  %v3179_v56 = vsel %vm11189_vm0, %v3177_v46, %v3178_v50  ;;  %v9047_v7 = vld [vmem:[%s9417_s25 + $0xcc] sm:$0xff]   ;;  %v9059_v48 = vld [vmem:[%s9417_s25 + $0xd8] sm:$0xff]  }
 0x109   : > { %3267 = vst.msk [vmem:[#allocation2 + $0x38] sm:$0xff] %vm3259_vm11, %v9357_v53  ;;  %2402 = vrot.lane.b32.xlu0 %v9029_v1, %s9354_s6  ;;  %v834_v1 = vrot.slane %v832_v60, 1  ;;  %v2840_v60 = vshll.u32 %v9061_v54, 16 }
 0x10a   : > { %v1181_v4 = vpop.permute.xlu1 %1180 }
 0x10b   : > { %v1179_v2 = vpop.permute.xlu0 %1178  ;;  %1226 = vst.msk [vmem:[#allocation2 + $0x48] sm:$0xff] %vm1216_vm4, %v1181_v4  ;;  %v9049_v4 = vld [vmem:[%s9417_s25 + $0xcc] sm:$0xff]   ;;  %v835_v10 = vsel %vm11190_vm1, %v830_v59, %v834_v1  ;;  %v2838_v59 = vshrl.u32 %v9061_v54, 16 }
 0x10c   : > { %1225 = vst.msk [vmem:[#allocation2 + $0x40] sm:$0xff] %vm1216_vm4, %v1179_v2  ;;  %v3284_v18 = vld [vmem:[#allocation2 + $0x30] sm:$0xff]  ;;  %2891 = vrot.lane.b32.xlu1 %v2836_v35, %s9355_s7  ;;  %v1157_v2 = vrot.slane %v9044_v61, 1  ;;  %v1826_v13 = vshrl.u32 %v9049_v4, 16  ;;  %v1828_v14 = vshll.u32 %v9049_v4, 16 }
 0x10d   : > { %8686 = vmatprep.mubr.bf16.mxu0 %v3284_v18  ;;  %2889 = vrot.lane.b32.xlu0 %v2824_v30, %s9355_s7  ;;  %v9048_v18 = vld [vmem:[%s9417_s25 + $0xd8] sm:$0xff]   ;;  %v9054_v30 = vld [vmem:[%s9417_s25 + $0xcc] sm:$0xfe]  }
 0x10e   : > { %v1381_v17 = vpop.permute.xlu1 %1380  ;;  %v1158_v11 = vsel %vm11189_vm0, %v1156_v62, %v1157_v2  ;;  %v1830_v20 = vrot.slane %v1828_v14, 1  ;;  %v2168_v36 = vrot.slane %v9054_v30, 1  ;;  %v9064_v62 = vld [vmem:[%s9417_s25 + $0xec] ss:$0 sps:$4 sm:$0x11]   ;;  %v2842_v2 = vrot.slane %v2840_v60, 1 }
 0x10f   : > { %v1379_v15 = vpop.permute.xlu0 %1378  ;;  %1426 = vst.msk [vmem:[#allocation2 + $0x48] sm:$0xff] %vm1416_vm5, %v1381_v17  ;;  %v1840_v17 = vshll.u32 %v9051_v9, 16  ;;  %v2857_v4 = vshll.u32 %v9064_v62, 16  ;;  %v9066_v9 = vld [vmem:[%s9417_s25 + $0xe0] ss:$0 sps:$4 sm:$0x11]  }
 0x110   : > { %1425 = vst.msk [vmem:[#allocation2 + $0x40] sm:$0xff] %vm1416_vm5, %v1379_v15  ;;  %v3285_v22 = vld [vmem:[#allocation2 + $0x38] sm:$0xff]  ;;  %868 = vrot.lane.b32.xlu1 %v823_v55, %s9352_s29  ;;  %v1161_v15 = vsel %vm11189_vm0, %v1159_v6, %v1160_v12  ;;  %v1831_v25 = vor.u32 %v1830_v20, %v1826_v13  ;;  %v9062_v55 = vld [vmem:[%s9417_s25 + $0xe0] ss:$0 sps:$4 sm:$0x11]   ;;  %v9069_v13 = vld [vmem:[%s9417_s25 + $0x90] sm:$0xff]  }
 0x111   : > { %8687 = vmatmul.mubr.bf16.gmra.mrb[12].mxu0 %v3285_v22  ;;  %3214 = vrot.lane.b32.xlu0 %v3176_v39, %s9356_s8  ;;  %v9053_v22 = vld [vmem:[%s9417_s25 + $0x78] sm:$0xff]   ;;  %v1842_v26 = vrot.slane %v1840_v17, 1  ;;  %v2169_v39 = vrot.slane %v9055_v34, 1  ;;  %v2845_v61 = vshll.u32 %v9062_v55, 16  ;;  %415 = vst.msk [vmem:[#allocation2 + $0x60] sm:$0xff] %vm402_vm2, %v9069_v13  ;;  %v9319_v60 = vld [vmem:[%s11186_s3 + $0x30] sm:$0xff]  }
 0x112   : > { %v1868_v38 = vpop.permute.xlu1 %1867  ;;  %413 = vst.msk [vmem:[#allocation2 + $0x50] sm:$0xff] %vm402_vm2, %v9053_v22  ;;  %v1836_v31 = vsel %vm11190_vm1, %v1831_v25, %v1835_v27  ;;  %v9070_v20 = vld [vmem:[%s9417_s25 + $0x9c] sm:$0xff]   ;;  %v3183_v22 = vrot.slane %v9067_v16, 1  ;;  %v9072_v27 = vld [vmem:[%s9417_s25 + $0xb4] sm:$0xff]  }
 0x113   : > { %v1866_v29 = vpop.permute.xlu0 %1865  ;;  %1913 = vst.msk [vmem:[#allocation2 + $0x48] sm:$0xff] %vm1903_vm6, %v1868_v38  ;;  %v2170_v43 = vsel %vm11189_vm0, %v2168_v36, %v2169_v39  ;;  %v2847_v3 = vrot.slane %v2845_v61, 1 }
 0x114   : > { %1912 = vst.msk [vmem:[#allocation2 + $0x40] sm:$0xff] %vm1903_vm6, %v1866_v29  ;;  %870 = vrot.lane.b32.xlu1 %v835_v10, %s9352_s29  ;;  %v1843_v29 = vor.u32 %v1842_v26, %v1838_v5  ;;  %v2843_v10 = vor.u32 %v2842_v2, %v2838_v59  ;;  %s9360_s29 = smov 48  }
 0x115   : > { %3216 = vrot.lane.b32.xlu0 %v3179_v56, %s9356_s8  ;;  %v9063_v56 = vld [vmem:[%s9417_s25 + $0xe4] sm:$0xff]   ;;  %416 = vst.msk [vmem:[#allocation2 + $0x68] sm:$0xff] %vm402_vm2, %v9070_v20  ;;  %418 = vst.msk [vmem:[#allocation2 + $0x78] sm:$0xff] %vm402_vm2, %v9072_v27 }
 0x116   : > { %v2193_v51 = vpop.permute.xlu1 %2192  ;;  %v1848_v38 = vsel %vm11190_vm1, %v1843_v29, %v1847_v32  ;;  %v2852_v1 = vshll.u32 %v9063_v56, 16 }
 0x117   : > { %v2191_v45 = vpop.permute.xlu0 %2190  ;;  %2238 = vst.msk [vmem:[#allocation2 + $0x48] sm:$0xff] %vm11191_vm7, %v2193_v51  ;;  %v2173_v51 = vsel %vm11189_vm0, %v2171_v41, %v2172_v44  ;;  %v4200_v41 = vld [vmem:[#allocation3] sm:$0xf] }
 0x118   : > { %2237 = vst.msk [vmem:[#allocation2 + $0x40] sm:$0xff] %vm11191_vm7, %v2191_v45  ;;  %1196 = vrot.lane.b32.xlu1 %v1161_v15, %s9351_s28  ;;  %v9358_v45 = vmov 0.0|0.0   ;;  %v3181_v15 = vrot.slane %v9066_v9, 1 }
 0x119   : > { %1194 = vrot.lane.b32.xlu0 %v1158_v11, %s9351_s28  ;;  %v10058_v46 = vcombine.low %v9358_v45, %v9358_v45  ;;  %v2859_v11 = vrot.slane %v2857_v4, 1  ;;  %v8225_v29 = vcombine.high %v9358_v45, %v9358_v45 }
 0x11a   : > { %v2393_v0 = vpop.permute.xlu1 %2392 }
 0x11b   : > { %v2391_v58 = vpop.permute.xlu0 %2390  ;;  %2438 = vst.msk [vmem:[#allocation2 + $0x48] sm:$0xff] %vm2428_vm8, %v2393_v0  ;;  %v3838_v57 = vshrl.u32 %v10058_v46, 16  ;;  %v2850_v0 = vshrl.u32 %v9063_v56, 16  ;;  %v3841_v34 = vshll.u32 %v10058_v46, 16  ;;  %v3846_v39 = vshrl.u32 %v8225_v29, 16 }
 0x11c   : > { %2437 = vst.msk [vmem:[#allocation2 + $0x40] sm:$0xff] %vm2428_vm8, %v2391_v58  ;;  %1396 = vrot.lane.b32.xlu1 %v9048_v18, %s9349_s26  ;;  %v2848_v18 = vsel %vm11190_vm1, %v2843_v10, %v2847_v3  ;;  %v3849_v40 = vshll.u32 %v8225_v29, 16 }
 0x11d   : > { %1394 = vrot.lane.b32.xlu0 %v9047_v7, %s9349_s26  ;;  %v2854_v7 = vrot.slane %v2852_v1, 1  ;;  %v3840_v32 = vrot.slane %v3838_v57, 7  ;;  %v10125_v44 = vrot.slane %v3846_v39, 7 }
 0x11e   : > { %v2880_v19 = vpop.permute.xlu1 %2879 }
 0x11f   : > { %v2878_v8 = vpop.permute.xlu0 %2877  ;;  %2925 = vst.msk [vmem:[#allocation2 + $0x48] sm:$0xff] %vm2915_vm9, %v2880_v19  ;;  %v2855_v14 = vor.u32 %v2854_v7, %v2850_v0  ;;  %v9068_v19 = vld [vmem:[%s9417_s25 + $0xec] ss:$0 sps:$4 sm:$0x11]  }
 0x120   : > { %2924 = vst.msk [vmem:[#allocation2 + $0x40] sm:$0xff] %vm2915_vm9, %v2878_v8  ;;  %1883 = vrot.lane.b32.xlu1 %v1848_v38, %s9353_s30  ;;  %v9065_v8 = vld [vmem:[%s9417_s25 + $0xd8] sm:$0xfe]   ;;  %v3184_v25 = vrot.slane %v9068_v19, 1  ;;  %v10116_v38 = vor.u32 %v3841_v34, %v3840_v32 }
 0x121   : > { %1881 = vrot.lane.b32.xlu0 %v1836_v31, %s9353_s30  ;;  %v3180_v5 = vrot.slane %v9065_v8, 1  ;;  %v9073_v31 = vld [vmem:[%s9417_s25 + $0xc0] sm:$0xff]  }
 0x122   : > { %v857_v33 = vpop.permute.xlu1 %856  ;;  %v3185_v30 = vsel %vm11189_vm0, %v3183_v22, %v3184_v25  ;;  %419 = vst.msk [vmem:[#allocation2 + $0x80] sm:$0xff] %vm402_vm2, %v9073_v31 }
 0x123   : > { %v3203_v21 = vpop.permute.xlu0 %3202  ;;  %901 = vst.msk [vmem:[#allocation2 + $0x50] sm:$0xff] %vm890_vm3, %v857_v33  ;;  %v3182_v24 = vsel %vm11189_vm0, %v3180_v5, %v3181_v15  ;;  %v9074_v33 = vld [vmem:[%s9417_s25 + $0xcc] sm:$0xff]   ;;  %vm10112_vm0 = vmand %vm11192_vm12, %vm4198_vm14 }
 0x124   : > { %3249 = vst.msk [vmem:[#allocation2 + $0x40] sm:$0xff] %vm3240_vm10, %v3203_v21  ;;  %2208 = vrot.lane.b32.xlu1 %v2173_v51, %s9350_s27  ;;  %v2860_v21 = vsel %vm11190_vm1, %v2855_v14, %v2859_v11  ;;  %vm3835_vm1 = vsmask.f32 4368  ;;  %v4201_v45 = vsel %vm10112_vm0, %v10116_v38, %v4200_v41  ;;  %v3853_v51 = vrot.slane %v10125_v44, 4 }
 0x125   : > { %3268 = vst.msk [vmem:[#allocation2 + $0x40] sm:$0xff] %vm3259_vm11, %v9357_v53  ;;  %2206 = vrot.lane.b32.xlu0 %v2170_v43, %s9350_s27  ;;  %v3844_v43 = vrot.slane %v3840_v32, 4  ;;  %4202 = vst [vmem:[#allocation3] sm:$0xf] %v4201_v45  ;;  %s9359_s27 = smov 40  }
 0x126   : > { %v859_v47 = vpop.permute.xlu1 %858  ;;  %420 = vst.msk [vmem:[#allocation2 + $0x88] sm:$0xff] %vm402_vm2, %v9074_v33  ;;  %vm10131_vm2 = vmor %vm3834_vm13, %vm3835_vm1 }
 0x127   : > { %v3205_v35 = vpop.permute.xlu0 %3204  ;;  %902 = vst.msk [vmem:[#allocation2 + $0x58] sm:$0xff] %vm890_vm3, %v859_v47  ;;  %vm10155_vm1 = vmand %vm4205_vm15, %vm4198_vm14  ;;  %vm11203_vm14 = vcmask 195744  }
 0x128   : > { %3250 = vst.msk [vmem:[#allocation2 + $0x48] sm:$0xff] %vm3240_vm10, %v3205_v35  ;;  %2408 = vrot.lane.b32.xlu1 %v9060_v52, %s9354_s6 }
 0x129   : > { %3269 = vst.msk [vmem:[#allocation2 + $0x48] sm:$0xff] %vm3259_vm11, %v9357_v53  ;;  %2406 = vrot.lane.b32.xlu0 %v9059_v48, %s9354_s6  ;;  %v4207_v48 = vld [vmem:[#allocation3 + $0x8] sm:$0x1] }
 0x12a   : > { %v1185_v58 = vpop.permute.xlu1 %1184 }
 0x12b   : > { %v1183_v49 = vpop.permute.xlu0 %1182  ;;  %1228 = vst.msk [vmem:[#allocation2 + $0x58] sm:$0xff] %vm1216_vm4, %v1185_v58 }
 0x12c   : > { %v3286_v50 = vld [vmem:[#allocation2 + $0x40] sm:$0xff]  ;;  %1227 = vst.msk [vmem:[#allocation2 + $0x50] sm:$0xff] %vm1216_vm4, %v1183_v49  ;;  %2895 = vrot.lane.b32.xlu1 %v2860_v21, %s9355_s7  ;;  %v4329_v57 = vld [vmem:[#allocation3] sm:$0x1] }
 0x12d   : > { %8690 = vmatprep.mubr.bf16.mxu0 %v3286_v50  ;;  %2893 = vrot.lane.b32.xlu0 %v2848_v18, %s9355_s7  ;;  %v3851_v50 = vor.u32 %v3849_v40, %v10125_v44  ;;  %s9361_s7 = smov 64   ;;  %v9314_v44 = vld [vmem:[%s11186_s3 + $0x18] sm:$0xff]  }
 0x12e   : > { %v1385_v12 = vpop.permute.xlu1 %1384 }
 0x12f   : > { %v1383_v63 = vpop.permute.xlu0 %1382  ;;  %1428 = vst.msk [vmem:[#allocation2 + $0x58] sm:$0xff] %vm1416_vm5, %v1385_v12  ;;  %v3852_v52 = vsel %vm10131_vm2, %v3844_v43, %v3851_v50  ;;  %v10203_v50 = vld [vmem:[%s11185_s2] ss:$0 sm:$0xff] }
 0x130   : > { %1427 = vst.msk [vmem:[#allocation2 + $0x50] sm:$0xff] %vm1416_vm5, %v1383_v63  ;;  %v3287_v6 = vld [vmem:[#allocation2 + $0x48] sm:$0xff]  ;;  %3220 = vrot.lane.b32.xlu1 %v3185_v30, %s9356_s8 }
 0x131   : > { %8691 = vmatmul.mubr.bf16.gmra.mrb[16].mxu0 %v3287_v6  ;;  %3218 = vrot.lane.b32.xlu0 %v3182_v24, %s9356_s8  ;;  %4204 = vst.msk [vmem:[#allocation3 + $0x4] sm:$0xf] %vm11192_vm12, %v3852_v52  ;;  %4325 = vst.msk [vmem:[#allocation3 + $0xd0] sm:$0xf] %vm11192_vm12, %v3852_v52 }
 0x132   : > { %v1872_v26 = vpop.permute.xlu1 %1871  ;;  %vm11205_vm12 = vmmov %vm11203_vm14 }
 0x133   : > { %v1870_v17 = vpop.permute.xlu0 %1869  ;;  %1915 = vst.msk [vmem:[#allocation2 + $0x58] sm:$0xff] %vm1903_vm6, %v1872_v26 }
 0x134   : > { %1914 = vst.msk [vmem:[#allocation2 + $0x50] sm:$0xff] %vm1903_vm6, %v1870_v17 }
 0x136   : > { %v2197_v35 = vpop.permute.xlu1 %2196 }
 0x137   : > { %v2195_v28 = vpop.permute.xlu0 %2194  ;;  %2240 = vst.msk [vmem:[#allocation2 + $0x58] sm:$0xff] %vm11191_vm7, %v2197_v35 }
 0x138   : > { %2239 = vst.msk [vmem:[#allocation2 + $0x50] sm:$0xff] %vm11191_vm7, %v2195_v28  ;;  %vm10121_vm7 = vmand %vm4205_vm15, %vm3834_vm13  ;;  %v9077_v10 = vld [vmem:[#allocation3] sm:$0xfe]   ;;  %vm11202_vm13 = vsmask.f32 7424  ;;  %vm11204_vm15 = vcmask 1046528  }
 0x139   : > { %v4208_v54 = vsel %vm10121_vm7, %v3853_v51, %v4207_v48  ;;  %v4330_v58 = vsel %vm10121_vm7, 0, %v4329_v57  ;;  %v5192_v18 = vrot.slane %v9077_v10, 1 }
 0x13a   : > { %v2397_v46 = vpop.permute.xlu1 %2396  ;;  %4209 = vst [vmem:[#allocation3 + $0x8] sm:$0x1] %v4208_v54  ;;  %4331 = vst [vmem:[#allocation3] sm:$0x1] %v4330_v58 }
 0x13b   : > { %v2395_v36 = vpop.permute.xlu0 %2394  ;;  %2440 = vst.msk [vmem:[#allocation2 + $0x58] sm:$0xff] %vm2428_vm8, %v2397_v46 }
 0x13c   : > { %2439 = vst.msk [vmem:[#allocation2 + $0x50] sm:$0xff] %vm2428_vm8, %v2395_v36 }
 0x13e   : > { %v2884_v55 = vpop.permute.xlu1 %2883 }
 0x13f   : > { %v2882_v49 = vpop.permute.xlu0 %2881  ;;  %2927 = vst.msk [vmem:[#allocation2 + $0x58] sm:$0xff] %vm2915_vm9, %v2884_v55 }
 0x140   : > { %2926 = vst.msk [vmem:[#allocation2 + $0x50] sm:$0xff] %vm2915_vm9, %v2882_v49 }
 0x141   : > { %v4384_v62 = vld [vmem:[#allocation3 + $0x8] sm:$0x1]  ;;  %v9075_v3 = vld [vmem:[#allocation3] sm:$0xff]  }
 0x142   : > { %v861_v61 = vpop.permute.xlu1 %860  ;;  %v4385_v63 = vsel %vm10155_vm1, 0, %v4384_v62  ;;  %v4760_v8 = vshrl.u32 %v9075_v3, 16  ;;  %v4762_v9 = vshll.u32 %v9075_v3, 16 }
 0x143   : > { %v3207_v56 = vpop.permute.xlu0 %3206  ;;  %903 = vst.msk [vmem:[#allocation2 + $0x60] sm:$0xff] %vm890_vm3, %v861_v61  ;;  %4386 = vst [vmem:[#allocation3 + $0x8] sm:$0x1] %v4385_v63 }
 0x144   : > { %3251 = vst.msk [vmem:[#allocation2 + $0x50] sm:$0xff] %vm3240_vm10, %v3207_v56  ;;  %v4764_v12 = vrot.slane %v4762_v9, 1 }
 0x145   : > { %3270 = vst.msk [vmem:[#allocation2 + $0x50] sm:$0xff] %vm3259_vm11, %v9357_v53 }
 0x146   : > { %v863_v0 = vpop.permute.xlu1 %862  ;;  %v4765_v15 = vor.u32 %v4764_v12, %v4760_v8 }
 0x147   : > { %v3209_v59 = vpop.permute.xlu0 %3208  ;;  %904 = vst.msk [vmem:[#allocation2 + $0x68] sm:$0xff] %vm890_vm3, %v863_v0 }
 0x148   : > { %3252 = vst.msk [vmem:[#allocation2 + $0x58] sm:$0xff] %vm3240_vm10, %v3209_v59 }
 0x149   : > { %3271 = vst.msk [vmem:[#allocation2 + $0x58] sm:$0xff] %vm3259_vm11, %v9357_v53 }
 0x14a   : > { %v1189_v4 = vpop.permute.xlu1 %1188  ;;  %v9076_v11 = vld [vmem:[#allocation3 + $0x8] ss:$0 sps:$4 sm:$0x11]  }
 0x14b   : > { %v1187_v1 = vpop.permute.xlu0 %1186  ;;  %1230 = vst.msk [vmem:[#allocation2 + $0x68] sm:$0xff] %vm1216_vm4, %v1189_v4  ;;  %v9078_v13 = vld [vmem:[#allocation3 + $0x8] ss:$0 sps:$4 sm:$0x11]   ;;  %v4767_v16 = vshll.u32 %v9076_v11, 16 }
 0x14c   : > { %v3288_v2 = vld [vmem:[#allocation2 + $0x50] sm:$0xff]  ;;  %1229 = vst.msk [vmem:[#allocation2 + $0x60] sm:$0xff] %vm1216_vm4, %v1187_v1  ;;  %v5193_v19 = vrot.slane %v9078_v13, 1  ;;  %v4210_v11 = vld [vmem:[#allocation3 + $0xc] sm:$0xf] }
 0x14d   : > { %8694 = vmatprep.mubr.bf16.mxu0 %v3288_v2  ;;  %v4769_v17 = vrot.slane %v4767_v16, 1  ;;  %v4214_v16 = vld [vmem:[#allocation3 + $0x14] sm:$0x1] }
 0x14e   : > { %v1389_v14 = vpop.permute.xlu1 %1388  ;;  %v5194_v23 = vsel %vm11204_vm15, %v5192_v18, %v5193_v19 }
 0x14f   : > { %v1387_v6 = vpop.permute.xlu0 %1386  ;;  %1430 = vst.msk [vmem:[#allocation2 + $0x68] sm:$0xff] %vm1416_vm5, %v1389_v14  ;;  %v4770_v22 = vsel %vm11202_vm13, %v4765_v15, %v4769_v17  ;;  %vm11206_vm13 = vmmov %vm11205_vm12 }
 0x150   : > { %v3289_v7 = vld [vmem:[#allocation2 + $0x58] sm:$0xff]  ;;  %1429 = vst.msk [vmem:[#allocation2 + $0x60] sm:$0xff] %vm1416_vm5, %v1387_v6  ;;  %4951 = vrot.lane.b32.xlu0 %v4770_v22, %s9351_s28 }
 0x151   : > { %8695 = vmatmul.mubr.bf16.gmra.mrb[20].mxu0 %v3289_v7 }
 0x152   : > { %v1876_v20 = vpop.permute.xlu1 %1875 }
 0x153   : > { %v1874_v5 = vpop.permute.xlu0 %1873  ;;  %1917 = vst.msk [vmem:[#allocation2 + $0x68] sm:$0xff] %vm1903_vm6, %v1876_v20 }
 0x154   : > { %1916 = vst.msk [vmem:[#allocation2 + $0x60] sm:$0xff] %vm1903_vm6, %v1874_v5  ;;  %5240 = vrot.lane.b32.xlu0 %v5194_v23, %s9353_s30 }
 0x156   : > { %v2201_v24 = vpop.permute.xlu1 %2200 }
 0x157   : > { %v2199_v21 = vpop.permute.xlu0 %2198  ;;  %2242 = vst.msk [vmem:[#allocation2 + $0x68] sm:$0xff] %vm11205_vm12, %v2201_v24 }
 0x158   : > { %2241 = vst.msk [vmem:[#allocation2 + $0x60] sm:$0xff] %vm11203_vm14, %v2199_v21 }
 0x15a   : > { %v2401_v26 = vpop.permute.xlu1 %2400 }
 0x15b   : > { %v2399_v25 = vpop.permute.xlu0 %2398  ;;  %2442 = vst.msk [vmem:[#allocation2 + $0x68] sm:$0xff] %vm2428_vm8, %v2401_v26 }
 0x15c   : > { %2441 = vst.msk [vmem:[#allocation2 + $0x60] sm:$0xff] %vm2428_vm8, %v2399_v25 }
 0x15e   : > { %v2888_v28 = vpop.permute.xlu1 %2887 }
 0x15f   : > { %v2886_v27 = vpop.permute.xlu0 %2885  ;;  %2929 = vst.msk [vmem:[#allocation2 + $0x68] sm:$0xff] %vm2915_vm9, %v2888_v28 }
 0x160   : > { %2928 = vst.msk [vmem:[#allocation2 + $0x60] sm:$0xff] %vm2915_vm9, %v2886_v27 }
 0x162   : > { %v865_v30 = vpop.permute.xlu1 %864 }
 0x163   : > { %v3211_v29 = vpop.permute.xlu0 %3210  ;;  %905 = vst.msk [vmem:[#allocation2 + $0x70] sm:$0xff] %vm890_vm3, %v865_v30 }
 0x164   : > { %3253 = vst.msk [vmem:[#allocation2 + $0x60] sm:$0xff] %vm3240_vm10, %v3211_v29 }
 0x165   : > { %3272 = vst.msk [vmem:[#allocation2 + $0x60] sm:$0xff] %vm3259_vm11, %v9357_v53 }
 0x166   : > { %v867_v32 = vpop.permute.xlu1 %866 }
 0x167   : > { %v3213_v31 = vpop.permute.xlu0 %3212  ;;  %906 = vst.msk [vmem:[#allocation2 + $0x78] sm:$0xff] %vm890_vm3, %v867_v32 }
 0x168   : > { %3254 = vst.msk [vmem:[#allocation2 + $0x68] sm:$0xff] %vm3240_vm10, %v3213_v31 }
 0x169   : > { %3273 = vst.msk [vmem:[#allocation2 + $0x68] sm:$0xff] %vm3259_vm11, %v9357_v53 }
 0x16a   : > { %v1193_v35 = vpop.permute.xlu1 %1192 }
 0x16b   : > { %v1191_v33 = vpop.permute.xlu0 %1190  ;;  %1232 = vst.msk [vmem:[#allocation2 + $0x78] sm:$0xff] %vm1216_vm4, %v1193_v35  ;;  %v9156_v35 = vld [vmem:[#allocation3] sm:$0xff]  }
 0x16c   : > { %1231 = vst.msk [vmem:[#allocation2 + $0x70] sm:$0xff] %vm1216_vm4, %v1191_v33  ;;  %v3290_v34 = vld [vmem:[#allocation2 + $0x60] sm:$0xff] }
 0x16d   : > { %8698 = vmatprep.mubr.bf16.mxu0 %v3290_v34 }
 0x16e   : > { %v1393_v40 = vpop.permute.xlu1 %1392 }
 0x16f   : > { %v1391_v36 = vpop.permute.xlu0 %1390  ;;  %1432 = vst.msk [vmem:[#allocation2 + $0x78] sm:$0xff] %vm1416_vm5, %v1393_v40 }
 0x170   : > { %1431 = vst.msk [vmem:[#allocation2 + $0x70] sm:$0xff] %vm1416_vm5, %v1391_v36  ;;  %v3291_v39 = vld [vmem:[#allocation2 + $0x68] sm:$0xff] }
 0x171   : > { %8699 = vmatmul.mubr.bf16.gmra.mrb[24].mxu0 %v3291_v39 }
 0x172   : > { %v1880_v43 = vpop.permute.xlu1 %1879 }
 0x173   : > { %v1878_v41 = vpop.permute.xlu0 %1877  ;;  %1919 = vst.msk [vmem:[#allocation2 + $0x78] sm:$0xff] %vm1903_vm6, %v1880_v43 }
 0x174   : > { %1918 = vst.msk [vmem:[#allocation2 + $0x70] sm:$0xff] %vm1903_vm6, %v1878_v41 }
 0x176   : > { %v2205_v46 = vpop.permute.xlu1 %2204 }
 0x177   : > { %v2203_v45 = vpop.permute.xlu0 %2202  ;;  %2244 = vst.msk [vmem:[#allocation2 + $0x78] sm:$0xff] %vm11206_vm13, %v2205_v46  ;;  %vm5288_vm13 = vcmask 195712  }
 0x178   : > { %2243 = vst.msk [vmem:[#allocation2 + $0x70] sm:$0xff] %vm11205_vm12, %v2203_v45 }
 0x17a   : > { %v2405_v49 = vpop.permute.xlu1 %2404 }
 0x17b   : > { %v2403_v48 = vpop.permute.xlu0 %2402  ;;  %2444 = vst.msk [vmem:[#allocation2 + $0x78] sm:$0xff] %vm2428_vm8, %v2405_v49 }
 0x17c   : > { %2443 = vst.msk [vmem:[#allocation2 + $0x70] sm:$0xff] %vm2428_vm8, %v2403_v48 }
 0x17e   : > { %v2892_v55 = vpop.permute.xlu1 %2891 }
 0x17f   : > { %v2890_v52 = vpop.permute.xlu0 %2889  ;;  %2931 = vst.msk [vmem:[#allocation2 + $0x78] sm:$0xff] %vm2915_vm9, %v2892_v55 }
 0x180   : > { %2930 = vst.msk [vmem:[#allocation2 + $0x70] sm:$0xff] %vm2915_vm9, %v2890_v52 }
 0x182   : > { %v869_v2 = vpop.permute.xlu1 %868 }
 0x183   : > { %v3215_v59 = vpop.permute.xlu0 %3214  ;;  %907 = vst.msk [vmem:[#allocation2 + $0x80] sm:$0xff] %vm890_vm3, %v869_v2 }
 0x184   : > { %v8676_v54 = vpop.f32.mrb[0].mxu0  ;;  %3255 = vst.msk [vmem:[#allocation2 + $0x70] sm:$0xff] %vm3240_vm10, %v3215_v59 }
 0x185   : > { %v3410_v56 = vadd.f32 %v8676_v54, %v10203_v50  ;;  %v3401_v57 = vpop.f32.mrb[1].mxu0  ;;  %3274 = vst.msk [vmem:[#allocation2 + $0x70] sm:$0xff] %vm3259_vm11, %v9357_v53 }
 0x186   : > { %v8677_v58 = vpop.f32.mrb[2].mxu0  ;;  %v871_v12 = vpop.permute.xlu1 %870 }
 0x187   : > { %v3546_v61 = vmax.f32 %v3410_v56, 0.0  ;;  %v3413_v62 = vadd.f32 %v8677_v58, %v10203_v50  ;;  %v3404_v63 = vpop.f32.mrb[3].mxu0  ;;  %v3217_v3 = vpop.permute.xlu0 %3216  ;;  %908 = vst.msk [vmem:[#allocation2 + $0x88] sm:$0xff] %vm890_vm3, %v871_v12  ;;  %vm11207_vm3 = vcmask 60416  }
 0x188   : > { %3256 = vst.msk [vmem:[#allocation2 + $0x78] sm:$0xff] %vm3240_vm10, %v3217_v3 }
 0x189   : > { %v8544_v0 = vpack.c.bf16 %v3546_v61, %v3546_v61  ;;  %v3547_v1 = vmax.f32 %v3413_v62, 0.0  ;;  %3275 = vst.msk [vmem:[#allocation2 + $0x78] sm:$0xff] %vm3259_vm11, %v9357_v53 }
 0x18a   : > { %v1197_v23 = vpop.permute.xlu1 %1196 }
 0x18b   : > { %v3855_v4 = vshrl.u32 %v8544_v0, 16  ;;  %v3858_v6 = vshll.u32 %v8544_v0, 16  ;;  %v8545_v7 = vpack.c.bf16 %v3547_v1, %v3547_v1  ;;  %v1195_v5 = vpop.permute.xlu0 %1194  ;;  %1234 = vst.msk [vmem:[#allocation2 + $0x88] sm:$0xff] %vm1216_vm4, %v1197_v23 }
 0x18c   : > { %1233 = vst.msk [vmem:[#allocation2 + $0x80] sm:$0xff] %vm1216_vm4, %v1195_v5  ;;  %v3292_v17 = vld [vmem:[#allocation2 + $0x70] sm:$0xff]  ;;  %vm11208_vm4 = vmmov %vm11205_vm12  ;;  %vm4999_vm12 = vcmask 130112  }
 0x18d   : > { %v3857_v8 = vrot.slane %v3855_v4, 7  ;;  %v3863_v9 = vshrl.u32 %v8545_v7, 16  ;;  %v3866_v10 = vshll.u32 %v8545_v7, 16  ;;  %8702 = vmatprep.mubr.bf16.mxu0 %v3292_v17  ;;  %vm11209_vm14 = vmmov %vm11208_vm4 }
 0x18e   : > { %v1397_v26 = vpop.permute.xlu1 %1396 }
 0x18f   : > { %v3860_v13 = vor.u32 %v3858_v6, %v3857_v8  ;;  %v3861_v14 = vrot.slane %v3857_v8, 4  ;;  %v3865_v15 = vrot.slane %v3863_v9, 7  ;;  %v1395_v24 = vpop.permute.xlu0 %1394  ;;  %1434 = vst.msk [vmem:[#allocation2 + $0x88] sm:$0xff] %vm1416_vm5, %v1397_v26  ;;  %v4217_v26 = vld [vmem:[#allocation3 + $0x18] sm:$0xf] }
 0x190   : > { %1433 = vst.msk [vmem:[#allocation2 + $0x80] sm:$0xff] %vm1416_vm5, %v1395_v24  ;;  %v3293_v25 = vld [vmem:[#allocation2 + $0x78] sm:$0xff]  ;;  %vm4566_vm5 = vcmask 64512  }
 0x191   : > { %v4211_v18 = vsel %vm10112_vm0, %v3860_v13, %v4210_v11  ;;  %v3868_v19 = vor.u32 %v3866_v10, %v3865_v15  ;;  %v3870_v20 = vrot.slane %v3865_v15, 4  ;;  %8703 = vmatmul.mubr.bf16.gmra.mrb[28].mxu0 %v3293_v25  ;;  %4567 = vst.msk [vmem:[#allocation4] sm:$0xff] %vm4566_vm5, %v9156_v35 }
 0x192   : > { %4212 = vst [vmem:[#allocation3 + $0xc] sm:$0xf] %v4211_v18  ;;  %v1884_v31 = vpop.permute.xlu1 %1883 }
 0x193   : > { %v3869_v21 = vsel %vm10131_vm2, %v3861_v14, %v3868_v19  ;;  %v4215_v22 = vsel %vm10121_vm7, %v3870_v20, %v4214_v16  ;;  %v1882_v27 = vpop.permute.xlu0 %1881  ;;  %1921 = vst.msk [vmem:[#allocation2 + $0x88] sm:$0xff] %vm1903_vm6, %v1884_v31  ;;  %v4224_v20 = vld [vmem:[#allocation3 + $0x24] sm:$0xf] }
 0x194   : > { %4213 = vst.msk [vmem:[#allocation3 + $0x10] sm:$0xf] %vm11207_vm3, %v3869_v21  ;;  %4216 = vst [vmem:[#allocation3 + $0x14] sm:$0x1] %v4215_v22 }
 0x195   : > { %1920 = vst.msk [vmem:[#allocation2 + $0x80] sm:$0xff] %vm1903_vm6, %v1882_v27  ;;  %vm11210_vm6 = vmmov %vm11204_vm15 }
 0x196   : > { %v2209_v36 = vpop.permute.xlu1 %2208 }
 0x197   : > { %v2207_v32 = vpop.permute.xlu0 %2206  ;;  %2246 = vst.msk [vmem:[#allocation2 + $0x88] sm:$0xff] %vm11209_vm14, %v2209_v36 }
 0x198   : > { %2245 = vst.msk [vmem:[#allocation2 + $0x80] sm:$0xff] %vm11208_vm4, %v2207_v32 }
 0x199   : > { %v4332_v28 = vld [vmem:[#allocation3 + $0xc] sm:$0x1] }
 0x19a   : > { %v4333_v29 = vsel %vm10121_vm7, 0, %v4332_v28  ;;  %v2409_v54 = vpop.permute.xlu1 %2408 }
 0x19b   : > { %4334 = vst [vmem:[#allocation3 + $0xc] sm:$0x1] %v4333_v29  ;;  %v4387_v30 = vld [vmem:[#allocation3 + $0x14] sm:$0x1]  ;;  %v9080_v34 = vld [vmem:[#allocation3 + $0xc] sm:$0xfe]   ;;  %v2407_v39 = vpop.permute.xlu0 %2406 }
 0x19c   : > { %v4388_v33 = vsel %vm10155_vm1, 0, %v4387_v30  ;;  %v9082_v40 = vld [vmem:[#allocation3 + $0xc] sm:$0xfe]   ;;  %2445 = vst.msk [vmem:[#allocation2 + $0x80] sm:$0xff] %vm2428_vm8, %v2407_v39  ;;  %v6092_v46 = vrot.slane %v9080_v34, 1  ;;  %2446 = vst.msk [vmem:[#allocation2 + $0x88] sm:$0xff] %vm2428_vm8, %v2409_v54 }
 0x19d   : > { %4389 = vst [vmem:[#allocation3 + $0x14] sm:$0x1] %v4388_v33  ;;  %v5195_v58 = vrot.slane %v9082_v40, 1  ;;  %vm11211_vm8 = vmmov %vm11210_vm6  ;;  %v4228_v34 = vld [vmem:[#allocation3 + $0x2c] sm:$0x1] }
 0x19e   : > { %v2896_v10 = vpop.permute.xlu1 %2895 }
 0x19f   : > { %v2894_v3 = vpop.permute.xlu0 %2893  ;;  %2933 = vst.msk [vmem:[#allocation2 + $0x88] sm:$0xff] %vm2915_vm9, %v2896_v10 }
 0x1a0   : > { %2932 = vst.msk [vmem:[#allocation2 + $0x80] sm:$0xff] %vm2915_vm9, %v2894_v3  ;;  %vm11212_vm9 = vmmov %vm11207_vm3 }
 0x1a2   : > { %v9079_v52 = vld [vmem:[#allocation3 + $0xc] sm:$0xff]   ;;  %v3221_v30 = vpop.permute.xlu1 %3220 }
 0x1a3   : > { %v10241_v59 = vld [vmem:[#allocation3 + $0xc] sm:$0xff]   ;;  %5418 = vrot.lane.b32.xlu0 %v9079_v52, %s9354_s6  ;;  %v3219_v24 = vpop.permute.xlu0 %3218  ;;  %3258 = vst.msk [vmem:[#allocation2 + $0x88] sm:$0xff] %vm3240_vm10, %v3221_v30  ;;  %v4221_v52 = vld [vmem:[#allocation3 + $0x20] sm:$0x1] }
 0x1a4   : > { %v8680_v41 = vpop.f32.mrb[4].mxu0  ;;  %v9081_v63 = vld [vmem:[#allocation3 + $0x14] ss:$0 sps:$4 sm:$0x11]   ;;  %v5660_v8 = vshrl.u32 %v10241_v59, 16  ;;  %v9173_v9 = vld [vmem:[#allocation3 + $0xc] sm:$0xff]  }
 0x1a5   : > { %v3426_v43 = vadd.f32 %v8680_v41, %v10203_v50  ;;  %v3417_v45 = vpop.f32.mrb[5].mxu0  ;;  %v9083_v2 = vld [vmem:[#allocation3 + $0x14] ss:$0 sps:$4 sm:$0x11]   ;;  %v6093_v7 = vrot.slane %v9081_v63, 1  ;;  %4568 = vst.msk [vmem:[#allocation4 + $0x8] sm:$0xff] %vm4566_vm5, %v9173_v9 }
 0x1a6   : > { %v3418_v48 = vadd.f32 %v10203_v50, %v3417_v45  ;;  %v8681_v49 = vpop.f32.mrb[6].mxu0  ;;  %v5196_v14 = vrot.slane %v9083_v2, 1  ;;  %v9085_v5 = vld [vmem:[#allocation3 + $0x14] ss:$0 sps:$4 sm:$0x11]   ;;  %v5662_v29 = vshll.u32 %v10241_v59, 16 }
 0x1a7   : > { %v3550_v55 = vmax.f32 %v3426_v43, 0.0  ;;  %v3429_v56 = vadd.f32 %v8681_v49, %v10203_v50  ;;  %v3420_v57 = vpop.f32.mrb[7].mxu0  ;;  %v6094_v18 = vsel %vm11210_vm6, %v6092_v46, %v6093_v7  ;;  %3257 = vst.msk [vmem:[#allocation2 + $0x80] sm:$0xff] %vm3240_vm10, %v3219_v24  ;;  %v5667_v35 = vshll.u32 %v9085_v5, 16  ;;  %v9086_v36 = vld [vmem:[#allocation3 + $0xc] sm:$0xff]  }
 0x1a8   : > { %v3548_v61 = vmax.f32 %v3418_v48, 0.0  ;;  %v3421_v62 = vadd.f32 %v10203_v50, %v3420_v57  ;;  %6140 = vrot.lane.b32.xlu0 %v6094_v18, %s9359_s27  ;;  %v5197_v23 = vsel %vm11211_vm8, %v5195_v58, %v5196_v14  ;;  %3276 = vst.msk [vmem:[#allocation2 + $0x80] sm:$0xff] %vm3259_vm11, %v9357_v53  ;;  %v5664_v43 = vrot.slane %v5662_v29, 1  ;;  %v9087_v45 = vld [vmem:[#allocation3 + $0x14] ss:$0 sps:$4 sm:$0x11]  }
 0x1a9   : > { %v8548_v0 = vpack.c.bf16 %v3550_v55, %v3550_v55  ;;  %v3551_v1 = vmax.f32 %v3429_v56, 0.0  ;;  %5242 = vrot.lane.b32.xlu1 %v5197_v23, %s9353_s30  ;;  %3277 = vst.msk [vmem:[#allocation2 + $0x88] sm:$0xff] %vm3259_vm11, %v9357_v53  ;;  %v5669_v54 = vrot.slane %v5667_v35, 1  ;;  %v4774_v63 = vshll.u32 %v9086_v36, 16  ;;  %vm11214_vm11 = vmmov %vm11207_vm3 }
 0x1aa   : > { %v8546_v4 = vpack.c.bf16 %v3548_v61, %v3548_v61  ;;  %v3549_v6 = vmax.f32 %v3421_v62, 0.0  ;;  %v5665_v58 = vor.u32 %v5664_v43, %v5660_v8  ;;  %v4772_v62 = vshrl.u32 %v9086_v36, 16  ;;  %vm11216_vm3 = vmmov %vm11210_vm6 }
 0x1ab   : > { %v3889_v11 = vshrl.u32 %v8548_v0, 16  ;;  %v3892_v12 = vshll.u32 %v8548_v0, 16  ;;  %v8549_v13 = vpack.c.bf16 %v3551_v1, %v3551_v1  ;;  %vm11213_vm10 = vsmask.f32 7424  ;;  %vm11217_vm4 = vmmov %vm11216_vm3 }
 0x1ac   : > { %v3872_v15 = vshrl.u32 %v8546_v4, 16  ;;  %v3875_v16 = vshll.u32 %v8546_v4, 16  ;;  %v8547_v17 = vpack.c.bf16 %v3549_v6, %v3549_v6  ;;  %v5670_v2 = vsel %vm11213_vm10, %v5665_v58, %v5669_v54  ;;  %vm11215_vm15 = vmmov %vm11213_vm10 }
 0x1ad   : > { %v3891_v19 = vrot.slane %v3889_v11, 7  ;;  %v3897_v21 = vshrl.u32 %v8549_v13, 16  ;;  %v3900_v22 = vshll.u32 %v8549_v13, 16  ;;  %v4779_v3 = vshll.u32 %v9087_v45, 16  ;;  %5851 = vrot.lane.b32.xlu0 %v5670_v2, %s9356_s8  ;;  %vm11218_vm14 = vmmov %vm11216_vm3 }
 0x1ae   : > { %v3874_v25 = vrot.slane %v3872_v15, 7  ;;  %v3880_v27 = vshrl.u32 %v8547_v17, 16  ;;  %v3883_v28 = vshll.u32 %v8547_v17, 16  ;;  %v4776_v4 = vrot.slane %v4774_v63, 1  ;;  %vm11219_vm6 = vmmov %vm11216_vm3 }
 0x1af   : > { %v3894_v31 = vor.u32 %v3892_v12, %v3891_v19  ;;  %v3895_v32 = vrot.slane %v3891_v19, 4  ;;  %v3899_v33 = vrot.slane %v3897_v21, 7  ;;  %v4781_v6 = vrot.slane %v4779_v3, 1  ;;  %v3294_v7 = vld [vmem:[#allocation2 + $0x80] sm:$0xff]  ;;  %v4238_v3 = vld [vmem:[#allocation3 + $0x3c] sm:$0xf]  ;;  %vm11220_vm8 = vmmov %vm11216_vm3 }
 0x1b0   : > { %v3877_v39 = vor.u32 %v3875_v16, %v3874_v25  ;;  %v3878_v40 = vrot.slane %v3874_v25, 4  ;;  %v3882_v41 = vrot.slane %v3880_v27, 7  ;;  %v4777_v8 = vor.u32 %v4776_v4, %v4772_v62  ;;  %8706 = vmatprep.mubr.bf16.mxu0 %v3294_v7  ;;  %v3295_v9 = vld [vmem:[#allocation2 + $0x88] sm:$0xff]  ;;  %vm11221_vm10 = vmmov %vm11212_vm9 }
 0x1b1   : > { %v4225_v46 = vsel %vm10112_vm0, %v3894_v31, %v4224_v20  ;;  %v3902_v48 = vor.u32 %v3900_v22, %v3899_v33  ;;  %v3904_v49 = vrot.slane %v3899_v33, 4  ;;  %8707 = vmatmul.mubr.bf16.gmra.mrb[32].mxu0 %v3295_v9 }
 0x1b2   : > { %4226 = vst [vmem:[#allocation3 + $0x24] sm:$0xf] %v4225_v46  ;;  %v4218_v55 = vsel %vm10112_vm0, %v3877_v39, %v4217_v26  ;;  %v3885_v56 = vor.u32 %v3883_v28, %v3882_v41  ;;  %v3887_v57 = vrot.slane %v3882_v41, 4  ;;  %v4782_v11 = vsel %vm11215_vm15, %v4777_v8, %v4781_v6 }
 0x1b3   : > { %4219 = vst [vmem:[#allocation3 + $0x18] sm:$0xf] %v4218_v55  ;;  %v3903_v59 = vsel %vm10131_vm2, %v3895_v32, %v3902_v48  ;;  %v4229_v61 = vsel %vm10121_vm7, %v3904_v49, %v4228_v34  ;;  %4953 = vrot.lane.b32.xlu1 %v4782_v11, %s9351_s28 }
 0x1b4   : > { %4227 = vst.msk [vmem:[#allocation3 + $0x28] sm:$0xf] %vm11212_vm9, %v3903_v59  ;;  %4230 = vst [vmem:[#allocation3 + $0x2c] sm:$0x1] %v4229_v61  ;;  %v3886_v0 = vsel %vm10131_vm2, %v3878_v40, %v3885_v56  ;;  %v4222_v1 = vsel %vm10121_vm7, %v3887_v57, %v4221_v52 }
 0x1b5   : > { %4220 = vst.msk [vmem:[#allocation3 + $0x1c] sm:$0xf] %vm11214_vm11, %v3886_v0  ;;  %4223 = vst [vmem:[#allocation3 + $0x20] sm:$0x1] %v4222_v1 }
 0x1b6   : > { %vm11222_vm11 = vmmov %vm11215_vm15 }
 0x1b7   : > { %vm11223_vm15 = vmmov %vm11216_vm3 }
 0x1b9   : > { %v4338_v10 = vld [vmem:[#allocation3 + $0x24] sm:$0x1] }
 0x1ba   : > { %v4339_v12 = vsel %vm10121_vm7, 0, %v4338_v10  ;;  %v4335_v13 = vld [vmem:[#allocation3 + $0x18] sm:$0x1]  ;;  %v4231_v10 = vld [vmem:[#allocation3 + $0x30] sm:$0xf] }
 0x1bb   : > { %4340 = vst [vmem:[#allocation3 + $0x24] sm:$0x1] %v4339_v12  ;;  %v4336_v14 = vsel %vm10121_vm7, 0, %v4335_v13  ;;  %v4393_v5 = vld [vmem:[#allocation3 + $0x2c] sm:$0x1] }
 0x1bc   : > { %4337 = vst [vmem:[#allocation3 + $0x18] sm:$0x1] %v4336_v14  ;;  %v4394_v15 = vsel %vm10155_vm1, 0, %v4393_v5  ;;  %v4390_v16 = vld [vmem:[#allocation3 + $0x20] sm:$0x1] }
 0x1bd   : > { %4395 = vst [vmem:[#allocation3 + $0x2c] sm:$0x1] %v4394_v15  ;;  %v4391_v17 = vsel %vm10155_vm1, 0, %v4390_v16  ;;  %v9092_v18 = vld [vmem:[#allocation3 + $0x24] sm:$0xfe]  }
 0x1be   : > { %4392 = vst [vmem:[#allocation3 + $0x20] sm:$0x1] %v4391_v17  ;;  %v9094_v19 = vld [vmem:[#allocation3 + $0x24] sm:$0xfe]   ;;  %v6995_v22 = vrot.slane %v9092_v18, 1 }
 0x1bf   : > { %v5201_v23 = vrot.slane %v9094_v19, 1  ;;  %v9096_v24 = vld [vmem:[#allocation3 + $0x24] sm:$0xfe]   ;;  %v9098_v27 = vld [vmem:[#allocation3 + $0x18] sm:$0xfe]  }
 0x1c0   : > { %v6098_v52 = vrot.slane %v9096_v24, 1  ;;  %v6095_v59 = vrot.slane %v9098_v27, 1  ;;  %v9100_v61 = vld [vmem:[#allocation3 + $0x18] sm:$0xfe]   ;;  %v4242_v15 = vld [vmem:[#allocation3 + $0x44] sm:$0x1] }
 0x1c2   : > { %v9088_v20 = vld [vmem:[#allocation3 + $0x24] sm:$0xff]   ;;  %v4952_v19 = vpop.permute.xlu0 %4951 }
 0x1c3   : > { %v9089_v21 = vld [vmem:[#allocation3 + $0x24] sm:$0xff]   ;;  %6320 = vrot.lane.b32.xlu1 %v9088_v20, %s9360_s29  ;;  %v9091_v26 = vld [vmem:[#allocation3 + $0x18] sm:$0xff]   ;;  %5000 = vst.msk [vmem:[#allocation4] sm:$0xff] %vm4999_vm12, %v4952_v19 }
 0x1c4   : > { %v8684_v25 = vpop.f32.mrb[8].mxu0  ;;  %5422 = vrot.lane.b32.xlu0 %v9089_v21, %s9354_s6  ;;  %v9090_v30 = vld [vmem:[#allocation3 + $0x18] sm:$0xff]   ;;  %v9093_v31 = vld [vmem:[#allocation3 + $0x2c] ss:$0 sps:$4 sm:$0x11]   ;;  %v9102_v14 = vld [vmem:[#allocation3 + $0x24] sm:$0xff]  }
 0x1c5   : > { %v3442_v28 = vadd.f32 %v8684_v25, %v10203_v50  ;;  %v3433_v29 = vpop.f32.mrb[9].mxu0  ;;  %v9095_v34 = vld [vmem:[#allocation3 + $0x2c] ss:$0 sps:$4 sm:$0x11]   ;;  %v6996_v40 = vrot.slane %v9093_v31, 1  ;;  %v10305_v31 = vld [vmem:[#allocation3 + $0x24] sm:$0xff]  }
 0x1c6   : > { %v3434_v32 = vadd.f32 %v10203_v50, %v3433_v29  ;;  %v8685_v33 = vpop.f32.mrb[10].mxu0  ;;  %v9097_v41 = vld [vmem:[#allocation3 + $0x2c] ss:$0 sps:$4 sm:$0x11]   ;;  %v5202_v46 = vrot.slane %v9095_v34, 1 }
 0x1c7   : > { %v3554_v35 = vmax.f32 %v3442_v28, 0.0  ;;  %v3445_v36 = vadd.f32 %v8685_v33, %v10203_v50  ;;  %v3436_v39 = vpop.f32.mrb[11].mxu0  ;;  %5420 = vrot.lane.b32.xlu1 %v9091_v26, %s9354_s6  ;;  %v6099_v54 = vrot.slane %v9097_v41, 1  ;;  %v9099_v55 = vld [vmem:[#allocation3 + $0x20] ss:$0 sps:$4 sm:$0x11]   ;;  %v6997_v58 = vsel %vm11216_vm3, %v6995_v22, %v6996_v40  ;;  %vm11224_vm3 = vmmov %vm11222_vm11 }
 0x1c8   : > { %v3552_v43 = vmax.f32 %v3434_v32, 0.0  ;;  %v3437_v45 = vadd.f32 %v10203_v50, %v3436_v39  ;;  %6318 = vrot.lane.b32.xlu0 %v9090_v30, %s9360_s29  ;;  %v5203_v1 = vsel %vm11217_vm4, %v5201_v23, %v5202_v46  ;;  %v9101_v2 = vld [vmem:[#allocation3 + $0x20] ss:$0 sps:$4 sm:$0x11]   ;;  %v6096_v8 = vrot.slane %v9099_v55, 1  ;;  %v10301_v26 = vld [vmem:[#allocation3 + $0x24] sm:$0xff]   ;;  %v5241_v46 = vpop.permute.xlu0 %5240  ;;  %vm11225_vm4 = vmmov %vm11224_vm3 }
 0x1c9   : > { %v8552_v48 = vpack.c.bf16 %v3554_v35, %v3554_v35  ;;  %v3555_v49 = vmax.f32 %v3445_v36, 0.0  ;;  %v6100_v13 = vsel %vm11218_vm14, %v6098_v52, %v6099_v54  ;;  %v4235_v23 = vld [vmem:[#allocation3 + $0x38] sm:$0x1]  ;;  %v6993_v24 = vrot.slane %v9101_v2, 1  ;;  %5289 = vst.msk [vmem:[#allocation4] sm:$0xff] %vm5288_vm13, %v5241_v46  ;;  %vm11226_vm14 = vmmov %vm11224_vm3 }
 0x1ca   : > { %v8550_v56 = vpack.c.bf16 %v3552_v43, %v3552_v43  ;;  %v3553_v57 = vmax.f32 %v3437_v45, 0.0  ;;  %v6097_v18 = vsel %vm11219_vm6, %v6095_v59, %v6096_v8  ;;  %v9103_v25 = vld [vmem:[#allocation3 + $0x2c] ss:$0 sps:$4 sm:$0x11]   ;;  %v6992_v30 = vrot.slane %v9100_v61, 1  ;;  %v10310_v36 = vld [vmem:[#allocation3 + $0x18] sm:$0xff]   ;;  %vm11227_vm6 = vmmov %vm11224_vm3 }
 0x1cb   : > { %v3923_v62 = vshrl.u32 %v8552_v48, 16  ;;  %v3926_v63 = vshll.u32 %v8552_v48, 16  ;;  %v8553_v0 = vpack.c.bf16 %v3555_v49, %v3555_v49  ;;  %5246 = vrot.lane.b32.xlu1 %v5203_v1, %s9353_s30  ;;  %v6572_v35 = vshrl.u32 %v9102_v14, 16  ;;  %v9104_v45 = vld [vmem:[#allocation3 + $0x18] sm:$0xfe]  }
 0x1cc   : > { %v3906_v4 = vshrl.u32 %v8550_v56, 16  ;;  %v3909_v6 = vshll.u32 %v8550_v56, 16  ;;  %v8551_v7 = vpack.c.bf16 %v3553_v57, %v3553_v57  ;;  %7042 = vrot.lane.b32.xlu0 %v6997_v58, %s9361_s7  ;;  %v6574_v43 = vshll.u32 %v9102_v14, 16  ;;  %v9105_v55 = vld [vmem:[#allocation3 + $0x20] ss:$0 sps:$4 sm:$0x11]  }
 0x1cd   : > { %v3925_v9 = vrot.slane %v3923_v62, 7  ;;  %v3931_v11 = vshrl.u32 %v8553_v0, 16  ;;  %v3934_v12 = vshll.u32 %v8553_v0, 16  ;;  %v6994_v52 = vsel %vm11220_vm8, %v6992_v30, %v6993_v24  ;;  %v10319_v56 = vld [vmem:[#allocation3 + $0x18] sm:$0xff]   ;;  %vm11228_vm8 = vmmov %vm11224_vm3 }
 0x1ce   : > { %v3908_v5 = vrot.slane %v3906_v4, 7  ;;  %v3914_v16 = vshrl.u32 %v8551_v7, 16  ;;  %v3917_v17 = vshll.u32 %v8551_v7, 16  ;;  %v6579_v54 = vshll.u32 %v9103_v25, 16 }
 0x1cf   : > { %v3928_v20 = vor.u32 %v3926_v63, %v3925_v9  ;;  %v3929_v21 = vrot.slane %v3925_v9, 4  ;;  %v3933_v22 = vrot.slane %v3931_v11, 7  ;;  %6142 = vrot.lane.b32.xlu1 %v6097_v18, %s9359_s27  ;;  %v6576_v59 = vrot.slane %v6574_v43, 1  ;;  %v9107_v0 = vld [vmem:[#allocation3 + $0x2c] ss:$0 sps:$4 sm:$0x11]  }
 0x1d0   : > { %v3911_v27 = vor.u32 %v3909_v6, %v3908_v5  ;;  %v3912_v28 = vrot.slane %v3908_v5, 4  ;;  %v3916_v29 = vrot.slane %v3914_v16, 7  ;;  %6144 = vrot.lane.b32.xlu0 %v6100_v13, %s9359_s27  ;;  %v5198_v61 = vrot.slane %v9104_v45, 1  ;;  %v9109_v7 = vld [vmem:[#allocation3 + $0x2c] ss:$0 sps:$4 sm:$0x11]  }
 0x1d1   : > { %v4239_v32 = vsel %vm10112_vm0, %v3928_v20, %v4238_v3  ;;  %v3936_v33 = vor.u32 %v3934_v12, %v3933_v22  ;;  %v3938_v34 = vrot.slane %v3933_v22, 4  ;;  %v6581_v62 = vrot.slane %v6579_v54, 1  ;;  %v9114_v18 = vld [vmem:[#allocation3 + $0x18] sm:$0xff]   ;;  %v9111_v30 = vld [vmem:[#allocation3 + $0x20] ss:$0 sps:$4 sm:$0x11]  }
 0x1d2   : > { %4240 = vst [vmem:[#allocation3 + $0x3c] sm:$0xf] %v4239_v32  ;;  %v4232_v39 = vsel %vm10112_vm0, %v3911_v27, %v4231_v10  ;;  %v3919_v40 = vor.u32 %v3917_v17, %v3916_v29  ;;  %v3921_v41 = vrot.slane %v3916_v29, 4  ;;  %v5199_v63 = vrot.slane %v9105_v55, 1 }
 0x1d3   : > { %4233 = vst [vmem:[#allocation3 + $0x30] sm:$0xf] %v4232_v39  ;;  %v3937_v48 = vsel %vm10131_vm2, %v3929_v21, %v3936_v33  ;;  %v4243_v49 = vsel %vm10121_vm7, %v3938_v34, %v4242_v15  ;;  %v4796_v1 = vshrl.u32 %v10301_v26, 16  ;;  %v6577_v2 = vor.u32 %v6576_v59, %v6572_v35  ;;  %v9115_v45 = vld [vmem:[#allocation3 + $0x20] ss:$0 sps:$4 sm:$0x11]  }
 0x1d4   : > { %4241 = vst.msk [vmem:[#allocation3 + $0x40] sm:$0xf] %vm11212_vm9, %v3937_v48  ;;  %4244 = vst [vmem:[#allocation3 + $0x44] sm:$0x1] %v4243_v49  ;;  %v3920_v57 = vsel %vm10131_vm2, %v3912_v28, %v3919_v40  ;;  %v4236_v58 = vsel %vm10121_vm7, %v3921_v41, %v4235_v23  ;;  %7040 = vrot.lane.b32.xlu0 %v6994_v52, %s9361_s7  ;;  %v4798_v3 = vshll.u32 %v10301_v26, 16  ;;  %v5684_v4 = vshrl.u32 %v10305_v31, 16 }
 0x1d5   : > { %4234 = vst.msk [vmem:[#allocation3 + $0x34] sm:$0xf] %vm11221_vm10, %v3920_v57  ;;  %4237 = vst [vmem:[#allocation3 + $0x38] sm:$0x1] %v4236_v58  ;;  %v4803_v6 = vshll.u32 %v9107_v0, 16  ;;  %v5686_v8 = vshll.u32 %v10305_v31, 16  ;;  %v6582_v10 = vsel %vm11222_vm11, %v6577_v2, %v6581_v62  ;;  %v5200_v11 = vsel %vm11223_vm15, %v5198_v61, %v5199_v63 }
 0x1d6   : > { %v5672_v9 = vshrl.u32 %v10310_v36, 16  ;;  %v4800_v12 = vrot.slane %v4798_v3, 1  ;;  %v5674_v13 = vshll.u32 %v10310_v36, 16  ;;  %6753 = vrot.lane.b32.xlu1 %v6582_v10, %s9362_s13  ;;  %v5691_v16 = vshll.u32 %v9109_v7, 16  ;;  %vm11229_vm9 = vmmov %vm11223_vm15 }
 0x1d7   : > { %v4805_v5 = vrot.slane %v4803_v6, 1  ;;  %v5688_v15 = vrot.slane %v5686_v8, 1  ;;  %v6560_v17 = vshrl.u32 %v10319_v56, 16  ;;  %v6562_v33 = vshll.u32 %v10319_v56, 16  ;;  %vm11230_vm10 = vmmov %vm11229_vm9 }
 0x1d8   : > { %5244 = vrot.lane.b32.xlu0 %v5200_v11, %s9353_s30  ;;  %v4801_v21 = vor.u32 %v4800_v12, %v4796_v1  ;;  %v5676_v22 = vrot.slane %v5674_v13, 1  ;;  %v5693_v26 = vrot.slane %v5691_v16, 1  ;;  %v5679_v35 = vshll.u32 %v9111_v30, 16  ;;  %v9113_v36 = vld [vmem:[#allocation3 + $0x20] ss:$0 sps:$4 sm:$0x11]   ;;  %vm11231_vm11 = vmmov %vm11229_vm9 }
 0x1d9   : > { %v4344_v14 = vld [vmem:[#allocation3 + $0x3c] sm:$0x1]  ;;  %v5689_v25 = vor.u32 %v5688_v15, %v5684_v4  ;;  %v6564_v39 = vrot.slane %v6562_v33, 1  ;;  %v4784_v40 = vshrl.u32 %v9114_v18, 16  ;;  %v6567_v43 = vshll.u32 %v9113_v36, 16 }
 0x1da   : > { %v4345_v19 = vsel %vm10121_vm7, 0, %v4344_v14  ;;  %v4341_v20 = vld [vmem:[#allocation3 + $0x30] sm:$0x1]  ;;  %v4806_v29 = vsel %vm11224_vm3, %v4801_v21, %v4805_v5  ;;  %v5677_v34 = vor.u32 %v5676_v22, %v5672_v9  ;;  %v5681_v41 = vrot.slane %v5679_v35, 1  ;;  %v4245_v35 = vld [vmem:[#allocation3 + $0x48] sm:$0xf] }
 0x1db   : > { %4346 = vst [vmem:[#allocation3 + $0x3c] sm:$0x1] %v4345_v19  ;;  %v4342_v23 = vsel %vm10121_vm7, 0, %v4341_v20  ;;  %v4399_v24 = vld [vmem:[#allocation3 + $0x44] sm:$0x1]  ;;  %4957 = vrot.lane.b32.xlu1 %v4806_v29, %s9351_s28  ;;  %v5694_v32 = vsel %vm11225_vm4, %v5689_v25, %v5693_v26  ;;  %v4786_v46 = vshll.u32 %v9114_v18, 16  ;;  %v6565_v48 = vor.u32 %v6564_v39, %v6560_v17  ;;  %vm11234_vm4 = vmmov %vm11229_vm9 }
 0x1dc   : > { %4343 = vst [vmem:[#allocation3 + $0x30] sm:$0x1] %v4342_v23  ;;  %v4400_v27 = vsel %vm10155_vm1, 0, %v4399_v24  ;;  %v4396_v28 = vld [vmem:[#allocation3 + $0x38] sm:$0x1]  ;;  %5855 = vrot.lane.b32.xlu0 %v5694_v32, %s9356_s8  ;;  %v5682_v49 = vsel %vm11226_vm14, %v5677_v34, %v5681_v41  ;;  %v6569_v52 = vrot.slane %v6567_v43, 1  ;;  %vm11235_vm14 = vmmov %vm11234_vm4 }
 0x1dd   : > { %4401 = vst [vmem:[#allocation3 + $0x44] sm:$0x1] %v4400_v27  ;;  %v4397_v31 = vsel %vm10155_vm1, 0, %v4396_v28  ;;  %v4788_v54 = vrot.slane %v4786_v46, 1  ;;  %v4791_v55 = vshll.u32 %v9115_v45, 16  ;;  %vm11232_vm15 = vcmask 60416  }
 0x1de   : > { %4398 = vst [vmem:[#allocation3 + $0x38] sm:$0x1] %v4397_v31  ;;  %v6570_v56 = vsel %vm11227_vm6, %v6565_v48, %v6569_v52  ;;  %v9120_v2 = vld [vmem:[#allocation3 + $0x3c] sm:$0xfe]   ;;  %v4252_v28 = vld [vmem:[#allocation3 + $0x54] sm:$0xf]  ;;  %vm11233_vm3 = vmmov %vm11232_vm15 }
 0x1df   : > { %5853 = vrot.lane.b32.xlu1 %v5682_v49, %s9356_s8  ;;  %v4789_v57 = vor.u32 %v4788_v54, %v4784_v40  ;;  %v4793_v58 = vrot.slane %v4791_v55, 1  ;;  %v7001_v11 = vrot.slane %v9120_v2, 1  ;;  %v9122_v15 = vld [vmem:[#allocation3 + $0x3c] sm:$0xfe]   ;;  %v4256_v43 = vld [vmem:[#allocation3 + $0x5c] sm:$0x1] }
 0x1e0   : > { %6751 = vrot.lane.b32.xlu0 %v6570_v56, %s9362_s13  ;;  %v5207_v27 = vrot.slane %v9122_v15, 1  ;;  %v4249_v55 = vld [vmem:[#allocation3 + $0x50] sm:$0x1] }
 0x1e1   : > { %v4794_v63 = vsel %vm11228_vm8, %v4789_v57, %v4793_v58  ;;  %vm11236_vm8 = vmmov %vm11234_vm4 }
 0x1e2   : > { %v9116_v59 = vld [vmem:[#allocation3 + $0x3c] sm:$0xff]  }
 0x1e3   : > { %v9117_v62 = vld [vmem:[#allocation3 + $0x3c] sm:$0xff]   ;;  %4955 = vrot.lane.b32.xlu1 %v4794_v63, %s9351_s28  ;;  %v9118_v14 = vld [vmem:[#allocation3 + $0x30] sm:$0xff]  }
 0x1e4   : > { %v8688_v61 = vpop.f32.mrb[12].mxu0  ;;  %v10359_v3 = vld [vmem:[#allocation3 + $0x3c] sm:$0xff]   ;;  %v9121_v7 = vld [vmem:[#allocation3 + $0x44] ss:$0 sps:$4 sm:$0x11]   ;;  %5426 = vrot.lane.b32.xlu0 %v9116_v59, %s9354_s6  ;;  %v9119_v26 = vld [vmem:[#allocation3 + $0x30] sm:$0xff]  }
 0x1e5   : > { %v3458_v0 = vadd.f32 %v8688_v61, %v10203_v50  ;;  %v3449_v1 = vpop.f32.mrb[13].mxu0  ;;  %v7002_v5 = vrot.slane %v9121_v7, 1  ;;  %v9123_v18 = vld [vmem:[#allocation3 + $0x44] ss:$0 sps:$4 sm:$0x11]   ;;  %v6596_v22 = vshrl.u32 %v10359_v3, 16 }
 0x1e6   : > { %v3450_v4 = vadd.f32 %v10203_v50, %v3449_v1  ;;  %v8689_v6 = vpop.f32.mrb[14].mxu0  ;;  %v5208_v32 = vrot.slane %v9123_v18, 1  ;;  %v9125_v33 = vld [vmem:[#allocation3 + $0x44] ss:$0 sps:$4 sm:$0x11]   ;;  %v6598_v40 = vshll.u32 %v10359_v3, 16 }
 0x1e7   : > { %v3558_v8 = vmax.f32 %v3458_v0, 0.0  ;;  %v3461_v9 = vadd.f32 %v8689_v6, %v10203_v50  ;;  %v3452_v10 = vpop.f32.mrb[15].mxu0  ;;  %6324 = vrot.lane.b32.xlu1 %v9117_v62, %s9360_s29  ;;  %v7003_v21 = vsel %vm11229_vm9, %v7001_v11, %v7002_v5  ;;  %v6105_v56 = vrot.slane %v9125_v33, 1  ;;  %v9126_v61 = vld [vmem:[#allocation3 + $0x30] sm:$0xfe]   ;;  %v9136_v15 = vld [vmem:[#allocation3 + $0x3c] sm:$0xff]   ;;  %vm11237_vm9 = vmmov %vm11227_vm6 }
 0x1e8   : > { %v3556_v12 = vmax.f32 %v3450_v4, 0.0  ;;  %v3453_v13 = vadd.f32 %v10203_v50, %v3452_v10  ;;  %v9124_v50 = vld [vmem:[#allocation3 + $0x3c] sm:$0xfe]   ;;  %6322 = vrot.lane.b32.xlu0 %v9118_v14, %s9360_s29  ;;  %v5209_v1 = vsel %vm11230_vm10, %v5207_v27, %v5208_v32  ;;  %v9127_v2 = vld [vmem:[#allocation3 + $0x38] ss:$0 sps:$4 sm:$0x11]   ;;  %vm11238_vm10 = vmmov %vm11227_vm6 }
 0x1e9   : > { %v8556_v16 = vpack.c.bf16 %v3558_v8, %v3558_v8  ;;  %v3559_v17 = vmax.f32 %v3461_v9, 0.0  ;;  %v6104_v48 = vrot.slane %v9124_v50, 1  ;;  %v6101_v8 = vrot.slane %v9126_v61, 1  ;;  %v9128_v9 = vld [vmem:[#allocation3 + $0x30] sm:$0xfe]   ;;  %v9134_v10 = vld [vmem:[#allocation3 + $0x3c] sm:$0xff]  }
 0x1ea   : > { %v8554_v19 = vpack.c.bf16 %v3556_v12, %v3556_v12  ;;  %v3557_v20 = vmax.f32 %v3453_v13, 0.0  ;;  %v6102_v14 = vrot.slane %v9127_v2, 1  ;;  %v9129_v5 = vld [vmem:[#allocation3 + $0x38] ss:$0 sps:$4 sm:$0x11]   ;;  %v6998_v18 = vrot.slane %v9128_v9, 1 }
 0x1eb   : > { %v3957_v23 = vshrl.u32 %v8556_v16, 16  ;;  %v3960_v24 = vshll.u32 %v8556_v16, 16  ;;  %v8557_v25 = vpack.c.bf16 %v3559_v17, %v3559_v17  ;;  %5424 = vrot.lane.b32.xlu1 %v9119_v26, %s9354_s6  ;;  %v6106_v13 = vsel %vm11231_vm11, %v6104_v48, %v6105_v56  ;;  %v9133_v50 = vld [vmem:[#allocation3 + $0x38] ss:$0 sps:$4 sm:$0x11]   ;;  %vm11239_vm11 = vmmov %vm11227_vm6 }
 0x1ec   : > { %v3940_v29 = vshrl.u32 %v8554_v19, 16  ;;  %v3943_v30 = vshll.u32 %v8554_v19, 16  ;;  %v8555_v31 = vpack.c.bf16 %v3557_v20, %v3557_v20  ;;  %7046 = vrot.lane.b32.xlu0 %v7003_v21, %s9361_s7  ;;  %v6600_v19 = vrot.slane %v6598_v40, 1  ;;  %v9138_v40 = vld [vmem:[#allocation3 + $0x30] sm:$0xff]  }
 0x1ed   : > { %v3959_v34 = vrot.slane %v3957_v23, 7  ;;  %v3965_v36 = vshrl.u32 %v8557_v25, 16  ;;  %v3968_v39 = vshll.u32 %v8557_v25, 16  ;;  %v6103_v20 = vsel %vm11234_vm4, %v6101_v8, %v6102_v14  ;;  %v9131_v23 = vld [vmem:[#allocation3 + $0x44] ss:$0 sps:$4 sm:$0x11]  }
 0x1ee   : > { %v3942_v41 = vrot.slane %v3940_v29, 7  ;;  %v3948_v45 = vshrl.u32 %v8555_v31, 16  ;;  %v3951_v46 = vshll.u32 %v8555_v31, 16  ;;  %v6999_v21 = vrot.slane %v9129_v5, 1 }
 0x1ef   : > { %v3962_v49 = vor.u32 %v3960_v24, %v3959_v34  ;;  %v3963_v52 = vrot.slane %v3959_v34, 4  ;;  %v3967_v54 = vrot.slane %v3965_v36, 7  ;;  %5250 = vrot.lane.b32.xlu1 %v5209_v1, %s9353_s30  ;;  %v9132_v24 = vld [vmem:[#allocation3 + $0x30] sm:$0xfe]   ;;  %v6601_v26 = vor.u32 %v6600_v19, %v6596_v22 }
 0x1f0   : > { %v3945_v57 = vor.u32 %v3943_v30, %v3942_v41  ;;  %v3946_v58 = vrot.slane %v3942_v41, 4  ;;  %v3950_v59 = vrot.slane %v3948_v45, 7  ;;  %6148 = vrot.lane.b32.xlu0 %v6106_v13, %s9359_s27  ;;  %v7000_v25 = vsel %vm11235_vm14, %v6998_v18, %v6999_v21  ;;  %v9140_v1 = vld [vmem:[#allocation3 + $0x30] sm:$0xff]   ;;  %v9141_v8 = vld [vmem:[#allocation3 + $0x38] ss:$0 sps:$4 sm:$0x11]   ;;  %vm11242_vm14 = vmmov %vm11236_vm8 }
 0x1f1   : > { %v4253_v62 = vsel %vm10112_vm0, %v3962_v49, %v4252_v28  ;;  %v3970_v63 = vor.u32 %v3968_v39, %v3967_v54  ;;  %v3972_v0 = vrot.slane %v3967_v54, 4  ;;  %v6603_v27 = vshll.u32 %v9131_v23, 16  ;;  %v9135_v39 = vld [vmem:[#allocation3 + $0x44] ss:$0 sps:$4 sm:$0x11]  }
 0x1f2   : > { %4254 = vst [vmem:[#allocation3 + $0x54] sm:$0xf] %v4253_v62  ;;  %v4246_v4 = vsel %vm10112_vm0, %v3945_v57, %v4245_v35  ;;  %v3953_v6 = vor.u32 %v3951_v46, %v3950_v59  ;;  %v3955_v7 = vrot.slane %v3950_v59, 4  ;;  %v5204_v28 = vrot.slane %v9132_v24, 1 }
 0x1f3   : > { %4247 = vst [vmem:[#allocation3 + $0x48] sm:$0xf] %v4246_v4  ;;  %v3971_v11 = vsel %vm10131_vm2, %v3963_v52, %v3970_v63  ;;  %v4257_v12 = vsel %vm10121_vm7, %v3972_v0, %v4256_v43  ;;  %6146 = vrot.lane.b32.xlu1 %v6103_v20, %s9359_s27  ;;  %v4820_v29 = vshrl.u32 %v9134_v10, 16  ;;  %v6605_v31 = vrot.slane %v6603_v27, 1 }
 0x1f4   : > { %4255 = vst.msk [vmem:[#allocation3 + $0x58] sm:$0xf] %vm11232_vm15, %v3971_v11  ;;  %4258 = vst [vmem:[#allocation3 + $0x5c] sm:$0x1] %v4257_v12  ;;  %v3954_v16 = vsel %vm10131_vm2, %v3946_v58, %v3953_v6  ;;  %v4250_v17 = vsel %vm10121_vm7, %v3955_v7, %v4249_v55  ;;  %7044 = vrot.lane.b32.xlu0 %v7000_v25, %s9361_s7  ;;  %v5205_v32 = vrot.slane %v9133_v50, 1  ;;  %v4822_v33 = vshll.u32 %v9134_v10, 16 }
 0x1f5   : > { %4248 = vst.msk [vmem:[#allocation3 + $0x4c] sm:$0xf] %vm11233_vm3, %v3954_v16  ;;  %4251 = vst [vmem:[#allocation3 + $0x50] sm:$0x1] %v4250_v17  ;;  %v5708_v34 = vshrl.u32 %v9136_v15, 16  ;;  %v6606_v41 = vsel %vm11227_vm6, %v6601_v26, %v6605_v31  ;;  %v4827_v49 = vshll.u32 %v9135_v39, 16 }
 0x1f6   : > { %v5206_v43 = vsel %vm11236_vm8, %v5204_v28, %v5205_v32  ;;  %v4824_v45 = vrot.slane %v4822_v33, 1  ;;  %v9137_v55 = vld [vmem:[#allocation3 + $0x44] ss:$0 sps:$4 sm:$0x11]   ;;  %v5710_v57 = vshll.u32 %v9136_v15, 16  ;;  %v5696_v63 = vshrl.u32 %v9138_v40, 16  ;;  %vm11240_vm15 = vmmov %vm11227_vm6 }
 0x1f7   : > { %6757 = vrot.lane.b32.xlu1 %v6606_v41, %s9362_s13  ;;  %v4829_v56 = vrot.slane %v4827_v49, 1  ;;  %v5715_v58 = vshll.u32 %v9137_v55, 16  ;;  %v9139_v59 = vld [vmem:[#allocation3 + $0x38] ss:$0 sps:$4 sm:$0x11]   ;;  %v5698_v0 = vshll.u32 %v9138_v40, 16  ;;  %vm11241_vm3 = vmmov %vm11227_vm6 }
 0x1f8   : > { %5248 = vrot.lane.b32.xlu0 %v5206_v43, %s9353_s30  ;;  %v4825_v54 = vor.u32 %v4824_v45, %v4820_v29  ;;  %v5712_v62 = vrot.slane %v5710_v57, 1  ;;  %v5703_v4 = vshll.u32 %v9139_v59, 16  ;;  %v6584_v9 = vshrl.u32 %v9140_v1, 16  ;;  %v9142_v12 = vld [vmem:[#allocation3 + $0x30] sm:$0xff]  }
 0x1f9   : > { %v4350_v30 = vld [vmem:[#allocation3 + $0x54] sm:$0x1]  ;;  %v5717_v2 = vrot.slane %v5715_v58, 1  ;;  %v5700_v7 = vrot.slane %v5698_v0, 1  ;;  %v6586_v10 = vshll.u32 %v9140_v1, 16  ;;  %v6591_v15 = vshll.u32 %v9141_v8, 16 }
 0x1fa   : > { %v4351_v35 = vsel %vm10121_vm7, 0, %v4350_v30  ;;  %v4347_v36 = vld [vmem:[#allocation3 + $0x48] sm:$0x1]  ;;  %v4830_v61 = vsel %vm11237_vm9, %v4825_v54, %v4829_v56  ;;  %v5713_v6 = vor.u32 %v5712_v62, %v5708_v34  ;;  %v5705_v11 = vrot.slane %v5703_v4, 1  ;;  %v10418_v26 = vld [vmem:[%s11185_s2] ss:$0 sm:$0xff]  ;;  %vm11245_vm9 = vmmov %vm11242_vm14 }
 0x1fb   : > { %4352 = vst [vmem:[#allocation3 + $0x54] sm:$0x1] %v4351_v35  ;;  %v4348_v3 = vsel %vm10121_vm7, 0, %v4347_v36  ;;  %v4405_v22 = vld [vmem:[#allocation3 + $0x5c] sm:$0x1]  ;;  %4961 = vrot.lane.b32.xlu1 %v4830_v61, %s9351_s28  ;;  %v5701_v14 = vor.u32 %v5700_v7, %v5696_v63  ;;  %v6588_v5 = vrot.slane %v6586_v10, 1 }
 0x1fc   : > { %4349 = vst [vmem:[#allocation3 + $0x48] sm:$0x1] %v4348_v3  ;;  %v4406_v46 = vsel %vm10155_vm1, 0, %v4405_v22  ;;  %v4402_v48 = vld [vmem:[#allocation3 + $0x50] sm:$0x1]  ;;  %v5718_v13 = vsel %vm11238_vm10, %v5713_v6, %v5717_v2  ;;  %v4810_v17 = vshll.u32 %v9142_v12, 16  ;;  %vm11246_vm10 = vmmov %vm11245_vm9 }
 0x1fd   : > { %4407 = vst [vmem:[#allocation3 + $0x5c] sm:$0x1] %v4406_v46  ;;  %v4403_v52 = vsel %vm10155_vm1, 0, %v4402_v48  ;;  %5859 = vrot.lane.b32.xlu0 %v5718_v13, %s9356_s8  ;;  %v9143_v16 = vld [vmem:[#allocation3 + $0x38] ss:$0 sps:$4 sm:$0x11]   ;;  %v5706_v18 = vsel %vm11239_vm11, %v5701_v14, %v5705_v11  ;;  %v6589_v19 = vor.u32 %v6588_v5, %v6584_v9  ;;  %vm11247_vm11 = vmmov %vm11245_vm9 }
 0x1fe   : > { %4404 = vst [vmem:[#allocation3 + $0x50] sm:$0x1] %v4403_v52  ;;  %v6593_v20 = vrot.slane %v6591_v15, 1  ;;  %v4808_v23 = vshrl.u32 %v9142_v12, 16  ;;  %v4812_v24 = vrot.slane %v4810_v17, 1  ;;  %v4815_v25 = vshll.u32 %v9143_v16, 16 }
 0x1ff   : > { %5857 = vrot.lane.b32.xlu1 %v5706_v18, %s9356_s8  ;;  %v4266_v56 = vld [vmem:[#allocation3 + $0x6c] sm:$0xf]  ;;  %v9148_v61 = vld [vmem:[#allocation3 + $0x54] sm:$0xfe]   ;;  %v4259_v63 = vld [vmem:[#allocation3 + $0x60] sm:$0xf] }
 0x200   : > { %v6594_v28 = vsel %vm11240_vm15, %v6589_v19, %v6593_v20  ;;  %v4813_v31 = vor.u32 %v4812_v24, %v4808_v23  ;;  %v4817_v32 = vrot.slane %v4815_v25, 1  ;;  %v9150_v4 = vld [vmem:[#allocation3 + $0x54] sm:$0xfe]   ;;  %vm5466_vm4 = vcmask 261312   ;;  %v4270_v7 = vld [vmem:[#allocation3 + $0x74] sm:$0x1]  ;;  %vm11248_vm15 = vmmov %vm11245_vm9 }
 0x201   : > { %6755 = vrot.lane.b32.xlu0 %v6594_v28, %s9362_s13  ;;  %v4263_v5 = vld [vmem:[#allocation3 + $0x68] sm:$0x1]  ;;  %v7007_v18 = vrot.slane %v9148_v61, 1  ;;  %v9152_v25 = vld [vmem:[#allocation3 + $0x54] sm:$0xfe]   ;;  %vm11243_vm6 = vcmask 60416  }
 0x202   : > { %v9144_v34 = vld [vmem:[#allocation3 + $0x54] sm:$0xff]   ;;  %v4818_v3 = vsel %vm11241_vm3, %v4813_v31, %v4817_v32  ;;  %vm11244_vm8 = vmmov %vm11243_vm6  ;;  %vm5899_vm3 = vcmask 326912  }
 0x203   : > { %4959 = vrot.lane.b32.xlu1 %v4818_v3, %s9351_s28  ;;  %v9145_v45 = vld [vmem:[#allocation3 + $0x54] sm:$0xff]   ;;  %v9146_v55 = vld [vmem:[#allocation3 + $0x48] sm:$0xff]  }
 0x204   : > { %v8692_v21 = vpop.f32.mrb[16].mxu0  ;;  %v9149_v48 = vld [vmem:[#allocation3 + $0x5c] ss:$0 sps:$4 sm:$0x11]   ;;  %v9147_v10 = vld [vmem:[#allocation3 + $0x48] sm:$0xff]   ;;  %v10431_v19 = vld [vmem:[#allocation3 + $0x54] sm:$0xff]  }
 0x205   : > { %v3474_v27 = vadd.f32 %v10418_v26, %v8692_v21  ;;  %v3465_v50 = vpop.f32.mrb[17].mxu0  ;;  %5430 = vrot.lane.b32.xlu0 %v9144_v34, %s9354_s6  ;;  %v7008_v2 = vrot.slane %v9149_v48, 1  ;;  %v9151_v11 = vld [vmem:[#allocation3 + $0x5c] ss:$0 sps:$4 sm:$0x11]   ;;  %v6110_v34 = vrot.slane %v9152_v25, 1 }
 0x206   : > { %v3466_v29 = vadd.f32 %v10418_v26, %v3465_v50  ;;  %v8693_v30 = vpop.f32.mrb[18].mxu0  ;;  %v5214_v24 = vrot.slane %v9151_v11, 1  ;;  %v9155_v3 = vld [vmem:[#allocation3 + $0x50] ss:$0 sps:$4 sm:$0x11]  }
 0x207   : > { %v3562_v33 = vmax.f32 %v3474_v27, 0.0  ;;  %v3477_v35 = vadd.f32 %v10418_v26, %v8693_v30  ;;  %v3468_v36 = vpop.f32.mrb[19].mxu0  ;;  %6328 = vrot.lane.b32.xlu1 %v9145_v45, %s9360_s29  ;;  %v9153_v30 = vld [vmem:[#allocation3 + $0x5c] ss:$0 sps:$4 sm:$0x11]  }
 0x208   : > { %v3560_v39 = vmax.f32 %v3466_v29, 0.0  ;;  %v3469_v40 = vadd.f32 %v10418_v26, %v3468_v36  ;;  %v7009_v29 = vsel %vm11242_vm14, %v7007_v18, %v7008_v2  ;;  %v9157_v48 = vld [vmem:[#allocation3 + $0x48] sm:$0xfe]   ;;  %v9163_v2 = vld [vmem:[#allocation3 + $0x54] sm:$0xff]   ;;  %vm6188_vm14 = vcmask 392512  }
 0x209   : > { %v8560_v22 = vpack.c.bf16 %v3562_v33, %v3562_v33  ;;  %v3563_v41 = vmax.f32 %v3477_v35, 0.0  ;;  %6326 = vrot.lane.b32.xlu0 %v9146_v55, %s9360_s29  ;;  %v5213_v33 = vrot.slane %v9150_v4, 1  ;;  %v9154_v35 = vld [vmem:[#allocation3 + $0x48] sm:$0xfe]  }
 0x20a   : > { %v8558_v43 = vpack.c.bf16 %v3560_v39, %v3560_v39  ;;  %v3561_v46 = vmax.f32 %v3469_v40, 0.0  ;;  %v6111_v40 = vrot.slane %v9153_v30, 1  ;;  %v9171_v30 = vld [vmem:[#allocation3 + $0x48] sm:$0xff]  }
 0x20b   : > { %v3991_v49 = vshrl.u32 %v8560_v22, 16  ;;  %v3994_v52 = vshll.u32 %v8560_v22, 16  ;;  %v8561_v54 = vpack.c.bf16 %v3563_v41, %v3563_v41  ;;  %5428 = vrot.lane.b32.xlu1 %v9147_v10, %s9354_s6  ;;  %v5215_v22 = vsel %vm11245_vm9, %v5213_v33, %v5214_v24  ;;  %v9169_v24 = vld [vmem:[#allocation3 + $0x48] sm:$0xff]  }
 0x20c   : > { %v3974_v57 = vshrl.u32 %v8558_v43, 16  ;;  %v3977_v58 = vshll.u32 %v8558_v43, 16  ;;  %v8559_v59 = vpack.c.bf16 %v3561_v46, %v3561_v46  ;;  %v6107_v41 = vrot.slane %v9154_v35, 1  ;;  %v9168_v35 = vld [vmem:[#allocation3 + $0x50] ss:$0 sps:$4 sm:$0x11]  }
 0x20d   : > { %v3993_v62 = vrot.slane %v3991_v49, 7  ;;  %v3999_v0 = vshrl.u32 %v8561_v54, 16  ;;  %v4002_v1 = vshll.u32 %v8561_v54, 16  ;;  %7050 = vrot.lane.b32.xlu0 %v7009_v29, %s9361_s7  ;;  %v6620_v43 = vshrl.u32 %v10431_v19, 16 }
 0x20e   : > { %v3976_v6 = vrot.slane %v3974_v57, 7  ;;  %v3982_v8 = vshrl.u32 %v8559_v59, 16  ;;  %v3985_v9 = vshll.u32 %v8559_v59, 16  ;;  %v6112_v45 = vsel %vm11246_vm10, %v6110_v34, %v6111_v40  ;;  %v9158_v49 = vld [vmem:[#allocation3 + $0x50] ss:$0 sps:$4 sm:$0x11]  }
 0x20f   : > { %v3996_v12 = vor.u32 %v3994_v52, %v3993_v62  ;;  %v3997_v13 = vrot.slane %v3993_v62, 4  ;;  %v4001_v14 = vrot.slane %v3999_v0, 7  ;;  %5254 = vrot.lane.b32.xlu1 %v5215_v22, %s9353_s30  ;;  %v6108_v46 = vrot.slane %v9155_v3, 1 }
 0x210   : > { %v3979_v15 = vor.u32 %v3977_v58, %v3976_v6  ;;  %v3980_v16 = vrot.slane %v3976_v6, 4  ;;  %v3984_v17 = vrot.slane %v3982_v8, 7  ;;  %v7004_v54 = vrot.slane %v9157_v48, 1  ;;  %v9170_v48 = vld [vmem:[#allocation3 + $0x50] ss:$0 sps:$4 sm:$0x11]  }
 0x211   : > { %v4267_v20 = vsel %vm10112_vm0, %v3996_v12, %v4266_v56  ;;  %v4004_v21 = vor.u32 %v4002_v1, %v4001_v14  ;;  %v4006_v23 = vrot.slane %v4001_v14, 4  ;;  %6152 = vrot.lane.b32.xlu0 %v6112_v45, %s9359_s27  ;;  %v7005_v55 = vrot.slane %v9158_v49, 1  ;;  %v9160_v56 = vld [vmem:[#allocation3 + $0x5c] ss:$0 sps:$4 sm:$0x11]  }
 0x212   : > { %4268 = vst [vmem:[#allocation3 + $0x6c] sm:$0xf] %v4267_v20  ;;  %v4260_v27 = vsel %vm10112_vm0, %v3979_v15, %v4259_v63  ;;  %v3987_v50 = vor.u32 %v3985_v9, %v3984_v17  ;;  %v3989_v28 = vrot.slane %v3984_v17, 4  ;;  %v6622_v57 = vshll.u32 %v10431_v19, 16  ;;  %v9161_v12 = vld [vmem:[#allocation3 + $0x48] sm:$0xfe]  }
 0x213   : > { %4261 = vst [vmem:[#allocation3 + $0x60] sm:$0xf] %v4260_v27  ;;  %v4005_v31 = vsel %vm10131_vm2, %v3997_v13, %v4004_v21  ;;  %v4271_v32 = vsel %vm10121_vm7, %v4006_v23, %v4270_v7  ;;  %v6109_v59 = vsel %vm11247_vm11, %v6107_v41, %v6108_v46  ;;  %v7006_v63 = vsel %vm11248_vm15, %v7004_v54, %v7005_v55  ;;  %v9165_v7 = vld [vmem:[#allocation3 + $0x54] sm:$0xff]   ;;  %v9162_v14 = vld [vmem:[#allocation3 + $0x50] ss:$0 sps:$4 sm:$0x11]  }
 0x214   : > { %4269 = vst.msk [vmem:[#allocation3 + $0x70] sm:$0xf] %vm11243_vm6, %v4005_v31  ;;  %4272 = vst [vmem:[#allocation3 + $0x74] sm:$0x1] %v4271_v32  ;;  %v3988_v36 = vsel %vm10131_vm2, %v3980_v16, %v3987_v50  ;;  %v4264_v39 = vsel %vm10121_vm7, %v3989_v28, %v4263_v5  ;;  %6150 = vrot.lane.b32.xlu1 %v6109_v59, %s9359_s27  ;;  %v6624_v0 = vrot.slane %v6622_v57, 1  ;;  %v6627_v1 = vshll.u32 %v9160_v56, 16 }
 0x215   : > { %4262 = vst.msk [vmem:[#allocation3 + $0x64] sm:$0xf] %vm11244_vm8, %v3988_v36  ;;  %4265 = vst [vmem:[#allocation3 + $0x68] sm:$0x1] %v4264_v39  ;;  %v5419_v52 = vpop.permute.xlu0 %5418  ;;  %7048 = vrot.lane.b32.xlu0 %v7006_v63, %s9361_s7  ;;  %vm11249_vm6 = vsmask.f32 7424 }
 0x216   : > { %5467 = vst.msk [vmem:[#allocation4] sm:$0xff] %vm5466_vm4, %v5419_v52  ;;  %v6625_v10 = vor.u32 %v6624_v0, %v6620_v43  ;;  %v6629_v11 = vrot.slane %v6627_v1, 1  ;;  %v5210_v15 = vrot.slane %v9161_v12, 1  ;;  %v4846_v16 = vshll.u32 %v9163_v2, 16  ;;  %v9167_v17 = vld [vmem:[#allocation3 + $0x48] sm:$0xff]   ;;  %vm11250_vm8 = vmmov %vm11245_vm9 }
 0x217   : > { %v5211_v19 = vrot.slane %v9162_v14, 1  ;;  %v9164_v20 = vld [vmem:[#allocation3 + $0x5c] ss:$0 sps:$4 sm:$0x11]   ;;  %v4844_v21 = vshrl.u32 %v9163_v2, 16  ;;  %v5732_v28 = vshrl.u32 %v9165_v7, 16  ;;  %vm11251_vm9 = vmmov %vm11249_vm6 }
 0x218   : > { %v6630_v5 = vsel %vm11249_vm6, %v6625_v10, %v6629_v11  ;;  %v4848_v23 = vrot.slane %v4846_v16, 1  ;;  %v4851_v27 = vshll.u32 %v9164_v20, 16  ;;  %v9166_v50 = vld [vmem:[#allocation3 + $0x5c] ss:$0 sps:$4 sm:$0x11]   ;;  %v5734_v29 = vshll.u32 %v9165_v7, 16  ;;  %vm11252_vm10 = vmmov %vm11249_vm6 }
 0x219   : > { %v4356_v58 = vld [vmem:[#allocation3 + $0x6c] sm:$0x1]  ;;  %6761 = vrot.lane.b32.xlu1 %v6630_v5, %s9362_s13  ;;  %v5212_v25 = vsel %vm11250_vm8, %v5210_v15, %v5211_v19  ;;  %v5739_v34 = vshll.u32 %v9166_v50, 16  ;;  %v5720_v39 = vshrl.u32 %v9167_v17, 16  ;;  %v5722_v40 = vshll.u32 %v9167_v17, 16  ;;  %vm11253_vm11 = vmmov %vm11249_vm6 }
 0x21a   : > { %v4357_v61 = vsel %vm10121_vm7, 0, %v4356_v58  ;;  %v4353_v62 = vld [vmem:[#allocation3 + $0x60] sm:$0x1]  ;;  %v6141_v18 = vpop.permute.xlu0 %6140  ;;  %5252 = vrot.lane.b32.xlu0 %v5212_v25, %s9353_s30  ;;  %v4849_v31 = vor.u32 %v4848_v23, %v4844_v21  ;;  %v4853_v32 = vrot.slane %v4851_v27, 1  ;;  %v5736_v33 = vrot.slane %v5734_v29, 1  ;;  %vm11254_vm15 = vmmov %vm11249_vm6 }
 0x21b   : > { %4358 = vst [vmem:[#allocation3 + $0x6c] sm:$0x1] %v4357_v61  ;;  %v4354_v4 = vsel %vm10121_vm7, 0, %v4353_v62  ;;  %v4411_v6 = vld [vmem:[#allocation3 + $0x74] sm:$0x1]  ;;  %v5243_v36 = vpop.permute.xlu1 %5242  ;;  %v5741_v43 = vrot.slane %v5739_v34, 1 }
 0x21c   : > { %4355 = vst [vmem:[#allocation3 + $0x60] sm:$0x1] %v4354_v4  ;;  %v4412_v8 = vsel %vm10155_vm1, 0, %v4411_v6  ;;  %v4408_v9 = vld [vmem:[#allocation3 + $0x68] sm:$0x1]  ;;  %v4854_v22 = vsel %vm11251_vm9, %v4849_v31, %v4853_v32  ;;  %v5737_v41 = vor.u32 %v5736_v33, %v5732_v28  ;;  %v5727_v45 = vshll.u32 %v9168_v35, 16 }
 0x21d   : > { %4413 = vst [vmem:[#allocation3 + $0x74] sm:$0x1] %v4412_v8  ;;  %v4409_v13 = vsel %vm10155_vm1, 0, %v4408_v9  ;;  %4965 = vrot.lane.b32.xlu1 %v4854_v22, %s9351_s28  ;;  %v5724_v46 = vrot.slane %v5722_v40, 1  ;;  %v6608_v49 = vshrl.u32 %v9169_v24, 16  ;;  %v6610_v52 = vshll.u32 %v9169_v24, 16 }
 0x21e   : > { %4410 = vst [vmem:[#allocation3 + $0x68] sm:$0x1] %v4409_v13  ;;  %v5742_v54 = vsel %vm11252_vm10, %v5737_v41, %v5741_v43  ;;  %v5729_v55 = vrot.slane %v5727_v45, 1  ;;  %v4834_v56 = vshll.u32 %v9171_v30, 16  ;;  %v6615_v59 = vshll.u32 %v9170_v48, 16 }
 0x21f   : > { %v5852_v3 = vpop.permute.xlu0 %5851  ;;  %5863 = vrot.lane.b32.xlu0 %v5742_v54, %s9356_s8  ;;  %v5725_v57 = vor.u32 %v5724_v46, %v5720_v39  ;;  %v6612_v58 = vrot.slane %v6610_v52, 1  ;;  %v9172_v61 = vld [vmem:[#allocation3 + $0x50] ss:$0 sps:$4 sm:$0x11]   ;;  %v4832_v63 = vshrl.u32 %v9171_v30, 16  ;;  %vm11255_vm9 = vcmask 60416  }
 0x220   : > { %5900 = vst.msk [vmem:[#allocation4] sm:$0xff] %vm5899_vm3, %v5852_v3  ;;  %v4836_v0 = vrot.slane %v4834_v56, 1  ;;  %v6617_v8 = vrot.slane %v6615_v59, 1  ;;  %v4839_v9 = vshll.u32 %v9172_v61, 16  ;;  %v4280_v30 = vld [vmem:[#allocation3 + $0x84] sm:$0xf]  ;;  %vm11256_vm10 = vmmov %vm11255_vm9 }
 0x221   : > { %6189 = vst.msk [vmem:[#allocation4] sm:$0xff] %vm6188_vm14, %v6141_v18  ;;  %v5730_v6 = vsel %vm11253_vm11, %v5725_v57, %v5729_v55  ;;  %v6613_v7 = vor.u32 %v6612_v58, %v6608_v49  ;;  %v9178_v32 = vld [vmem:[#allocation3 + $0x6c] sm:$0xfe]   ;;  %v4273_v3 = vld [vmem:[#allocation3 + $0x78] sm:$0xf]  ;;  %vm11257_vm11 = vmmov %vm11250_vm8 }
 0x222   : > { %5861 = vrot.lane.b32.xlu1 %v5730_v6, %s9356_s8  ;;  %v4837_v10 = vor.u32 %v4836_v0, %v4832_v63  ;;  %v4841_v5 = vrot.slane %v4839_v9, 1  ;;  %v9174_v19 = vld [vmem:[#allocation3 + $0x6c] sm:$0xff]   ;;  %v7013_v43 = vrot.slane %v9178_v32, 1  ;;  %v4277_v59 = vld [vmem:[#allocation3 + $0x80] sm:$0x1] }
 0x223   : > { %v6618_v14 = vsel %vm11254_vm15, %v6613_v7, %v6617_v8  ;;  %v9175_v23 = vld [vmem:[#allocation3 + $0x6c] sm:$0xff]   ;;  %v9176_v39 = vld [vmem:[#allocation3 + $0x60] sm:$0xff]   ;;  %vm11258_vm15 = vmmov %vm11250_vm8 }
 0x224   : > { %v8696_v62 = vpop.f32.mrb[20].mxu0  ;;  %6759 = vrot.lane.b32.xlu0 %v6618_v14, %s9362_s13  ;;  %v4842_v21 = vsel %vm11249_vm6, %v4837_v10, %v4841_v5  ;;  %v10491_v29 = vld [vmem:[#allocation3 + $0x6c] sm:$0xff]   ;;  %v9179_v40 = vld [vmem:[#allocation3 + $0x74] ss:$0 sps:$4 sm:$0x11]   ;;  %v9177_v55 = vld [vmem:[#allocation3 + $0x60] sm:$0xff]  }
 0x225   : > { %v3490_v1 = vadd.f32 %v10418_v26, %v8696_v62  ;;  %v4954_v2 = vpop.permute.xlu1 %4953  ;;  %v3481_v4 = vpop.f32.mrb[21].mxu0  ;;  %v6644_v45 = vshrl.u32 %v10491_v29, 16  ;;  %v4284_v52 = vld [vmem:[#allocation3 + $0x8c] sm:$0x1]  ;;  %v7014_v61 = vrot.slane %v9179_v40, 1  ;;  %v6646_v62 = vshll.u32 %v10491_v29, 16  ;;  %vm11259_vm6 = vmmov %vm11250_vm8 }
 0x226   : > { %5001 = vst.msk [vmem:[#allocation4 + $0x8] sm:$0xff] %vm4999_vm12, %v4954_v2  ;;  %v3482_v12 = vadd.f32 %v10418_v26, %v3481_v4  ;;  %v8697_v13 = vpop.f32.mrb[22].mxu0  ;;  %4963 = vrot.lane.b32.xlu1 %v4842_v21, %s9351_s28  ;;  %v9180_v6 = vld [vmem:[#allocation3 + $0x6c] sm:$0xfe]  }
 0x227   : > { %v3566_v11 = vmax.f32 %v3490_v1, 0.0  ;;  %5290 = vst.msk [vmem:[#allocation4 + $0x8] sm:$0xff] %vm5288_vm13, %v5243_v36  ;;  %v3493_v15 = vadd.f32 %v10418_v26, %v8697_v13  ;;  %v3484_v16 = vpop.f32.mrb[23].mxu0  ;;  %v9181_v9 = vld [vmem:[#allocation3 + $0x74] ss:$0 sps:$4 sm:$0x11]  }
 0x228   : > { %v3564_v18 = vmax.f32 %v3482_v12, 0.0  ;;  %v3485_v20 = vadd.f32 %v10418_v26, %v3484_v16  ;;  %5434 = vrot.lane.b32.xlu0 %v9174_v19, %s9354_s6  ;;  %v5219_v13 = vrot.slane %v9180_v6, 1  ;;  %v9182_v14 = vld [vmem:[#allocation3 + $0x6c] sm:$0xfe]   ;;  %v5220_v19 = vrot.slane %v9181_v9, 1 }
 0x229   : > { %v8564_v17 = vpack.c.bf16 %v3566_v11, %v3566_v11  ;;  %v3567_v24 = vmax.f32 %v3493_v15, 0.0  ;;  %v10507_v5 = vld [vmem:[#allocation3 + $0x6c] sm:$0xff]   ;;  %v9191_v9 = vld [vmem:[#allocation3 + $0x68] ss:$0 sps:$4 sm:$0x11]  }
 0x22a   : > { %v8562_v50 = vpack.c.bf16 %v3564_v18, %v3564_v18  ;;  %v3565_v28 = vmax.f32 %v3485_v20, 0.0  ;;  %6332 = vrot.lane.b32.xlu1 %v9175_v23, %s9360_s29  ;;  %v7015_v18 = vsel %vm11250_vm8, %v7013_v43, %v7014_v61  ;;  %v9183_v20 = vld [vmem:[#allocation3 + $0x74] ss:$0 sps:$4 sm:$0x11]   ;;  %vm11260_vm8 = vmmov %vm11259_vm6 }
 0x22b   : > { %v4025_v25 = vshrl.u32 %v8564_v17, 16  ;;  %v4028_v27 = vshll.u32 %v8564_v17, 16  ;;  %v8565_v31 = vpack.c.bf16 %v3567_v24, %v3567_v24 }
 0x22c   : > { %v4008_v34 = vshrl.u32 %v8562_v50, 16  ;;  %v4011_v35 = vshll.u32 %v8562_v50, 16  ;;  %v8563_v36 = vpack.c.bf16 %v3565_v28, %v3565_v28  ;;  %6330 = vrot.lane.b32.xlu0 %v9176_v39, %s9360_s29  ;;  %v5221_v50 = vsel %vm11257_vm11, %v5219_v13, %v5220_v19  ;;  %v9194_v13 = vld [vmem:[#allocation3 + $0x6c] sm:$0xff]   ;;  %vm11262_vm11 = vmmov %vm11259_vm6 }
 0x22d   : > { %v4027_v33 = vrot.slane %v4025_v25, 7  ;;  %v4033_v22 = vshrl.u32 %v8565_v31, 16  ;;  %v4036_v41 = vshll.u32 %v8565_v31, 16  ;;  %v6116_v25 = vrot.slane %v9182_v14, 1 }
 0x22e   : > { %v4010_v49 = vrot.slane %v4008_v34, 7  ;;  %v4016_v54 = vshrl.u32 %v8563_v36, 16  ;;  %v4019_v58 = vshll.u32 %v8563_v36, 16  ;;  %5432 = vrot.lane.b32.xlu1 %v9177_v55, %s9354_s6  ;;  %v6117_v28 = vrot.slane %v9183_v20, 1 }
 0x22f   : > { %v4030_v46 = vor.u32 %v4028_v27, %v4027_v33  ;;  %v4031_v48 = vrot.slane %v4027_v33, 4  ;;  %v4035_v57 = vrot.slane %v4033_v22, 7  ;;  %v6648_v27 = vrot.slane %v6646_v62, 1  ;;  %v9185_v31 = vld [vmem:[#allocation3 + $0x68] ss:$0 sps:$4 sm:$0x11]  }
 0x230   : > { %v4013_v1 = vor.u32 %v4011_v35, %v4010_v49  ;;  %v4014_v2 = vrot.slane %v4010_v49, 4  ;;  %v4018_v4 = vrot.slane %v4016_v54, 7  ;;  %7054 = vrot.lane.b32.xlu0 %v7015_v18, %s9361_s7  ;;  %v6118_v32 = vsel %vm11258_vm15, %v6116_v25, %v6117_v28  ;;  %v9186_v35 = vld [vmem:[#allocation3 + $0x60] sm:$0xfe]  }
 0x231   : > { %v4281_v0 = vsel %vm10112_vm0, %v4030_v46, %v4280_v30  ;;  %v4038_v7 = vor.u32 %v4036_v41, %v4035_v57  ;;  %v4040_v8 = vrot.slane %v4035_v57, 4  ;;  %v9184_v30 = vld [vmem:[#allocation3 + $0x60] sm:$0xfe]   ;;  %v6114_v34 = vrot.slane %v9185_v31, 1 }
 0x232   : > { %4282 = vst [vmem:[#allocation3 + $0x84] sm:$0xf] %v4281_v0  ;;  %v4274_v10 = vsel %vm10112_vm0, %v4013_v1, %v4273_v3  ;;  %v4021_v11 = vor.u32 %v4019_v58, %v4018_v4  ;;  %v4023_v12 = vrot.slane %v4018_v4, 4  ;;  %5258 = vrot.lane.b32.xlu1 %v5221_v50, %s9353_s30  ;;  %v6113_v33 = vrot.slane %v9184_v30, 1  ;;  %v9190_v4 = vld [vmem:[#allocation3 + $0x60] sm:$0xfe]  }
 0x233   : > { %4275 = vst [vmem:[#allocation3 + $0x78] sm:$0xf] %v4274_v10  ;;  %v4039_v16 = vsel %vm10131_vm2, %v4031_v48, %v4038_v7  ;;  %v4285_v17 = vsel %vm10121_vm7, %v4040_v8, %v4284_v52  ;;  %v9187_v3 = vld [vmem:[#allocation3 + $0x68] ss:$0 sps:$4 sm:$0x11]   ;;  %v4868_v22 = vshrl.u32 %v10507_v5, 16  ;;  %v6649_v0 = vor.u32 %v6648_v27, %v6644_v45 }
 0x234   : > { %4283 = vst.msk [vmem:[#allocation3 + $0x88] sm:$0xf] %vm11255_vm9, %v4039_v16  ;;  %4286 = vst [vmem:[#allocation3 + $0x8c] sm:$0x1] %v4285_v17  ;;  %v4022_v23 = vsel %vm10131_vm2, %v4014_v2, %v4021_v11  ;;  %v4278_v24 = vsel %vm10121_vm7, %v4023_v12, %v4277_v59  ;;  %6156 = vrot.lane.b32.xlu0 %v6118_v32, %s9359_s27  ;;  %v6115_v43 = vsel %vm11259_vm6, %v6113_v33, %v6114_v34  ;;  %vm6366_vm9 = vcmask 458112   ;;  %v9196_v25 = vld [vmem:[#allocation3 + $0x60] sm:$0xff]  }
 0x235   : > { %v10496_v56 = vpop.permute.xlu1 %6320  ;;  %4276 = vst.msk [vmem:[#allocation3 + $0x7c] sm:$0xf] %vm11256_vm10, %v4022_v23  ;;  %4279 = vst [vmem:[#allocation3 + $0x80] sm:$0x1] %v4278_v24  ;;  %v7010_v46 = vrot.slane %v9186_v35, 1  ;;  %v7011_v49 = vrot.slane %v9187_v3, 1 }
 0x236   : > { %v10499_v63 = vpop.permute.xlu0 %5422  ;;  %6154 = vrot.lane.b32.xlu1 %v6115_v43, %s9359_s27  ;;  %v9189_v52 = vld [vmem:[#allocation3 + $0x74] ss:$0 sps:$4 sm:$0x11]   ;;  %v4870_v57 = vshll.u32 %v10507_v5, 16  ;;  %v5216_v10 = vrot.slane %v9190_v4, 1  ;;  %v5217_v45 = vrot.slane %v9191_v9, 1 }
 0x237   : > { %v7012_v62 = vsel %vm11260_vm8, %v7010_v46, %v7011_v49  ;;  %v6651_v1 = vshll.u32 %v9189_v52, 16  ;;  %vm11261_vm10 = vsmask.f32 7424  ;;  %v9193_v12 = vld [vmem:[#allocation3 + $0x74] ss:$0 sps:$4 sm:$0x11]  }
 0x238   : > { %7052 = vrot.lane.b32.xlu0 %v7012_v62, %s9361_s7  ;;  %v4872_v6 = vrot.slane %v4870_v57, 1  ;;  %v5218_v14 = vsel %vm11262_vm11, %v5216_v10, %v5217_v45  ;;  %v9195_v16 = vld [vmem:[#allocation3 + $0x74] ss:$0 sps:$4 sm:$0x11]   ;;  %v5756_v17 = vshrl.u32 %v9194_v13, 16  ;;  %v5758_v18 = vshll.u32 %v9194_v13, 16  ;;  %vm11263_vm15 = vmmov %vm11261_vm10 }
 0x239   : > { %v5421_v15 = vpop.permute.xlu1 %5420  ;;  %v4362_v40 = vld [vmem:[#allocation3 + $0x84] sm:$0x1]  ;;  %v6653_v8 = vrot.slane %v6651_v1, 1  ;;  %v5763_v24 = vshll.u32 %v9195_v16, 16  ;;  %v5746_v31 = vshll.u32 %v9196_v25, 16  ;;  %v5744_v34 = vshrl.u32 %v9196_v25, 16  ;;  %vm11264_vm6 = vmmov %vm11261_vm10 }
 0x23a   : > { %v6319_v21 = vpop.permute.xlu0 %6318  ;;  %5468 = vst.msk [vmem:[#allocation4 + $0x8] sm:$0xff] %vm5466_vm4, %v5421_v15  ;;  %v4363_v41 = vsel %vm10121_vm7, 0, %v4362_v40  ;;  %v4359_v48 = vld [vmem:[#allocation3 + $0x78] sm:$0x1]  ;;  %v4873_v5 = vor.u32 %v4872_v6, %v4868_v22  ;;  %v4875_v15 = vshll.u32 %v9193_v12, 16  ;;  %v5760_v27 = vrot.slane %v5758_v18, 1  ;;  %vm11265_vm8 = vmmov %vm11264_vm6 }
 0x23b   : > { %4364 = vst [vmem:[#allocation3 + $0x84] sm:$0x1] %v4363_v41  ;;  %v4360_v54 = vsel %vm10121_vm7, 0, %v4359_v48  ;;  %v4417_v55 = vld [vmem:[#allocation3 + $0x8c] sm:$0x1]  ;;  %v6654_v29 = vsel %vm11261_vm10, %v6649_v0, %v6653_v8  ;;  %6367 = vst.msk [vmem:[#allocation4] sm:$0xff] %vm6366_vm9, %v6319_v21 }
 0x23c   : > { %4361 = vst [vmem:[#allocation3 + $0x78] sm:$0x1] %v4360_v54  ;;  %v4418_v59 = vsel %vm10155_vm1, 0, %v4417_v55  ;;  %v4414_v61 = vld [vmem:[#allocation3 + $0x80] sm:$0x1]  ;;  %6765 = vrot.lane.b32.xlu1 %v6654_v29, %s9362_s13  ;;  %5256 = vrot.lane.b32.xlu0 %v5218_v14, %s9353_s30  ;;  %v4877_v23 = vrot.slane %v4875_v15, 1  ;;  %v5761_v33 = vor.u32 %v5760_v27, %v5756_v17  ;;  %vm11266_vm10 = vmmov %vm11264_vm6 }
 0x23d   : > { %v10527_v39 = vpop.permute.xlu1 %5246  ;;  %4419 = vst [vmem:[#allocation3 + $0x8c] sm:$0x1] %v4418_v59  ;;  %v4415_v2 = vsel %vm10155_vm1, 0, %v4414_v61  ;;  %v9197_v21 = vld [vmem:[#allocation3 + $0x68] ss:$0 sps:$4 sm:$0x11]  }
 0x23e   : > { %v10525_v36 = vpop.permute.xlu0 %7042  ;;  %4416 = vst [vmem:[#allocation3 + $0x80] sm:$0x1] %v4415_v2  ;;  %v9198_v50 = vld [vmem:[#allocation3 + $0x60] sm:$0xff]   ;;  %v4878_v28 = vsel %vm11263_vm15, %v4873_v5, %v4877_v23  ;;  %v5765_v30 = vrot.slane %v5763_v24, 1  ;;  %v5751_v35 = vshll.u32 %v9197_v21, 16  ;;  %v5748_v41 = vrot.slane %v5746_v31, 1  ;;  %vm11267_vm15 = vmmov %vm11264_vm6 }
 0x23f   : > { %v9200_v32 = vld [vmem:[#allocation3 + $0x60] sm:$0xff]   ;;  %v9199_v40 = vld [vmem:[#allocation3 + $0x68] ss:$0 sps:$4 sm:$0x11]   ;;  %v6634_v3 = vshll.u32 %v9198_v50, 16  ;;  %v6632_v43 = vshrl.u32 %v9198_v50, 16 }
 0x240   : > { %4969 = vrot.lane.b32.xlu1 %v4878_v28, %s9351_s28  ;;  %v5766_v46 = vsel %vm11264_vm6, %v5761_v33, %v5765_v30  ;;  %v5753_v48 = vrot.slane %v5751_v35, 1  ;;  %v6639_v52 = vshll.u32 %v9199_v40, 16  ;;  %v5749_v57 = vor.u32 %v5748_v41, %v5744_v34  ;;  %v9201_v59 = vld [vmem:[#allocation3 + $0x68] ss:$0 sps:$4 sm:$0x11]  }
 0x241   : > { %v10548_v7 = vpop.permute.xlu1 %6142  ;;  %v6636_v49 = vrot.slane %v6634_v3, 1  ;;  %5867 = vrot.lane.b32.xlu0 %v5766_v46, %s9356_s8  ;;  %v4858_v61 = vshll.u32 %v9200_v32, 16  ;;  %v4856_v2 = vshrl.u32 %v9200_v32, 16  ;;  %v4863_v9 = vshll.u32 %v9201_v59, 16  ;;  %v9205_v34 = vld [vmem:[#allocation3 + $0x24] sm:$0xff]  }
 0x242   : > { %v10538_v58 = vpop.permute.xlu0 %6144  ;;  %v6641_v1 = vrot.slane %v6639_v52, 1  ;;  %v5754_v6 = vsel %vm11265_vm8, %v5749_v57, %v5753_v48  ;;  %vm6799_vm11 = vcmask 523712   ;;  %vm11193_vm6 = vcmask 589312   ;;  %4570 = vst.msk [vmem:[#allocation4 + $0x18] sm:$0xff] %vm4566_vm5, %v9205_v34  ;;  %v4287_v52 = vld [vmem:[#allocation3 + $0x90] sm:$0xf] }
 0x243   : > { %v6637_v0 = vor.u32 %v6636_v49, %v6632_v43  ;;  %v4860_v8 = vrot.slane %v4858_v61, 1  ;;  %v4865_v16 = vrot.slane %v4863_v9, 1  ;;  %v9202_v18 = vld [vmem:[#allocation3 + $0x78] sm:$0xff]   ;;  %vm11268_vm8 = vcmask 60416  }
 0x244   : > { %v8700_v54 = vpop.f32.mrb[24].mxu0  ;;  %5865 = vrot.lane.b32.xlu1 %v5754_v6, %s9356_s8  ;;  %v9203_v30 = vld [vmem:[#allocation3 + $0x78] sm:$0xff]  }
 0x245   : > { %v3506_v62 = vadd.f32 %v10418_v26, %v8700_v54  ;;  %v3497_v4 = vpop.f32.mrb[25].mxu0  ;;  %v6642_v45 = vsel %vm11266_vm10, %v6637_v0, %v6641_v1  ;;  %v4861_v15 = vor.u32 %v4860_v8, %v4856_v2  ;;  %v9206_v3 = vld [vmem:[#allocation3 + $0x78] sm:$0xff]   ;;  %v4298_v54 = vld [vmem:[#allocation3 + $0xa4] sm:$0x1]  ;;  %vm11269_vm10 = vmmov %vm11268_vm8 }
 0x246   : > { %v10550_v11 = vpop.permute.xlu0 %7040  ;;  %v8701_v29 = vpop.f32.mrb[26].mxu0  ;;  %v3498_v12 = vadd.f32 %v10418_v26, %v3497_v4  ;;  %6763 = vrot.lane.b32.xlu0 %v6642_v45, %s9362_s13  ;;  %v6656_v0 = vshrl.u32 %v9206_v3, 16  ;;  %v6658_v1 = vshll.u32 %v9206_v3, 16  ;;  %v9208_v9 = vld [vmem:[#allocation3 + $0x78] sm:$0xfe]  }
 0x247   : > { %v3570_v10 = vmax.f32 %v3506_v62, 0.0  ;;  %v3509_v13 = vadd.f32 %v10418_v26, %v8701_v29  ;;  %v3500_v14 = vpop.f32.mrb[27].mxu0  ;;  %v4866_v27 = vsel %vm11267_vm15, %v4861_v15, %v4865_v16  ;;  %v4291_v62 = vld [vmem:[#allocation3 + $0x98] sm:$0x1]  ;;  %vm7105_vm15 = vcmask 1048128  }
 0x248   : > { %v10557_v19 = vpop.permute.xlu1 %6753  ;;  %v3501_v23 = vadd.f32 %v10418_v26, %v3500_v14  ;;  %v3568_v24 = vmax.f32 %v3498_v12, 0.0  ;;  %4967 = vrot.lane.b32.xlu1 %v4866_v27, %s9351_s28  ;;  %v4294_v26 = vld [vmem:[#allocation3 + $0x9c] sm:$0xf]  ;;  %v9204_v12 = vld [vmem:[#allocation3 + $0x84] sm:$0xff]   ;;  %v6660_v15 = vrot.slane %v6658_v1, 1 }
 0x249   : > { %v8568_v17 = vpack.c.bf16 %v3570_v10, %v3570_v10  ;;  %v3571_v25 = vmax.f32 %v3509_v13, 0.0  ;;  %v9209_v13 = vld [vmem:[#allocation3 + $0x80] ss:$0 sps:$4 sm:$0x11]  }
 0x24a   : > { %v10559_v20 = vpop.permute.xlu0 %5244  ;;  %v3569_v31 = vmax.f32 %v3501_v23, 0.0  ;;  %v8566_v32 = vpack.c.bf16 %v3568_v24, %v3568_v24  ;;  %6334 = vrot.lane.b32.xlu0 %v9202_v18, %s9360_s29 }
 0x24b   : > { %v4059_v50 = vshrl.u32 %v8568_v17, 16  ;;  %v4062_v28 = vshll.u32 %v8568_v17, 16  ;;  %v8569_v33 = vpack.c.bf16 %v3571_v25, %v3571_v25  ;;  %v9214_v17 = vld [vmem:[#allocation3 + $0x18] sm:$0xff]   ;;  %v6119_v25 = vrot.slane %v9208_v9, 1 }
 0x24c   : > { %v8567_v40 = vpack.c.bf16 %v3569_v31, %v3569_v31  ;;  %v4045_v41 = vshll.u32 %v8566_v32, 16  ;;  %5436 = vrot.lane.b32.xlu1 %v9203_v30, %s9354_s6  ;;  %v6661_v30 = vor.u32 %v6660_v15, %v6656_v0  ;;  %v6120_v31 = vrot.slane %v9209_v13, 1  ;;  %4569 = vst.msk [vmem:[#allocation4 + $0x10] sm:$0xff] %vm4566_vm5, %v9214_v17  ;;  %v9221_v13 = vld [vmem:[#allocation3 + $0x78] sm:$0xff]  }
 0x24d   : > { %v10563_v22 = vpop.permute.xlu1 %4957  ;;  %v4061_v35 = vrot.slane %v4059_v50, 7  ;;  %v4067_v43 = vshrl.u32 %v8569_v33, 16  ;;  %v4070_v46 = vshll.u32 %v8569_v33, 16  ;;  %v9217_v33 = vld [vmem:[#allocation3 + $0x78] sm:$0xff]  }
 0x24e   : > { %v10566_v55 = vpop.permute.xlu0 %5855  ;;  %v4050_v57 = vshrl.u32 %v8567_v40, 16  ;;  %v4053_v59 = vshll.u32 %v8567_v40, 16  ;;  %5003 = vst.msk [vmem:[#allocation4 + $0x18] sm:$0xff] %vm4999_vm12, %v10563_v22  ;;  %v5768_v0 = vshrl.u32 %v9217_v33, 16  ;;  %v9219_v15 = vld [vmem:[#allocation3 + $0x78] sm:$0xfe]  }
 0x24f   : > { %v4064_v48 = vor.u32 %v4062_v28, %v4061_v35  ;;  %v4065_v49 = vrot.slane %v4061_v35, 4  ;;  %5292 = vst.msk [vmem:[#allocation4 + $0x18] sm:$0xff] %vm5288_vm13, %v10527_v39 }
 0x250   : > { %v4052_v6 = vrot.slane %v4050_v57, 7  ;;  %6336 = vrot.lane.b32.xlu1 %v9204_v12, %s9360_s29  ;;  %v9215_v57 = vld [vmem:[#allocation3 + $0x84] sm:$0xfe]   ;;  %v9218_v12 = vld [vmem:[#allocation3 + $0x80] ss:$0 sps:$4 sm:$0x11]  }
 0x251   : > { %v5854_v5 = vpop.permute.xlu1 %5853  ;;  %v4295_v4 = vsel %vm10112_vm0, %v4064_v48, %v4294_v26  ;;  %v9210_v26 = vld [vmem:[#allocation3 + $0x78] sm:$0xfe]  }
 0x252   : > { %5901 = vst.msk [vmem:[#allocation4 + $0x8] sm:$0xff] %vm5899_vm3, %v5854_v5  ;;  %v6752_v21 = vpop.permute.xlu0 %6751  ;;  %4296 = vst [vmem:[#allocation3 + $0x9c] sm:$0xf] %v4295_v4  ;;  %v4055_v5 = vor.u32 %v4053_v59, %v4052_v6  ;;  %v4057_v39 = vrot.slane %v4052_v6, 4  ;;  %v7016_v3 = vrot.slane %v9210_v26, 1 }
 0x253   : > { %6190 = vst.msk [vmem:[#allocation4 + $0x8] sm:$0xff] %vm6188_vm14, %v10548_v7  ;;  %v9216_v59 = vld [vmem:[#allocation3 + $0x8c] ss:$0 sps:$4 sm:$0x11]  }
 0x254   : > { %6368 = vst.msk [vmem:[#allocation4 + $0x8] sm:$0xff] %vm6366_vm9, %v10496_v56  ;;  %v4042_v56 = vshrl.u32 %v8566_v32, 16  ;;  %v4292_v28 = vsel %vm10121_vm7, %v4057_v39, %v4291_v62  ;;  %v9211_v32 = vld [vmem:[#allocation3 + $0x80] ss:$0 sps:$4 sm:$0x11]   ;;  %v7020_v9 = vrot.slane %v9216_v59, 1 }
 0x255   : > { %6800 = vst.msk [vmem:[#allocation4] sm:$0xff] %vm6799_vm11, %v6752_v21  ;;  %6801 = vst.msk [vmem:[#allocation4 + $0x8] sm:$0xff] %vm6799_vm11, %v10557_v19  ;;  %v10587_v7 = vpop.permute.xlu1 %4955  ;;  %v9212_v21 = vld [vmem:[#allocation3 + $0x84] sm:$0xff]   ;;  %v5775_v39 = vshll.u32 %v9218_v12, 16  ;;  %v10677_v59 = vld [vmem:[%s11185_s2] ss:$0 sm:$0xff] }
 0x256   : > { %7090 = vst.msk [vmem:[#allocation4 + $0x8] sm:$0xff] %vm11193_vm6, %v10525_v36  ;;  %7089 = vst.msk [vmem:[#allocation4] sm:$0xff] %vm11193_vm6, %v10550_v11  ;;  %v10595_v19 = vpop.permute.xlu0 %5426  ;;  %v9207_v36 = vld [vmem:[#allocation3 + $0x80] ss:$0 sps:$4 sm:$0x11]   ;;  %v4044_v61 = vrot.slane %v4042_v56, 7 }
 0x257   : > { %v4069_v11 = vrot.slane %v4067_v43, 7  ;;  %v6663_v8 = vshll.u32 %v9207_v36, 16  ;;  %4293 = vst [vmem:[#allocation3 + $0x98] sm:$0x1] %v4292_v28  ;;  %5002 = vst.msk [vmem:[#allocation4 + $0x10] sm:$0xff] %vm4999_vm12, %v10587_v7  ;;  %vm11271_vm6 = vcmask 1046528  }
 0x258   : > { %v4047_v22 = vor.u32 %v4045_v41, %v4044_v61  ;;  %v4048_v10 = vrot.slane %v4044_v61, 4  ;;  %v6121_v40 = vsel %vm11271_vm6, %v6119_v25, %v6120_v31  ;;  %7107 = vst.msk [vmem:[#allocation4 + $0x8] sm:$0xff] %vm7105_vm15, %v9357_v53  ;;  %v7017_v56 = vrot.slane %v9211_v32, 1  ;;  %7106 = vst.msk [vmem:[#allocation4] sm:$0xff] %vm7105_vm15, %v9357_v53  ;;  %v9224_v31 = vld [vmem:[#allocation3 + $0x84] sm:$0xff]  }
 0x259   : > { %v10602_v2 = vpop.permute.xlu1 %6324  ;;  %v4072_v29 = vor.u32 %v4070_v46, %v4069_v11  ;;  %v4074_v45 = vrot.slane %v4069_v11, 4  ;;  %v6665_v16 = vrot.slane %v6663_v8, 1  ;;  %5291 = vst.msk [vmem:[#allocation4 + $0x10] sm:$0xff] %vm5288_vm13, %v10559_v20  ;;  %6158 = vrot.lane.b32.xlu1 %v6121_v40, %s9359_s27  ;;  %v9213_v7 = vld [vmem:[#allocation3 + $0x8c] ss:$0 sps:$4 sm:$0x11]  }
 0x25a   : > { %v6323_v14 = vpop.permute.xlu0 %6322  ;;  %v4288_v18 = vsel %vm10112_vm0, %v4047_v22, %v4287_v52  ;;  %v4056_v50 = vsel %vm10131_vm2, %v4048_v10, %v4055_v5  ;;  %v6670_v41 = vshll.u32 %v9212_v21, 16  ;;  %5469 = vst.msk [vmem:[#allocation4 + $0x10] sm:$0xff] %vm5466_vm4, %v10499_v63  ;;  %v4368_v46 = vld [vmem:[#allocation3 + $0x9c] sm:$0x1]  ;;  %v6675_v52 = vshll.u32 %v9213_v7, 16  ;;  %v9226_v7 = vld [vmem:[#allocation3 + $0x84] sm:$0xff]  }
 0x25b   : > { %v4073_v23 = vsel %vm10131_vm2, %v4065_v49, %v4072_v29  ;;  %v4299_v24 = vsel %vm10121_vm7, %v4074_v45, %v4298_v54  ;;  %4289 = vst [vmem:[#allocation3 + $0x90] sm:$0xf] %v4288_v18  ;;  %4290 = vst.msk [vmem:[#allocation3 + $0x94] sm:$0xf] %vm11269_vm10, %v4056_v50  ;;  %v4369_v48 = vsel %vm10121_vm7, 0, %v4368_v46  ;;  %v6668_v49 = vshrl.u32 %v9212_v21, 16 }
 0x25c   : > { %4297 = vst.msk [vmem:[#allocation3 + $0xa0] sm:$0xf] %vm11268_vm8, %v4073_v23  ;;  %4300 = vst [vmem:[#allocation3 + $0xa4] sm:$0x1] %v4299_v24  ;;  %vm11270_vm8 = vsmask.f32 7424  ;;  %v7018_v63 = vsel %vm11271_vm6, %v7016_v3, %v7017_v56 }
 0x25d   : > { %v5425_v27 = vpop.permute.xlu1 %5424  ;;  %v6666_v35 = vsel %vm11270_vm8, %v6661_v30, %v6665_v16  ;;  %5902 = vst.msk [vmem:[#allocation4 + $0x10] sm:$0xff] %vm5899_vm3, %v10566_v55  ;;  %v6672_v20 = vrot.slane %v6670_v41, 1  ;;  %4370 = vst [vmem:[#allocation3 + $0x9c] sm:$0x1] %v4369_v48  ;;  %v5770_v36 = vshll.u32 %v9217_v33, 16  ;;  %v6677_v62 = vrot.slane %v6675_v52, 1 }
 0x25e   : > { %5470 = vst.msk [vmem:[#allocation4 + $0x18] sm:$0xff] %vm5466_vm4, %v5425_v27  ;;  %v10623_v34 = vpop.permute.xlu0 %7046  ;;  %6767 = vrot.lane.b32.xlu0 %v6666_v35, %s9362_s13  ;;  %v4420_v6 = vld [vmem:[#allocation3 + $0x98] sm:$0x1]  ;;  %v7019_v8 = vrot.slane %v9215_v57, 1  ;;  %vm11272_vm10 = vmmov %vm11270_vm8  ;;  %v5777_v18 = vrot.slane %v5775_v39, 1  ;;  %v5222_v23 = vrot.slane %v9219_v15, 1 }
 0x25f   : > { %6191 = vst.msk [vmem:[#allocation4 + $0x10] sm:$0xff] %vm6188_vm14, %v10538_v58  ;;  %v6673_v11 = vor.u32 %v6672_v20, %v6668_v49  ;;  %v4421_v22 = vsel %vm10155_vm1, 0, %v4420_v6  ;;  %v5772_v29 = vrot.slane %v5770_v36, 1  ;;  %vm11273_vm8 = vmmov %vm11271_vm6  ;;  %v9220_v16 = vld [vmem:[#allocation3 + $0x80] ss:$0 sps:$4 sm:$0x11]  }
 0x260   : > { %6369 = vst.msk [vmem:[#allocation4 + $0x10] sm:$0xff] %vm6366_vm9, %v6323_v14  ;;  %4422 = vst [vmem:[#allocation3 + $0x98] sm:$0x1] %v4421_v22  ;;  %v7021_v45 = vsel %vm11273_vm8, %v7019_v8, %v7020_v9  ;;  %v5223_v24 = vrot.slane %v9220_v16, 1  ;;  %v4880_v21 = vshrl.u32 %v9221_v13, 16  ;;  %v4882_v27 = vshll.u32 %v9221_v13, 16 }
 0x261   : > { %v10637_v43 = vpop.permute.xlu1 %5250  ;;  %v6678_v10 = vsel %vm11272_vm10, %v6673_v11, %v6677_v62  ;;  %v5773_v5 = vor.u32 %v5772_v29, %v5768_v0  ;;  %v9222_v25 = vld [vmem:[#allocation3 + $0x80] ss:$0 sps:$4 sm:$0x11]   ;;  %vm11274_vm6 = vmmov %vm11272_vm10  ;;  %v9223_v33 = vld [vmem:[#allocation3 + $0x84] sm:$0xff]   ;;  %v4892_v3 = vshrl.u32 %v9224_v31, 16  ;;  %v4894_v56 = vshll.u32 %v9224_v31, 16 }
 0x262   : > { %v10645_v54 = vpop.permute.xlu0 %6148  ;;  %v4365_v55 = vld [vmem:[#allocation3 + $0x90] sm:$0x1]  ;;  %7056 = vrot.lane.b32.xlu0 %v7018_v63, %s9361_s7  ;;  %6769 = vrot.lane.b32.xlu1 %v6678_v10, %s9362_s13  ;;  %vm11275_vm10 = vmmov %vm11273_vm8  ;;  %v4887_v30 = vshll.u32 %v9222_v25, 16  ;;  %v4884_v32 = vrot.slane %v4882_v27, 1  ;;  %v5780_v63 = vshrl.u32 %v9226_v7, 16  ;;  %v5782_v57 = vshll.u32 %v9226_v7, 16 }
 0x263   : > { %v4423_v61 = vld [vmem:[#allocation3 + $0xa4] sm:$0x1]  ;;  %v4366_v58 = vsel %vm10121_vm7, 0, %v4365_v55  ;;  %v5778_v50 = vsel %vm11274_vm6, %v5773_v5, %v5777_v18  ;;  %v5224_v28 = vsel %vm11275_vm10, %v5222_v23, %v5223_v24  ;;  %v9225_v35 = vld [vmem:[#allocation3 + $0x8c] ss:$0 sps:$4 sm:$0x11]   ;;  %vm11276_vm8 = vmmov %vm11274_vm6 }
 0x264   : > { %v4424_v4 = vsel %vm10155_vm1, 0, %v4423_v61  ;;  %4367 = vst [vmem:[#allocation3 + $0x90] sm:$0x1] %v4366_v58  ;;  %v4889_v40 = vrot.slane %v4887_v30, 1  ;;  %v4885_v46 = vor.u32 %v4884_v32, %v4880_v21  ;;  %v4899_v48 = vshll.u32 %v9225_v35, 16  ;;  %v8704_v49 = vpop.f32.mrb[28].mxu0  ;;  %vm11277_vm10 = vmmov %vm11274_vm6 }
 0x265   : > { %v10650_v1 = vpop.permute.xlu1 %6146  ;;  %4425 = vst [vmem:[#allocation3 + $0xa4] sm:$0x1] %v4424_v4  ;;  %v4896_v20 = vrot.slane %v4894_v56, 1  ;;  %v9227_v52 = vld [vmem:[#allocation3 + $0x8c] ss:$0 sps:$4 sm:$0x11]   ;;  %v3522_v36 = vadd.f32 %v10677_v59, %v8704_v49 }
 0x266   : > { %v10661_v14 = vpop.permute.xlu0 %7044  ;;  %7058 = vrot.lane.b32.xlu0 %v7021_v45, %s9361_s7  ;;  %5869 = vrot.lane.b32.xlu1 %v5778_v50, %s9356_s8  ;;  %v4890_v55 = vsel %vm11276_vm8, %v4885_v46, %v4889_v40  ;;  %v4901_v61 = vrot.slane %v4899_v48, 1  ;;  %v3513_v11 = vpop.f32.mrb[29].mxu0  ;;  %v5784_v0 = vrot.slane %v5782_v57, 1  ;;  %v5787_v58 = vshll.u32 %v9227_v52, 16  ;;  %v9228_v4 = vld [vmem:[#allocation3 + $0x84] sm:$0xfe]  }
 0x267   : > { %v4897_v62 = vor.u32 %v4896_v20, %v4892_v3  ;;  %v3514_v6 = vadd.f32 %v10677_v59, %v3513_v11  ;;  %v9229_v9 = vld [vmem:[#allocation3 + $0x8c] ss:$0 sps:$4 sm:$0x11]   ;;  %v3574_v22 = vmax.f32 %v3522_v36, 0.0  ;;  %v5225_v45 = vrot.slane %v9228_v4, 1  ;;  %v8705_v24 = vpop.f32.mrb[30].mxu0 }
 0x268   : > { %v5785_v10 = vor.u32 %v5784_v0, %v5780_v63  ;;  %v5789_v29 = vrot.slane %v5787_v58, 1  ;;  %v5226_v5 = vrot.slane %v9229_v9, 1  ;;  %v9230_v18 = vld [vmem:[#allocation3 + $0x84] sm:$0xfe]   ;;  %vm11278_vm8 = vcmask 1046528   ;;  %v9234_v48 = vld [vmem:[#allocation3 + $0x3c] sm:$0xff]  }
 0x269   : > { %v10664_v17 = vpop.permute.xlu1 %6757  ;;  %v4902_v13 = vsel %vm11274_vm6, %v4897_v62, %v4901_v61  ;;  %v8572_v39 = vpack.c.bf16 %v3574_v22, %v3574_v22  ;;  %v3572_v15 = vmax.f32 %v3514_v6, 0.0  ;;  %v9231_v23 = vld [vmem:[#allocation3 + $0x8c] ss:$0 sps:$4 sm:$0x11]   ;;  %v6122_v30 = vrot.slane %v9230_v18, 1  ;;  %4572 = vst.msk [vmem:[#allocation4 + $0x28] sm:$0xff] %vm4566_vm5, %v9234_v48 }
 0x26a   : > { %v10668_v26 = vpop.permute.xlu0 %5248  ;;  %5260 = vrot.lane.b32.xlu0 %v5224_v28, %s9353_s30  ;;  %4971 = vrot.lane.b32.xlu1 %v4890_v55, %s9351_s28  ;;  %v5790_v16 = vsel %vm11277_vm10, %v5785_v10, %v5789_v29  ;;  %v5227_v21 = vsel %vm11278_vm8, %v5225_v45, %v5226_v5  ;;  %v6123_v31 = vrot.slane %v9231_v23, 1  ;;  %v3525_v32 = vadd.f32 %v10677_v59, %v8705_v24  ;;  %v4308_v35 = vld [vmem:[#allocation3 + $0xb4] sm:$0xf]  ;;  %v9236_v58 = vld [vmem:[#allocation3 + $0x98] ss:$0 sps:$4 sm:$0x11]  }
 0x26b   : > { %v4093_v27 = vshrl.u32 %v8572_v39, 16  ;;  %v8570_v50 = vpack.c.bf16 %v3572_v15, %v3572_v15  ;;  %v4096_v28 = vshll.u32 %v8572_v39, 16  ;;  %vm11279_vm6 = vcmask 589312   ;;  %v9233_v57 = vld [vmem:[#allocation3 + $0x90] sm:$0xff]  }
 0x26c   : > { %vm11280_vm10 = vmmov %vm11279_vm6  ;;  %v3575_v46 = vmax.f32 %v3525_v32, 0.0  ;;  %v9235_v36 = vld [vmem:[#allocation3 + $0x90] sm:$0xff]   ;;  %v6687_v5 = vshll.u32 %v9236_v58, 16  ;;  %v9238_v24 = vld [vmem:[#allocation3 + $0x98] ss:$0 sps:$4 sm:$0x11]  }
 0x26d   : > { %v10672_v41 = vpop.permute.xlu1 %4961  ;;  %v4076_v40 = vshrl.u32 %v8570_v50, 16  ;;  %v4079_v3 = vshll.u32 %v8570_v50, 16  ;;  %v6680_v22 = vshrl.u32 %v9235_v36, 16  ;;  %v6682_v10 = vshll.u32 %v9235_v36, 16  ;;  %v9237_v39 = vld [vmem:[#allocation3 + $0x90] sm:$0xff]  }
 0x26e   : > { %5438 = vrot.lane.b32.xlu0 %v9223_v33, %s9354_s6  ;;  %4973 = vrot.lane.b32.xlu1 %v4902_v13, %s9351_s28  ;;  %v3516_v33 = vpop.f32.mrb[31].mxu0  ;;  %v8573_v55 = vpack.c.bf16 %v3575_v46, %v3575_v46  ;;  %5005 = vst.msk [vmem:[#allocation4 + $0x28] sm:$0xff] %vm4999_vm12, %v10672_v41 }
 0x26f   : > { %v10684_v8 = vpop.permute.xlu0 %5859  ;;  %v3517_v56 = vadd.f32 %v10677_v59, %v3516_v33  ;;  %v4078_v52 = vrot.slane %v4076_v40, 7  ;;  %5294 = vst.msk [vmem:[#allocation4 + $0x28] sm:$0xff] %vm5288_vm13, %v10637_v43  ;;  %v6684_v18 = vrot.slane %v6682_v10, 1  ;;  %v6689_v43 = vrot.slane %v6687_v5, 1 }
 0x270   : > { %v4101_v6 = vshrl.u32 %v8573_v55, 16  ;;  %v4104_v9 = vshll.u32 %v8573_v55, 16  ;;  %v9241_v55 = vld [vmem:[#allocation3 + $0x90] sm:$0xfe]  }
 0x271   : > { %v5858_v12 = vpop.permute.xlu1 %5857  ;;  %v3573_v63 = vmax.f32 %v3517_v56, 0.0  ;;  %v4081_v11 = vor.u32 %v4079_v3, %v4078_v52  ;;  %v4082_v62 = vrot.slane %v4078_v52, 4 }
 0x272   : > { %5903 = vst.msk [vmem:[#allocation4 + $0x18] sm:$0xff] %vm5899_vm3, %v5858_v12  ;;  %5871 = vrot.lane.b32.xlu0 %v5790_v16, %s9356_s8  ;;  %5262 = vrot.lane.b32.xlu1 %v5227_v21, %s9353_s30  ;;  %v4312_v12 = vld [vmem:[#allocation3 + $0xbc] sm:$0x1]  ;;  %v4103_v15 = vrot.slane %v4101_v6, 7  ;;  %v4305_v16 = vld [vmem:[#allocation3 + $0xb0] sm:$0x1] }
 0x273   : > { %6192 = vst.msk [vmem:[#allocation4 + $0x18] sm:$0xff] %vm6188_vm14, %v10650_v1  ;;  %v6756_v25 = vpop.permute.xlu0 %6755  ;;  %v10702_v1 = vrot.slane %v4093_v27, 7  ;;  %v8571_v0 = vpack.c.bf16 %v3573_v63, %v3573_v63 }
 0x274   : > { %6370 = vst.msk [vmem:[#allocation4 + $0x18] sm:$0xff] %vm6366_vm9, %v10602_v2  ;;  %v9232_v2 = vld [vmem:[#allocation3 + $0x90] sm:$0xff]   ;;  %v4106_v27 = vor.u32 %v4104_v9, %v4103_v15  ;;  %v4108_v50 = vrot.slane %v4103_v15, 4 }
 0x275   : > { %6802 = vst.msk [vmem:[#allocation4 + $0x10] sm:$0xff] %vm6799_vm11, %v6756_v25  ;;  %6803 = vst.msk [vmem:[#allocation4 + $0x18] sm:$0xff] %vm6799_vm11, %v10664_v17  ;;  %v10709_v7 = vpop.permute.xlu1 %4959  ;;  %v4301_v17 = vld [vmem:[#allocation3 + $0xa8] sm:$0xf]  ;;  %v4098_v20 = vor.u32 %v4096_v28, %v10702_v1  ;;  %v4084_v41 = vshrl.u32 %v8571_v0, 16  ;;  %v4087_v13 = vshll.u32 %v8571_v0, 16  ;;  %v6685_v28 = vor.u32 %v6684_v18, %v6680_v22 }
 0x276   : > { %7091 = vst.msk [vmem:[#allocation4 + $0x10] sm:$0xff] %vm11279_vm6, %v10661_v14  ;;  %v6124_v14 = vsel %vm11278_vm8, %v6122_v30, %v6123_v31  ;;  %5440 = vrot.lane.b32.xlu1 %v9232_v2, %s9354_s6  ;;  %v4302_v45 = vsel %vm10112_vm0, %v4081_v11, %v4301_v17  ;;  %v5792_v25 = vshrl.u32 %v9237_v39, 16  ;;  %v5794_v30 = vshll.u32 %v9237_v39, 16  ;;  %v9240_v17 = vld [vmem:[#allocation3 + $0x98] ss:$0 sps:$4 sm:$0x11]  }
 0x277   : > { %7092 = vst.msk [vmem:[#allocation4 + $0x18] sm:$0xff] %vm11280_vm10, %v10623_v34  ;;  %v10715_v49 = vpop.permute.xlu0 %5430  ;;  %v4099_v34 = vrot.slane %v10702_v1, 4  ;;  %6160 = vrot.lane.b32.xlu0 %v6124_v14, %s9359_s27  ;;  %v4309_v61 = vsel %vm10112_vm0, %v4098_v20, %v4308_v35  ;;  %4303 = vst [vmem:[#allocation3 + $0xa8] sm:$0xf] %v4302_v45  ;;  %v4086_v23 = vrot.slane %v4084_v41, 7  ;;  %v5799_v1 = vshll.u32 %v9238_v24, 16 }
 0x278   : > { %7108 = vst.msk [vmem:[#allocation4 + $0x10] sm:$0xff] %vm7105_vm15, %v9357_v53  ;;  %7109 = vst.msk [vmem:[#allocation4 + $0x18] sm:$0xff] %vm7105_vm15, %v9357_v53  ;;  %v9239_v35 = vld [vmem:[#allocation3 + $0x90] sm:$0xfe]   ;;  %v4313_v3 = vsel %vm10121_vm7, %v4108_v50, %v4312_v12  ;;  %vm11281_vm6 = vsmask.f32 7424 }
 0x279   : > { %v10725_v4 = vpop.permute.xlu1 %6328  ;;  %4310 = vst [vmem:[#allocation3 + $0xb4] sm:$0xf] %v4309_v61  ;;  %v4089_v32 = vor.u32 %v4087_v13, %v4086_v23  ;;  %v4091_v33 = vrot.slane %v4086_v23, 4  ;;  %v4107_v40 = vsel %vm10131_vm2, %v4099_v34, %v4106_v27  ;;  %v6690_v2 = vsel %vm11281_vm6, %v6685_v28, %v6689_v43  ;;  %4314 = vst [vmem:[#allocation3 + $0xbc] sm:$0x1] %v4313_v3  ;;  %v9243_v0 = vld [vmem:[#allocation3 + $0x30] sm:$0xff]  }
 0x27a   : > { %v5796_v56 = vrot.slane %v5794_v30, 1  ;;  %vm11282_vm10 = vcmask 60416   ;;  %v5801_v20 = vrot.slane %v5799_v1, 1  ;;  %v7022_v34 = vrot.slane %v9239_v35, 1  ;;  %4571 = vst.msk [vmem:[#allocation4 + $0x20] sm:$0xff] %vm4566_vm5, %v9243_v0  ;;  %v9249_v13 = vld [vmem:[#allocation3 + $0x9c] sm:$0xff]  }
 0x27b   : > { %v10730_v29 = vpop.permute.xlu0 %6326  ;;  %6338 = vrot.lane.b32.xlu0 %v9233_v57, %s9360_s29  ;;  %4311 = vst.msk [vmem:[#allocation3 + $0xb8] sm:$0xf] %vm11282_vm10, %v4107_v40  ;;  %v4090_v46 = vsel %vm10131_vm2, %v4082_v62, %v4089_v32  ;;  %v4306_v48 = vsel %vm10121_vm7, %v4091_v33, %v4305_v16  ;;  %vm11283_vm8 = vmmov %vm11282_vm10  ;;  %v7023_v36 = vrot.slane %v9240_v17, 1  ;;  %v9242_v62 = vld [vmem:[#allocation3 + $0x98] ss:$0 sps:$4 sm:$0x11]  }
 0x27c   : > { %4304 = vst.msk [vmem:[#allocation3 + $0xac] sm:$0xf] %vm11283_vm8, %v4090_v46  ;;  %4307 = vst [vmem:[#allocation3 + $0xb0] sm:$0x1] %v4306_v48  ;;  %v5797_v57 = vor.u32 %v5796_v56, %v5792_v25  ;;  %vm11284_vm10 = vcmask 1046528   ;;  %v6125_v22 = vrot.slane %v9241_v55, 1 }
 0x27d   : > { %v5429_v21 = vpop.permute.xlu1 %5428  ;;  %v7024_v9 = vsel %vm11284_vm10, %v7022_v34, %v7023_v36  ;;  %v6126_v10 = vrot.slane %v9242_v62, 1  ;;  %5004 = vst.msk [vmem:[#allocation4 + $0x20] sm:$0xff] %vm4999_vm12, %v10709_v7  ;;  %v9244_v12 = vld [vmem:[#allocation3 + $0x9c] sm:$0xfe]   ;;  %vm11285_vm8 = vmmov %vm11284_vm10  ;;  %v6694_v28 = vshll.u32 %v9249_v13, 16  ;;  %v6692_v30 = vshrl.u32 %v9249_v13, 16 }
 0x27e   : > { %5472 = vst.msk [vmem:[#allocation4 + $0x28] sm:$0xff] %vm5466_vm4, %v5429_v21  ;;  %v4371_v11 = vld [vmem:[#allocation3 + $0xa8] sm:$0x1]  ;;  %v5802_v6 = vsel %vm11281_vm6, %v5797_v57, %v5801_v20  ;;  %v9245_v41 = vld [vmem:[#allocation3 + $0xa4] ss:$0 sps:$4 sm:$0x11]   ;;  %vm11286_vm6 = vmmov %vm11285_vm8 }
 0x27f   : > { %v10736_v31 = vpop.permute.xlu0 %7050  ;;  %6771 = vrot.lane.b32.xlu0 %v6690_v2, %s9362_s13  ;;  %v4372_v58 = vsel %vm10121_vm7, 0, %v4371_v11  ;;  %5873 = vrot.lane.b32.xlu1 %v5802_v6, %s9356_s8  ;;  %5293 = vst.msk [vmem:[#allocation4 + $0x20] sm:$0xff] %vm5288_vm13, %v10668_v26  ;;  %v6127_v15 = vsel %vm11285_vm8, %v6125_v22, %v6126_v10  ;;  %v7025_v16 = vrot.slane %v9244_v12, 1  ;;  %v7026_v18 = vrot.slane %v9245_v41, 1  ;;  %v9246_v26 = vld [vmem:[#allocation3 + $0x9c] sm:$0xff]   ;;  %vm11287_vm10 = vmmov %vm11286_vm6  ;;  %v9252_v40 = vld [vmem:[#allocation3 + $0x90] sm:$0xff]  }
 0x280   : > { %v4374_v14 = vld [vmem:[#allocation3 + $0xb4] sm:$0x1]  ;;  %4373 = vst [vmem:[#allocation3 + $0xa8] sm:$0x1] %v4372_v58  ;;  %v4429_v39 = vld [vmem:[#allocation3 + $0xbc] sm:$0x1] }
 0x281   : > { %v10749_v52 = vpop.permute.xlu1 %5254  ;;  %v4375_v63 = vsel %vm10121_vm7, 0, %v4374_v14  ;;  %5471 = vst.msk [vmem:[#allocation4 + $0x20] sm:$0xff] %vm5466_vm4, %v10595_v19  ;;  %v4430_v23 = vsel %vm10155_vm1, 0, %v4429_v39  ;;  %v7027_v24 = vsel %vm11286_vm6, %v7025_v16, %v7026_v18  ;;  %v9247_v19 = vld [vmem:[#allocation3 + $0x90] sm:$0xfe]   ;;  %v6696_v1 = vrot.slane %v6694_v28, 1 }
 0x282   : > { %4376 = vst [vmem:[#allocation3 + $0xb4] sm:$0x1] %v4375_v63  ;;  %5904 = vst.msk [vmem:[#allocation4 + $0x20] sm:$0xff] %vm5899_vm3, %v10684_v8  ;;  %v9248_v25 = vld [vmem:[#allocation3 + $0x98] ss:$0 sps:$4 sm:$0x11]  }
 0x283   : > { %v10754_v61 = vpop.permute.xlu0 %6152  ;;  %7060 = vrot.lane.b32.xlu0 %v7024_v9, %s9361_s7  ;;  %v4426_v7 = vld [vmem:[#allocation3 + $0xb0] sm:$0x1]  ;;  %6162 = vrot.lane.b32.xlu1 %v6127_v15, %s9359_s27  ;;  %4431 = vst [vmem:[#allocation3 + $0xbc] sm:$0x1] %v4430_v23  ;;  %6193 = vst.msk [vmem:[#allocation4 + $0x20] sm:$0xff] %vm6188_vm14, %v10645_v54  ;;  %v5228_v8 = vrot.slane %v9247_v19, 1  ;;  %v6697_v3 = vor.u32 %v6696_v1, %v6692_v30 }
 0x284   : > { %v4427_v43 = vsel %vm10155_vm1, 0, %v4426_v7  ;;  %6371 = vst.msk [vmem:[#allocation4 + $0x20] sm:$0xff] %vm6366_vm9, %v10730_v29  ;;  %v5229_v27 = vrot.slane %v9248_v25, 1  ;;  %v9250_v50 = vld [vmem:[#allocation3 + $0xa4] ss:$0 sps:$4 sm:$0x11]  }
 0x285   : > { %4428 = vst [vmem:[#allocation3 + $0xb0] sm:$0x1] %v4427_v43  ;;  %v8708_v32 = vpop.f32.mrb[32].mxu0  ;;  %v6699_v35 = vshll.u32 %v9250_v50, 16  ;;  %v9254_v56 = vld [vmem:[#allocation3 + $0x9c] sm:$0xff]   ;;  %v4906_v14 = vshll.u32 %v9252_v40, 16 }
 0x286   : > { %v10763_v45 = vpop.permute.xlu1 %6150  ;;  %v5230_v54 = vsel %vm11287_vm10, %v5228_v8, %v5229_v27  ;;  %v9253_v29 = vld [vmem:[#allocation3 + $0x98] ss:$0 sps:$4 sm:$0x11]   ;;  %v9251_v17 = vld [vmem:[#allocation3 + $0x9c] sm:$0xff]   ;;  %vm11288_vm8 = vsmask.f32 7424 }
 0x287   : > { %v10769_v5 = vpop.permute.xlu0 %7048  ;;  %7062 = vrot.lane.b32.xlu0 %v7027_v24, %s9361_s7  ;;  %6340 = vrot.lane.b32.xlu1 %v9246_v26, %s9360_s29  ;;  %v6701_v2 = vrot.slane %v6699_v35, 1  ;;  %v4911_v46 = vshll.u32 %v9253_v29, 16  ;;  %v9256_v48 = vld [vmem:[#allocation3 + $0x9c] sm:$0xff]   ;;  %v4904_v63 = vshrl.u32 %v9252_v40, 16  ;;  %v5806_v36 = vshll.u32 %v9254_v56, 16  ;;  %v3529_v55 = vpop.f32.mrb[33].mxu0  ;;  %vm11289_vm6 = vmmov %vm11288_vm8 }
 0x288   : > { %v9255_v57 = vld [vmem:[#allocation3 + $0xa4] ss:$0 sps:$4 sm:$0x11]   ;;  %v4908_v11 = vrot.slane %v4906_v14, 1  ;;  %v3530_v0 = vadd.f32 %v10677_v59, %v3529_v55  ;;  %v5804_v6 = vshrl.u32 %v9254_v56, 16  ;;  %v4918_v10 = vshll.u32 %v9256_v48, 16  ;;  %vm11290_vm10 = vmmov %vm11289_vm6 }
 0x289   : > { %v6702_v34 = vsel %vm11288_vm8, %v6697_v3, %v6701_v2  ;;  %v4913_v62 = vrot.slane %v4911_v46, 1  ;;  %v5808_v9 = vrot.slane %v5806_v36, 1  ;;  %v5811_v22 = vshll.u32 %v9255_v57, 16  ;;  %v9257_v41 = vld [vmem:[#allocation3 + $0xa4] ss:$0 sps:$4 sm:$0x11]  }
 0x28a   : > { %v4909_v12 = vor.u32 %v4908_v11, %v4904_v63  ;;  %v3576_v13 = vmax.f32 %v3530_v0, 0.0  ;;  %v4916_v16 = vshrl.u32 %v9256_v48, 16  ;;  %v4920_v18 = vrot.slane %v4918_v10, 1  ;;  %v8709_v23 = vpop.f32.mrb[34].mxu0  ;;  %v9258_v50 = vld [vmem:[#allocation3 + $0x9c] sm:$0xfe]  }
 0x28b   : > { %v10787_v21 = vpop.permute.xlu1 %6761  ;;  %5264 = vrot.lane.b32.xlu0 %v5230_v54, %s9353_s30  ;;  %6773 = vrot.lane.b32.xlu1 %v6702_v34, %s9362_s13  ;;  %v5809_v39 = vor.u32 %v5808_v9, %v5804_v6  ;;  %v5813_v15 = vrot.slane %v5811_v22, 1  ;;  %v4923_v43 = vshll.u32 %v9257_v41, 16  ;;  %v3532_v19 = vpop.f32.mrb[35].mxu0  ;;  %v9259_v1 = vld [vmem:[#allocation3 + $0xa4] ss:$0 sps:$4 sm:$0x11]  }
 0x28c   : > { %v10790_v33 = vpop.permute.xlu0 %5252  ;;  %v4914_v26 = vsel %vm11289_vm6, %v4909_v12, %v4913_v62  ;;  %v8574_v24 = vpack.c.bf16 %v3576_v13, %v3576_v13  ;;  %v4921_v8 = vor.u32 %v4920_v18, %v4916_v16  ;;  %v3533_v27 = vadd.f32 %v10677_v59, %v3532_v19  ;;  %v4315_v35 = vld [vmem:[#allocation3 + $0xc0] sm:$0xf]  ;;  %v9262_v57 = vld [vmem:[#allocation3 + $0xa8] sm:$0xff]   ;;  %v9264_v36 = vld [vmem:[#allocation3 + $0x54] sm:$0xff]  }
 0x28d   : > { %v5814_v25 = vsel %vm11290_vm10, %v5809_v39, %v5813_v15  ;;  %v4925_v30 = vrot.slane %v4923_v43, 1  ;;  %v6128_v29 = vrot.slane %v9258_v50, 1  ;;  %vm11291_vm8 = vcmask 589312   ;;  %v9260_v56 = vld [vmem:[#allocation3 + $0x9c] sm:$0xfe]   ;;  %4574 = vst.msk [vmem:[#allocation4 + $0x38] sm:$0xff] %vm4566_vm5, %v9264_v36 }
 0x28e   : > { %v4110_v32 = vshrl.u32 %v8574_v24, 16  ;;  %v4113_v54 = vshll.u32 %v8574_v24, 16  ;;  %v3577_v40 = vmax.f32 %v3533_v27, 0.0  ;;  %v6129_v2 = vrot.slane %v9259_v1, 1  ;;  %vm11292_vm10 = vmmov %vm11291_vm8  ;;  %v4319_v62 = vld [vmem:[#allocation3 + $0xc8] sm:$0x1] }
 0x28f   : > { %v10794_v20 = vpop.permute.xlu1 %4965  ;;  %5442 = vrot.lane.b32.xlu0 %v9251_v17, %s9354_s6  ;;  %4975 = vrot.lane.b32.xlu1 %v4914_v26, %s9351_s28  ;;  %v9261_v17 = vld [vmem:[#allocation3 + $0xa4] ss:$0 sps:$4 sm:$0x11]   ;;  %v5231_v48 = vrot.slane %v9260_v56, 1  ;;  %v9265_v9 = vld [vmem:[#allocation3 + $0xa8] sm:$0xff]   ;;  %v9279_v47 = vld [vmem:[#allocation3 + $0xb4] sm:$0xff]  }
 0x290   : > { %v4112_v3 = vrot.slane %v4110_v32, 7  ;;  %5007 = vst.msk [vmem:[#allocation4 + $0x38] sm:$0xff] %vm4999_vm12, %v10794_v20  ;;  %v9266_v10 = vld [vmem:[#allocation3 + $0xb0] ss:$0 sps:$4 sm:$0x11]   ;;  %v9267_v12 = vld [vmem:[#allocation3 + $0xa8] sm:$0xff]  }
 0x291   : > { %v10800_v58 = vpop.permute.xlu0 %5863  ;;  %v9263_v39 = vld [vmem:[#allocation3 + $0xa8] sm:$0xff]   ;;  %5296 = vst.msk [vmem:[#allocation4 + $0x38] sm:$0xff] %vm5288_vm13, %v10749_v52  ;;  %v6706_v15 = vshll.u32 %v9265_v9, 16  ;;  %v6704_v23 = vshrl.u32 %v9265_v9, 16  ;;  %v5818_v43 = vshll.u32 %v9267_v12, 16 }
 0x292   : > { %v4116_v14 = vrot.slane %v4112_v3, 4  ;;  %v9273_v16 = vld [vmem:[#allocation3 + $0x48] sm:$0xff]   ;;  %v9268_v26 = vld [vmem:[#allocation3 + $0xb0] ss:$0 sps:$4 sm:$0x11]  }
 0x293   : > { %5875 = vrot.lane.b32.xlu0 %v5814_v25, %s9356_s8  ;;  %v6708_v19 = vrot.slane %v6706_v15, 1  ;;  %v5816_v25 = vshrl.u32 %v9267_v12, 16  ;;  %4573 = vst.msk [vmem:[#allocation4 + $0x30] sm:$0xff] %vm4566_vm5, %v9273_v16  ;;  %v5820_v27 = vrot.slane %v5818_v43, 1  ;;  %v5823_v50 = vshll.u32 %v9268_v26, 16 }
 0x294   : > { %v5862_v7 = vpop.permute.xlu1 %5861  ;;  %v9270_v32 = vld [vmem:[#allocation3 + $0xb0] ss:$0 sps:$4 sm:$0x11]   ;;  %v9277_v9 = vld [vmem:[#allocation3 + $0xa8] sm:$0xfe]  }
 0x295   : > { %5905 = vst.msk [vmem:[#allocation4 + $0x28] sm:$0xff] %vm5899_vm3, %v5862_v7  ;;  %v6711_v7 = vshll.u32 %v9266_v10, 16  ;;  %v9280_v15 = vld [vmem:[#allocation3 + $0xbc] ss:$0 sps:$4 sm:$0x11]  }
 0x296   : > { %6194 = vst.msk [vmem:[#allocation4 + $0x28] sm:$0xff] %vm6188_vm14, %v10763_v45  ;;  %v6760_v28 = vpop.permute.xlu0 %6759  ;;  %v4926_v45 = vsel %vm11289_vm6, %v4921_v8, %v4925_v30  ;;  %v9269_v30 = vld [vmem:[#allocation3 + $0xa8] sm:$0xfe]  }
 0x297   : > { %6372 = vst.msk [vmem:[#allocation4 + $0x28] sm:$0xff] %vm6366_vm9, %v10725_v4  ;;  %4977 = vrot.lane.b32.xlu1 %v4926_v45, %s9351_s28  ;;  %v8575_v4 = vpack.c.bf16 %v3577_v40, %v3577_v40  ;;  %v6713_v8 = vrot.slane %v6711_v7, 1  ;;  %v5825_v40 = vrot.slane %v5823_v50, 1  ;;  %v9284_v7 = vld [vmem:[#allocation3 + $0xb4] sm:$0xff]  }
 0x298   : > { %6804 = vst.msk [vmem:[#allocation4 + $0x20] sm:$0xff] %vm6799_vm11, %v6760_v28  ;;  %6805 = vst.msk [vmem:[#allocation4 + $0x28] sm:$0xff] %vm6799_vm11, %v10787_v21  ;;  %v4964_v59 = vpop.permute.xlu1 %4963  ;;  %v4115_v21 = vor.u32 %v4113_v54, %v4112_v3  ;;  %v6709_v28 = vor.u32 %v6708_v19, %v6704_v23  ;;  %v7028_v3 = vrot.slane %v9269_v30, 1  ;;  %v6723_v23 = vshll.u32 %v9280_v15, 16 }
 0x299   : > { %7093 = vst.msk [vmem:[#allocation4 + $0x20] sm:$0xff] %vm11291_vm8, %v10769_v5  ;;  %vm11293_vm8 = vcmask 1046528   ;;  %v4118_v34 = vshrl.u32 %v8575_v4, 16  ;;  %v4121_v63 = vshll.u32 %v8575_v4, 16  ;;  %v9271_v4 = vld [vmem:[#allocation3 + $0xa8] sm:$0xfe]  }
 0x29a   : > { %7094 = vst.msk [vmem:[#allocation4 + $0x28] sm:$0xff] %vm11292_vm10, %v10736_v31  ;;  %v10825_v5 = vpop.permute.xlu0 %5434  ;;  %v6130_v46 = vsel %vm11293_vm8, %v6128_v29, %v6129_v2  ;;  %v5232_v31 = vrot.slane %v9261_v17, 1  ;;  %v4316_v11 = vsel %vm10112_vm0, %v4115_v21, %v4315_v35  ;;  %vm11294_vm6 = vmmov %vm11293_vm8  ;;  %vm11295_vm10 = vcmask 60416   ;;  %v9285_v50 = vld [vmem:[#allocation3 + $0xbc] ss:$0 sps:$4 sm:$0x11]  }
 0x29b   : > { %7110 = vst.msk [vmem:[#allocation4 + $0x20] sm:$0xff] %vm7105_vm15, %v9357_v53  ;;  %7111 = vst.msk [vmem:[#allocation4 + $0x28] sm:$0xff] %vm7105_vm15, %v9357_v53  ;;  %6164 = vrot.lane.b32.xlu0 %v6130_v46, %s9359_s27  ;;  %v4120_v0 = vrot.slane %v4118_v34, 7  ;;  %v5821_v35 = vor.u32 %v5820_v27, %v5816_v25  ;;  %v6716_v29 = vshrl.u32 %v9279_v47, 16  ;;  %v7029_v2 = vrot.slane %v9270_v32, 1  ;;  %v9281_v25 = vld [vmem:[#allocation3 + $0xb4] sm:$0xff]  }
 0x29c   : > { %v10829_v55 = vpop.permute.xlu1 %6332  ;;  %4317 = vst [vmem:[#allocation3 + $0xc0] sm:$0xf] %v4316_v11  ;;  %v5233_v6 = vsel %vm11294_vm6, %v5231_v48, %v5232_v31  ;;  %5006 = vst.msk [vmem:[#allocation4 + $0x30] sm:$0xff] %vm4999_vm12, %v4964_v59  ;;  %v6718_v17 = vshll.u32 %v9279_v47, 16  ;;  %v6131_v21 = vrot.slane %v9271_v4, 1  ;;  %v6725_v19 = vrot.slane %v6723_v23, 1 }
 0x29d   : > { %5266 = vrot.lane.b32.xlu1 %v5233_v6, %s9353_s30  ;;  %v4123_v41 = vor.u32 %v4121_v63, %v4120_v0  ;;  %v4125_v13 = vrot.slane %v4120_v0, 4  ;;  %5295 = vst.msk [vmem:[#allocation4 + $0x30] sm:$0xff] %vm5288_vm13, %v10790_v33  ;;  %v7030_v48 = vsel %vm11294_vm6, %v7028_v3, %v7029_v2  ;;  %v9276_v6 = vld [vmem:[#allocation3 + $0xb4] sm:$0xff]   ;;  %v5828_v47 = vshrl.u32 %v9284_v7, 16 }
 0x29e   : > { %v6331_v22 = vpop.permute.xlu0 %6330  ;;  %5473 = vst.msk [vmem:[#allocation4 + $0x30] sm:$0xff] %vm5466_vm4, %v10715_v49  ;;  %v9272_v49 = vld [vmem:[#allocation3 + $0xb0] ss:$0 sps:$4 sm:$0x11]   ;;  %v6720_v63 = vrot.slane %v6718_v17, 1 }
 0x29f   : > { %6342 = vrot.lane.b32.xlu0 %v9262_v57, %s9360_s29  ;;  %v4124_v20 = vsel %vm10131_vm2, %v4116_v14, %v4123_v41  ;;  %v4320_v24 = vsel %vm10121_vm7, %v4125_v13, %v4319_v62  ;;  %vm11296_vm2 = vsmask.f32 7424  ;;  %5906 = vst.msk [vmem:[#allocation4 + $0x30] sm:$0xff] %vm5899_vm3, %v10800_v58  ;;  %v9282_v14 = vld [vmem:[#allocation3 + $0xa8] sm:$0xff]   ;;  %v6132_v34 = vrot.slane %v9272_v49, 1 }
 0x2a0   : > { %v5433_v18 = vpop.permute.xlu1 %5432  ;;  %4318 = vst.msk [vmem:[#allocation3 + $0xc4] sm:$0xf] %vm11295_vm10, %v4124_v20  ;;  %4321 = vst [vmem:[#allocation3 + $0xc8] sm:$0x1] %v4320_v24  ;;  %v6714_v59 = vsel %vm11296_vm2, %v6709_v28, %v6713_v8  ;;  %v4930_v10 = vshll.u32 %v9282_v14, 16  ;;  %v5234_v13 = vrot.slane %v9277_v9, 1 }
 0x2a1   : > { %5474 = vst.msk [vmem:[#allocation4 + $0x38] sm:$0xff] %vm5466_vm4, %v5433_v18  ;;  %5444 = vrot.lane.b32.xlu1 %v9263_v39, %s9354_s6  ;;  %vm11297_vm8 = vmmov %vm11296_vm2  ;;  %v9275_v57 = vld [vmem:[#allocation3 + $0xbc] ss:$0 sps:$4 sm:$0x11]   ;;  %v6721_v18 = vor.u32 %v6720_v63, %v6716_v29  ;;  %v4928_v24 = vshrl.u32 %v9282_v14, 16  ;;  %v9286_v8 = vld [vmem:[#allocation3 + $0xb4] sm:$0xff]  }
 0x2a2   : > { %v10847_v52 = vpop.permute.xlu0 %7054  ;;  %v5826_v56 = vsel %vm11297_vm8, %v5821_v35, %v5825_v40  ;;  %6195 = vst.msk [vmem:[#allocation4 + $0x30] sm:$0xff] %vm6188_vm14, %v10754_v61  ;;  %v9274_v61 = vld [vmem:[#allocation3 + $0xb4] sm:$0xfe]   ;;  %vm11298_vm10 = vmmov %vm11294_vm6  ;;  %v7032_v0 = vrot.slane %v9275_v57, 1  ;;  %v4932_v16 = vrot.slane %v4930_v10, 1  ;;  %v5830_v28 = vshll.u32 %v9284_v7, 16 }
 0x2a3   : > { %v4377_v1 = vld [vmem:[#allocation3 + $0xc0] sm:$0x1]  ;;  %6775 = vrot.lane.b32.xlu0 %v6714_v59, %s9362_s13  ;;  %6373 = vst.msk [vmem:[#allocation4 + $0x30] sm:$0xff] %vm6366_vm9, %v6331_v22  ;;  %v6133_v36 = vsel %vm11298_vm10, %v6131_v21, %v6132_v34  ;;  %v7031_v62 = vrot.slane %v9274_v61, 1  ;;  %vm11299_vm2 = vmmov %vm11294_vm6  ;;  %vm11301_vm6 = vsmask.f32 7424 }
 0x2a4   : > { %v10854_v54 = vpop.permute.xlu1 %5258  ;;  %v4378_v45 = vsel %vm10121_vm7, 0, %v4377_v1  ;;  %v9278_v22 = vld [vmem:[#allocation3 + $0xb0] ss:$0 sps:$4 sm:$0x11]   ;;  %vm11300_vm8 = vmmov %vm11299_vm2  ;;  %v6726_v32 = vsel %vm11301_vm6, %v6721_v18, %v6725_v19  ;;  %v4933_v1 = vor.u32 %v4932_v16, %v4928_v24  ;;  %v5832_v40 = vrot.slane %v5830_v28, 1  ;;  %v9303_v19 = vld [vmem:[#allocation3 + $0x60] sm:$0xff]  }
 0x2a5   : > { %4379 = vst [vmem:[#allocation3 + $0xc0] sm:$0x1] %v4378_v45  ;;  %5877 = vrot.lane.b32.xlu1 %v5826_v56, %s9356_s8  ;;  %v7033_v12 = vsel %vm11299_vm2, %v7031_v62, %v7032_v0  ;;  %v5235_v39 = vrot.slane %v9278_v22, 1  ;;  %v9283_v20 = vld [vmem:[#allocation3 + $0xb0] ss:$0 sps:$4 sm:$0x11]   ;;  %vm11302_vm10 = vmmov %vm11301_vm6 }
 0x2a6   : > { %v10863_v33 = vpop.permute.xlu0 %6156  ;;  %v4935_v27 = vshll.u32 %v9283_v20, 16  ;;  %v5835_v29 = vshll.u32 %v9285_v50, 16  ;;  %v9287_v45 = vld [vmem:[#allocation3 + $0xbc] ss:$0 sps:$4 sm:$0x11]   ;;  %v4940_v59 = vshrl.u32 %v9286_v8, 16  ;;  %v5833_v56 = vor.u32 %v5832_v40, %v5828_v47  ;;  %vm11303_vm2 = vmmov %vm11301_vm6 }
 0x2a7   : > { %v4432_v46 = vld [vmem:[#allocation3 + $0xc8] sm:$0x1]  ;;  %7064 = vrot.lane.b32.xlu0 %v7030_v48, %s9361_s7  ;;  %v5236_v43 = vsel %vm11300_vm8, %v5234_v13, %v5235_v39  ;;  %v4942_v3 = vshll.u32 %v9286_v8, 16  ;;  %v4947_v49 = vshll.u32 %v9287_v45, 16  ;;  %v9288_v17 = vld [vmem:[#allocation3 + $0xb4] sm:$0xfe]   ;;  %vm11304_vm8 = vmmov %vm11303_vm2 }
 0x2a8   : > { %v10871_v58 = vpop.permute.xlu1 %6154  ;;  %v4433_v31 = vsel %vm10155_vm1, 0, %v4432_v46  ;;  %v4937_v35 = vrot.slane %v4935_v27, 1  ;;  %v5837_v4 = vrot.slane %v5835_v29, 1  ;;  %v9289_v46 = vld [vmem:[#allocation3 + $0xbc] ss:$0 sps:$4 sm:$0x11]  }
 0x2a9   : > { %4434 = vst [vmem:[#allocation3 + $0xc8] sm:$0x1] %v4433_v31  ;;  %6166 = vrot.lane.b32.xlu1 %v6133_v36, %s9359_s27  ;;  %v4944_v14 = vrot.slane %v4942_v3, 1  ;;  %v4949_v34 = vrot.slane %v4947_v49, 1  ;;  %v6134_v63 = vrot.slane %v9288_v17, 1  ;;  %v6135_v57 = vrot.slane %v9289_v46, 1 }
 0x2aa   : > { %v10878_v11 = vpop.permute.xlu0 %7052  ;;  %v4938_v21 = vsel %vm11302_vm10, %v4933_v1, %v4937_v35  ;;  %v5838_v48 = vsel %vm11303_vm2, %v5833_v56, %v5837_v4  ;;  %v9290_v36 = vld [vmem:[#allocation3 + $0xb4] sm:$0xfe]   ;;  %v9291_v62 = vld [vmem:[#allocation3 + $0xbc] ss:$0 sps:$4 sm:$0x11]   ;;  %v9294_v22 = vld [vmem:[#allocation3 + $0x6c] sm:$0xff]  }
 0x2ab   : > { %7066 = vrot.lane.b32.xlu0 %v7033_v12, %s9361_s7  ;;  %v4945_v61 = vor.u32 %v4944_v14, %v4940_v59  ;;  %v5238_v9 = vrot.slane %v9291_v62, 1  ;;  %vm11305_vm6 = vcmask 589312   ;;  %vm11306_vm10 = vcmask 1046528   ;;  %4576 = vst.msk [vmem:[#allocation4 + $0x48] sm:$0xff] %vm4566_vm5, %v9294_v22  ;;  %v9299_v47 = vld [vmem:[#allocation3 + $0xc0] sm:$0xfe]  }
 0x2ac   : > { %v6136_v10 = vsel %vm11306_vm10, %v6134_v63, %v6135_v57  ;;  %v5237_v12 = vrot.slane %v9290_v36, 1  ;;  %v9292_v13 = vld [vmem:[#allocation3 + $0xc0] sm:$0xff]   ;;  %vm11307_vm2 = vmmov %vm11305_vm6  ;;  %4575 = vst.msk [vmem:[#allocation4 + $0x40] sm:$0xff] %vm4566_vm5, %v9303_v19  ;;  %v9311_v29 = vld [vmem:[%s11186_s3] sm:$0xff]   ;;  %v7034_v17 = vrot.slane %v9299_v47, 1 }
 0x2ad   : > { %6344 = vrot.lane.b32.xlu1 %v9276_v6, %s9360_s29  ;;  %v4950_v6 = vsel %vm11304_vm8, %v4945_v61, %v4949_v34  ;;  %v9297_v39 = vld [vmem:[#allocation3 + $0xc0] sm:$0xff]   ;;  %vm11308_vm8 = vmmov %vm11306_vm10  ;;  %8710 = vmatprep.subr.bf16.mxu1 %v9311_v29  ;;  %v9312_v4 = vld [vmem:[%s11186_s3 + $0x8] sm:$0xff]  }
 0x2ae   : > { %v10882_v41 = vpop.permute.xlu1 %6765  ;;  %v10886_v26 = vpop.permute.xlu0 %5256  ;;  %v9293_v18 = vld [vmem:[#allocation3 + $0xc0] sm:$0xff]   ;;  %8711 = vmatpush3.bf16.msra.mxu1 %v9311_v29  ;;  %v4326_v46 = vld [vmem:[#allocation3 + $0xd4] sm:$0x1]  ;;  %v9321_v22 = vld [vmem:[#allocation3 + $0xa8] sm:$0xff]  }
 0x2af   : > { %5268 = vrot.lane.b32.xlu0 %v5236_v43, %s9353_s30  ;;  %v5842_v43 = vshll.u32 %v9297_v39, 16  ;;  %v9301_v3 = vld [vmem:[#allocation3 + $0xc0] sm:$0xfe]   ;;  %8712 = vmatprep.subr.bf16.mxu1 %v9312_v4  ;;  %v4327_v37 = vsel %vm10121_vm7, %v3853_v51, %v4326_v46  ;;  %v9316_v63 = vld [vmem:[#allocation3 + $0x90] sm:$0xff]   ;;  %v7122_v51 = vld [vmem:[#allocation4] sm:$0xff]  ;;  %4581 = vst.msk [vmem:[#allocation4 + $0x70] sm:$0xff] %vm4566_vm5, %v9321_v22 }
 0x2b0   : > { %v9298_v7 = vld [vmem:[#allocation3 + $0xc8] ss:$0 sps:$4 sm:$0x11]   ;;  %v9313_v34 = vld [vmem:[%s11186_s3 + $0x10] sm:$0xff]   ;;  %4328 = vst [vmem:[#allocation3 + $0xd4] sm:$0x1] %v4327_v37  ;;  %8726 = vmatprep.mubr.bf16.mxu1 %v7122_v51 }
 0x2b1   : > { %6777 = vrot.lane.b32.xlu1 %v6726_v32, %s9362_s13  ;;  %v5844_v8 = vrot.slane %v5842_v43, 1  ;;  %v5847_v27 = vshll.u32 %v9298_v7, 16  ;;  %v9300_v28 = vld [vmem:[#allocation3 + $0xc8] ss:$0 sps:$4 sm:$0x11]   ;;  %v9318_v61 = vld [vmem:[#allocation3 + $0x9c] sm:$0xff]  }
 0x2b2   : > { %v4970_v30 = vpop.permute.xlu1 %4969  ;;  %v7035_v59 = vrot.slane %v9300_v28, 1  ;;  %v9302_v56 = vld [vmem:[#allocation3 + $0xc8] ss:$0 sps:$4 sm:$0x11]   ;;  %8713 = vmatpush3.bf16.msra.mxu1 %v9312_v4  ;;  %4579 = vst.msk [vmem:[#allocation4 + $0x60] sm:$0xff] %vm4566_vm5, %v9316_v63  ;;  %4580 = vst.msk [vmem:[#allocation4 + $0x68] sm:$0xff] %vm4566_vm5, %v9318_v61 }
 0x2b3   : > { %5446 = vrot.lane.b32.xlu0 %v9281_v25, %s9354_s6  ;;  %v10893_v2 = vpop.permute.xlu0 %5867  ;;  %5009 = vst.msk [vmem:[#allocation4 + $0x48] sm:$0xff] %vm4999_vm12, %v4970_v30  ;;  %v9310_v30 = vld [vmem:[#allocation3 + $0x84] sm:$0xff]   ;;  %v5849_v1 = vrot.slane %v5847_v27, 1  ;;  %v6138_v14 = vrot.slane %v9302_v56, 1  ;;  %8714 = vmatprep.subr.bf16.mxu1 %v9313_v34  ;;  %v7125_v29 = vld [vmem:[#allocation4 + $0x18] sm:$0xff] }
 0x2b4   : > { %5298 = vst.msk [vmem:[#allocation4 + $0x48] sm:$0xff] %vm5288_vm13, %v10854_v54  ;;  %v9309_v54 = vld [vmem:[#allocation3 + $0x78] sm:$0xff]   ;;  %v7123_v28 = vld [vmem:[#allocation4 + $0x8] sm:$0xff] }
 0x2b5   : > { %4979 = vrot.lane.b32.xlu1 %v4938_v21, %s9351_s28  ;;  %4577 = vst.msk [vmem:[#allocation4 + $0x50] sm:$0xff] %vm4566_vm5, %v9309_v54  ;;  %4578 = vst.msk [vmem:[#allocation4 + $0x58] sm:$0xff] %vm4566_vm5, %v9310_v30  ;;  %v6137_v21 = vrot.slane %v9301_v3, 1  ;;  %v7127_v4 = vld [vmem:[#allocation4 + $0x28] sm:$0xff] }
 0x2b6   : > { %v5866_v31 = vpop.permute.xlu1 %5865  ;;  %8715 = vmatpush3.bf16.msra.mxu1 %v9313_v34 }
 0x2b7   : > { %5879 = vrot.lane.b32.xlu0 %v5838_v48, %s9356_s8  ;;  %5907 = vst.msk [vmem:[#allocation4 + $0x38] sm:$0xff] %vm5899_vm3, %v5866_v31  ;;  %8716 = vmatprep.subr.bf16.mxu1 %v9314_v44 }
 0x2b8   : > { %v6764_v0 = vpop.permute.xlu0 %6763  ;;  %6196 = vst.msk [vmem:[#allocation4 + $0x38] sm:$0xff] %vm6188_vm14, %v10871_v58 }
 0x2b9   : > { %6806 = vst.msk [vmem:[#allocation4 + $0x30] sm:$0xff] %vm6799_vm11, %v6764_v0  ;;  %4981 = vrot.lane.b32.xlu1 %v4950_v6, %s9351_s28  ;;  %v9315_v0 = vld [vmem:[%s11186_s3 + $0x20] sm:$0xff]  }
 0x2ba   : > { %6374 = vst.msk [vmem:[#allocation4 + $0x38] sm:$0xff] %vm6366_vm9, %v10829_v55  ;;  %v4968_v58 = vpop.permute.xlu1 %4967  ;;  %v9295_v55 = vld [vmem:[#allocation3 + $0xc0] sm:$0xff]   ;;  %8717 = vmatpush3.bf16.msra.mxu1 %v9314_v44 }
 0x2bb   : > { %7095 = vst.msk [vmem:[#allocation4 + $0x30] sm:$0xff] %vm11305_vm6, %v10878_v11  ;;  %6168 = vrot.lane.b32.xlu0 %v6136_v10, %s9359_s27  ;;  %v9296_v11 = vld [vmem:[#allocation3 + $0xc8] ss:$0 sps:$4 sm:$0x11]   ;;  %v6728_v15 = vshrl.u32 %v9295_v55, 16  ;;  %v6730_v16 = vshll.u32 %v9295_v55, 16  ;;  %8718 = vmatprep.subr.bf16.mxu1 %v9315_v0 }
 0x2bc   : > { %6807 = vst.msk [vmem:[#allocation4 + $0x38] sm:$0xff] %vm6799_vm11, %v10882_v41  ;;  %v5239_v41 = vsel %vm11308_vm8, %v5237_v12, %v5238_v9  ;;  %v6735_v23 = vshll.u32 %v9296_v11, 16  ;;  %v6335_v35 = vpop.permute.xlu0 %6334  ;;  %vm11309_vm6 = vsmask.f32 7424  ;;  %v4435_v9 = vld [vmem:[#allocation3 + $0xd4] sm:$0x1] }
 0x2bd   : > { %7112 = vst.msk [vmem:[#allocation4 + $0x30] sm:$0xff] %vm7105_vm15, %v9357_v53  ;;  %5270 = vrot.lane.b32.xlu1 %v5239_v41, %s9353_s30  ;;  %v6732_v24 = vrot.slane %v6730_v16, 1  ;;  %vm11310_vm10 = vmmov %vm11309_vm6  ;;  %v4436_v10 = vsel %vm10155_vm1, 0, %v4435_v9  ;;  %v9317_v12 = vld [vmem:[%s11186_s3 + $0x28] sm:$0xff]  }
 0x2be   : > { %7096 = vst.msk [vmem:[#allocation4 + $0x38] sm:$0xff] %vm11307_vm2, %v10847_v52  ;;  %v5840_v52 = vshrl.u32 %v9297_v39, 16  ;;  %v5437_v20 = vpop.permute.xlu1 %5436  ;;  %v6737_v25 = vrot.slane %v6735_v23, 1  ;;  %vm11311_vm2 = vmmov %vm11308_vm8  ;;  %vm11313_vm8 = vcmask 589312   ;;  %8719 = vmatpush3.bf16.msra.mxu1 %v9315_v0 }
 0x2bf   : > { %7113 = vst.msk [vmem:[#allocation4 + $0x38] sm:$0xff] %vm7105_vm15, %v9357_v53  ;;  %6346 = vrot.lane.b32.xlu0 %v9292_v13, %s9360_s29  ;;  %v6733_v50 = vor.u32 %v6732_v24, %v6728_v15  ;;  %4437 = vst [vmem:[#allocation3 + $0xd4] sm:$0x1] %v4436_v10  ;;  %8720 = vmatprep.subr.bf16.mxu1 %v9317_v12 }
 0x2c0   : > { %5476 = vst.msk [vmem:[#allocation4 + $0x48] sm:$0xff] %vm5466_vm4, %v5437_v20  ;;  %v5845_v32 = vor.u32 %v5844_v8, %v5840_v52  ;;  %vm11315_vm1 = vmmov %vm11309_vm6 }
 0x2c1   : > { %5448 = vrot.lane.b32.xlu1 %v9293_v18, %s9354_s6  ;;  %5008 = vst.msk [vmem:[#allocation4 + $0x40] sm:$0xff] %vm4999_vm12, %v4968_v58  ;;  %v6738_v45 = vsel %vm11309_vm6, %v6733_v50, %v6737_v25  ;;  %v9322_v58 = vld [vmem:[#allocation3 + $0xb4] sm:$0xff]   ;;  %v9320_v18 = vld [vmem:[%s11186_s3 + $0x38] sm:$0xff]  }
 0x2c2   : > { %v10930_v40 = vpop.permute.xlu1 %6336  ;;  %5297 = vst.msk [vmem:[#allocation4 + $0x40] sm:$0xff] %vm5288_vm13, %v10886_v26  ;;  %v5850_v49 = vsel %vm11310_vm10, %v5845_v32, %v5849_v1  ;;  %v4322_v26 = vld [vmem:[#allocation3 + $0xcc] sm:$0xf]  ;;  %8721 = vmatpush3.bf16.msra.mxu1 %v9317_v12 }
 0x2c3   : > { %6779 = vrot.lane.b32.xlu0 %v6738_v45, %s9362_s13  ;;  %5475 = vst.msk [vmem:[#allocation4 + $0x40] sm:$0xff] %vm5466_vm4, %v10825_v5  ;;  %v4323_v5 = vsel %vm10112_vm0, %v10116_v38, %v4322_v26  ;;  %vm11312_vm0 = vmmov %vm11311_vm2  ;;  %8722 = vmatprep.subr.bf16.mxu1 %v9319_v60  ;;  %v7124_v1 = vld [vmem:[#allocation4 + $0x10] sm:$0xff]  ;;  %v7126_v45 = vld [vmem:[#allocation4 + $0x20] sm:$0xff] }
 0x2c4   : > { %5908 = vst.msk [vmem:[#allocation4 + $0x40] sm:$0xff] %vm5899_vm3, %v10893_v2  ;;  %v7036_v2 = vsel %vm11311_vm2, %v7034_v17, %v7035_v59  ;;  %4324 = vst [vmem:[#allocation3 + $0xcc] sm:$0xf] %v4323_v5 }
 0x2c5   : > { %5881 = vrot.lane.b32.xlu1 %v5850_v49, %s9356_s8  ;;  %6197 = vst.msk [vmem:[#allocation4 + $0x40] sm:$0xff] %vm6188_vm14, %v10863_v33  ;;  %v6139_v33 = vsel %vm11312_vm0, %v6137_v21, %v6138_v14  ;;  %v7128_v49 = vld [vmem:[#allocation4 + $0x30] sm:$0xff] }
 0x2c6   : > { %6375 = vst.msk [vmem:[#allocation4 + $0x40] sm:$0xff] %vm6366_vm9, %v6335_v35  ;;  %v9306_v39 = vld [vmem:[#allocation3 + $0xd4] ss:$0 sps:$4 sm:$0x11]   ;;  %8723 = vmatpush3.bf16.msra.mxu1 %v9319_v60 }
 0x2c7   : > { %7068 = vrot.lane.b32.xlu0 %v7036_v2, %s9361_s7  ;;  %4582 = vst.msk [vmem:[#allocation4 + $0x78] sm:$0xff] %vm4566_vm5, %v9322_v58  ;;  %v6747_v52 = vshll.u32 %v9306_v39, 16  ;;  %v9308_v43 = vld [vmem:[#allocation3 + $0xd4] ss:$0 sps:$4 sm:$0x11]   ;;  %8724 = vmatprep.subr.bf16.mxu1 %v9320_v18  ;;  %vm11316_vm5 = vmmov %vm11312_vm0 }
 0x2c8   : > { %v7038_v27 = vrot.slane %v9308_v43, 1  ;;  %v7129_v14 = vld [vmem:[#allocation4 + $0x38] sm:$0xff] }
 0x2c9   : > { %6170 = vrot.lane.b32.xlu1 %v6139_v33, %s9359_s27  ;;  %v6749_v24 = vrot.slane %v6747_v52, 1 }
 0x2ca   : > { %8725 = vmatpush3.bf16.msra.mxu1 %v9320_v18 }
 0x2cb   : > { %v6159_v38 = vpop.permute.xlu1 %6158  ;;  %v4380_v57 = vld [vmem:[#allocation3 + $0xcc] sm:$0x1]  ;;  %v9307_v15 = vld [vmem:[#allocation3 + $0xcc] sm:$0xfe]  }
 0x2cc   : > { %v4381_v6 = vsel %vm10121_vm7, 0, %v4380_v57  ;;  %vm11314_vm7 = vmmov %vm11313_vm8  ;;  %v7037_v8 = vrot.slane %v9307_v15, 1 }
 0x2cd   : > { %4382 = vst [vmem:[#allocation3 + $0xcc] sm:$0x1] %v4381_v6  ;;  %8727 = vmatmul.mubr.bf16.vlgmr.msra.gmra.mrb[0].mxu1 %v7123_v28  ;;  %vm11317_vm6 = vmmov %vm11314_vm7 }
 0x2ce   : > { %v7039_v30 = vsel %vm11316_vm5, %v7037_v8, %v7038_v27  ;;  %8730 = vmatprep.mubr.bf16.mxu1 %v7124_v1  ;;  %vm11318_vm10 = vmmov %vm11317_vm6  ;;  %v11070_v8 = vld [vmem:[%s11187_s4] ss:$0 sm:$0xff] }
 0x2cf   : > { %vm11319_vm2 = vmmov %vm11317_vm6 }
 0x2d0   : > { %v6768_v48 = vpop.permute.xlu0 %6767  ;;  %vm11320_vm0 = vmmov %vm11319_vm2 }
 0x2d1   : > { %6808 = vst.msk [vmem:[#allocation4 + $0x40] sm:$0xff] %vm6799_vm11, %v6768_v48 }
 0x2d4   : > { %v7057_v31 = vpop.permute.xlu0 %7056  ;;  %v6770_v36 = vpop.permute.xlu1 %6769  ;;  %v9304_v55 = vld [vmem:[#allocation3 + $0xcc] sm:$0xff]  }
 0x2d5   : > { %7097 = vst.msk [vmem:[#allocation4 + $0x40] sm:$0xff] %vm11313_vm8, %v7057_v31  ;;  %v9305_v11 = vld [vmem:[#allocation3 + $0xcc] sm:$0xff]   ;;  %6348 = vrot.lane.b32.xlu1 %v9304_v55, %s9360_s29  ;;  %8731 = vmatmul.mubr.bf16.gmra.mrb[4].mxu1 %v7125_v29 }
 0x2d6   : > { %7114 = vst.msk [vmem:[#allocation4 + $0x40] sm:$0xff] %vm7105_vm15, %v9357_v53  ;;  %v6740_v23 = vshrl.u32 %v9305_v11, 16  ;;  %v6742_v7 = vshll.u32 %v9305_v11, 16  ;;  %8734 = vmatprep.mubr.bf16.mxu1 %v7126_v45 }
 0x2d8   : > { %v7059_v62 = vpop.permute.xlu0 %7058  ;;  %v5870_v42 = vpop.permute.xlu1 %5869  ;;  %v6744_v20 = vrot.slane %v6742_v7, 1 }
 0x2d9   : > { %5909 = vst.msk [vmem:[#allocation4 + $0x48] sm:$0xff] %vm5899_vm3, %v5870_v42 }
 0x2da   : > { %6198 = vst.msk [vmem:[#allocation4 + $0x48] sm:$0xff] %vm6188_vm14, %v6159_v38  ;;  %v6745_v25 = vor.u32 %v6744_v20, %v6740_v23 }
 0x2db   : > { %6376 = vst.msk [vmem:[#allocation4 + $0x48] sm:$0xff] %vm6366_vm9, %v10930_v40 }
 0x2dc   : > { %v5261_v13 = vpop.permute.xlu0 %5260  ;;  %6809 = vst.msk [vmem:[#allocation4 + $0x48] sm:$0xff] %vm6799_vm11, %v6770_v36  ;;  %v4972_v16 = vpop.permute.xlu1 %4971  ;;  %v6750_v50 = vsel %vm11315_vm1, %v6745_v25, %v6749_v24 }
 0x2dd   : > { %7098 = vst.msk [vmem:[#allocation4 + $0x48] sm:$0xff] %vm11314_vm7, %v7059_v62  ;;  %6781 = vrot.lane.b32.xlu1 %v6750_v50, %s9362_s13  ;;  %8735 = vmatmul.mubr.bf16.gmra.mrb[8].mxu1 %v7127_v4  ;;  %v7130_v46 = vld [vmem:[#allocation4 + $0x40] sm:$0xff]  ;;  %s8543_s13 = sshll.u32 %s11359_s18, 7 }
 0x2de   : > { %7115 = vst.msk [vmem:[#allocation4 + $0x48] sm:$0xff] %vm7105_vm15, %v9357_v53  ;;  %8738 = vmatprep.mubr.bf16.mxu1 %v7128_v49  ;;  %s11079_s28 = scalar_lea.vmem %s11188_s5, %s8543_s13 }
 0x2df   : > { %5010 = vst.msk [vmem:[#allocation4 + $0x50] sm:$0xff] %vm4999_vm12, %v4972_v16 }
 0x2e0   : > { %v5439_v41 = vpop.permute.xlu0 %5438  ;;  %5299 = vst.msk [vmem:[#allocation4 + $0x50] sm:$0xff] %vm5288_vm13, %v5261_v13  ;;  %v4974_v19 = vpop.permute.xlu1 %4973 }
 0x2e1   : > { %5477 = vst.msk [vmem:[#allocation4 + $0x50] sm:$0xff] %vm5466_vm4, %v5439_v41  ;;  %7070 = vrot.lane.b32.xlu1 %v7039_v30, %s9361_s7 }
 0x2e2   : > { %5011 = vst.msk [vmem:[#allocation4 + $0x58] sm:$0xff] %vm4999_vm12, %v4974_v19 }
 0x2e4   : > { %v5872_v54 = vpop.permute.xlu0 %5871  ;;  %v5263_v47 = vpop.permute.xlu1 %5262 }
 0x2e5   : > { %5910 = vst.msk [vmem:[#allocation4 + $0x50] sm:$0xff] %vm5899_vm3, %v5872_v54  ;;  %8739 = vmatmul.mubr.bf16.gmra.mrb[12].mxu1 %v7129_v14  ;;  %v7131_v2 = vld [vmem:[#allocation4 + $0x48] sm:$0xff] }
 0x2e6   : > { %5300 = vst.msk [vmem:[#allocation4 + $0x58] sm:$0xff] %vm5288_vm13, %v5263_v47  ;;  %8742 = vmatprep.mubr.bf16.mxu1 %v7130_v46 }
 0x2e8   : > { %v5441_v35 = vpop.permute.xlu1 %5440 }
 0x2e9   : > { %v6161_v32 = vpop.permute.xlu0 %6160  ;;  %5478 = vst.msk [vmem:[#allocation4 + $0x58] sm:$0xff] %vm5466_vm4, %v5441_v35 }
 0x2ea   : > { %6199 = vst.msk [vmem:[#allocation4 + $0x50] sm:$0xff] %vm6188_vm14, %v6161_v32 }
 0x2ed   : > { %v6339_v40 = vpop.permute.xlu0 %6338  ;;  %8743 = vmatmul.mubr.bf16.gmra.mrb[16].mxu1 %v7131_v2 }
 0x2ee   : > { %6377 = vst.msk [vmem:[#allocation4 + $0x50] sm:$0xff] %vm6366_vm9, %v6339_v40 }
 0x2f1   : > { %v6772_v59 = vpop.permute.xlu0 %6771  ;;  %v5874_v3 = vpop.permute.xlu1 %5873 }
 0x2f2   : > { %6810 = vst.msk [vmem:[#allocation4 + $0x50] sm:$0xff] %vm6799_vm11, %v6772_v59 }
 0x2f3   : > { %5911 = vst.msk [vmem:[#allocation4 + $0x58] sm:$0xff] %vm5899_vm3, %v5874_v3 }
 0x2f5   : > { %v7061_v56 = vpop.permute.xlu0 %7060  ;;  %v6163_v17 = vpop.permute.xlu1 %6162 }
 0x2f6   : > { %7099 = vst.msk [vmem:[#allocation4 + $0x50] sm:$0xff] %vm11317_vm6, %v7061_v56 }
 0x2f7   : > { %7116 = vst.msk [vmem:[#allocation4 + $0x50] sm:$0xff] %vm7105_vm15, %v9357_v53 }
 0x2f8   : > { %6200 = vst.msk [vmem:[#allocation4 + $0x58] sm:$0xff] %vm6188_vm14, %v6163_v17 }
 0x2f9   : > { %v7063_v21 = vpop.permute.xlu0 %7062  ;;  %v6341_v26 = vpop.permute.xlu1 %6340 }
 0x2fa   : > { %6378 = vst.msk [vmem:[#allocation4 + $0x58] sm:$0xff] %vm6366_vm9, %v6341_v26 }
 0x2fd   : > { %v5265_v5 = vpop.permute.xlu0 %5264  ;;  %v6774_v48 = vpop.permute.xlu1 %6773 }
 0x2fe   : > { %6811 = vst.msk [vmem:[#allocation4 + $0x58] sm:$0xff] %vm6799_vm11, %v6774_v48  ;;  %v7132_v37 = vld [vmem:[#allocation4 + $0x50] sm:$0xff] }
 0x2ff   : > { %7100 = vst.msk [vmem:[#allocation4 + $0x58] sm:$0xff] %vm11318_vm10, %v7063_v21  ;;  %8746 = vmatprep.mubr.bf16.mxu1 %v7132_v37 }
 0x300   : > { %7117 = vst.msk [vmem:[#allocation4 + $0x58] sm:$0xff] %vm7105_vm15, %v9357_v53 }
 0x301   : > { %v5443_v34 = vpop.permute.xlu0 %5442  ;;  %v4976_v38 = vpop.permute.xlu1 %4975 }
 0x302   : > { %5012 = vst.msk [vmem:[#allocation4 + $0x60] sm:$0xff] %vm4999_vm12, %v4976_v38 }
 0x303   : > { %5301 = vst.msk [vmem:[#allocation4 + $0x60] sm:$0xff] %vm5288_vm13, %v5265_v5 }
 0x304   : > { %5479 = vst.msk [vmem:[#allocation4 + $0x60] sm:$0xff] %vm5466_vm4, %v5443_v34 }
 0x305   : > { %v5876_v33 = vpop.permute.xlu0 %5875 }
 0x306   : > { %5912 = vst.msk [vmem:[#allocation4 + $0x60] sm:$0xff] %vm5899_vm3, %v5876_v33 }
 0x307   : > { %v7133_v44 = vld [vmem:[#allocation4 + $0x58] sm:$0xff] }
 0x308   : > { %8747 = vmatmul.mubr.bf16.gmra.mrb[20].mxu1 %v7133_v44 }
 0x309   : > { %v4978_v63 = vpop.permute.xlu1 %4977 }
 0x30a   : > { %5013 = vst.msk [vmem:[#allocation4 + $0x68] sm:$0xff] %vm4999_vm12, %v4978_v63 }
 0x30d   : > { %v6165_v31 = vpop.permute.xlu0 %6164 }
 0x30e   : > { %6201 = vst.msk [vmem:[#allocation4 + $0x60] sm:$0xff] %vm6188_vm14, %v6165_v31 }
 0x30f   : > { %v5267_v61 = vpop.permute.xlu1 %5266 }
 0x310   : > { %5302 = vst.msk [vmem:[#allocation4 + $0x68] sm:$0xff] %vm5288_vm13, %v5267_v61 }
 0x311   : > { %v6343_v51 = vpop.permute.xlu0 %6342 }
 0x312   : > { %6379 = vst.msk [vmem:[#allocation4 + $0x60] sm:$0xff] %vm6366_vm9, %v6343_v51 }
 0x313   : > { %v5445_v57 = vpop.permute.xlu1 %5444 }
 0x314   : > { %5480 = vst.msk [vmem:[#allocation4 + $0x68] sm:$0xff] %vm5466_vm4, %v5445_v57 }
 0x315   : > { %v6776_v36 = vpop.permute.xlu0 %6775 }
 0x316   : > { %6812 = vst.msk [vmem:[#allocation4 + $0x60] sm:$0xff] %vm6799_vm11, %v6776_v36 }
 0x317   : > { %v5878_v62 = vpop.permute.xlu1 %5877 }
 0x318   : > { %5913 = vst.msk [vmem:[#allocation4 + $0x68] sm:$0xff] %vm5899_vm3, %v5878_v62 }
 0x319   : > { %v7065_v0 = vpop.permute.xlu0 %7064 }
 0x31a   : > { %7101 = vst.msk [vmem:[#allocation4 + $0x60] sm:$0xff] %vm11319_vm2, %v7065_v0 }
 0x31b   : > { %7118 = vst.msk [vmem:[#allocation4 + $0x60] sm:$0xff] %vm7105_vm15, %v9357_v53  ;;  %v6167_v6 = vpop.permute.xlu1 %6166 }
 0x31c   : > { %6202 = vst.msk [vmem:[#allocation4 + $0x68] sm:$0xff] %vm6188_vm14, %v6167_v6 }
 0x31d   : > { %v7067_v9 = vpop.permute.xlu0 %7066 }
 0x31f   : > { %v6345_v22 = vpop.permute.xlu1 %6344 }
 0x320   : > { %6380 = vst.msk [vmem:[#allocation4 + $0x68] sm:$0xff] %vm6366_vm9, %v6345_v22 }
 0x321   : > { %v5269_v10 = vpop.permute.xlu0 %5268 }
 0x322   : > { %v7134_v58 = vld [vmem:[#allocation4 + $0x60] sm:$0xff] }
 0x323   : > { %8750 = vmatprep.mubr.bf16.mxu1 %v7134_v58  ;;  %v6778_v12 = vpop.permute.xlu1 %6777 }
 0x324   : > { %6813 = vst.msk [vmem:[#allocation4 + $0x68] sm:$0xff] %vm6799_vm11, %v6778_v12 }
 0x325   : > { %v5447_v42 = vpop.permute.xlu0 %5446  ;;  %7102 = vst.msk [vmem:[#allocation4 + $0x68] sm:$0xff] %vm11320_vm0, %v7067_v9 }
 0x326   : > { %7119 = vst.msk [vmem:[#allocation4 + $0x68] sm:$0xff] %vm7105_vm15, %v9357_v53 }
 0x327   : > { %v4980_v13 = vpop.permute.xlu1 %4979 }
 0x328   : > { %5014 = vst.msk [vmem:[#allocation4 + $0x70] sm:$0xff] %vm4999_vm12, %v4980_v13 }
 0x329   : > { %v5880_v60 = vpop.permute.xlu0 %5879  ;;  %5303 = vst.msk [vmem:[#allocation4 + $0x70] sm:$0xff] %vm5288_vm13, %v5269_v10 }
 0x32a   : > { %5481 = vst.msk [vmem:[#allocation4 + $0x70] sm:$0xff] %vm5466_vm4, %v5447_v42 }
 0x32b   : > { %5914 = vst.msk [vmem:[#allocation4 + $0x70] sm:$0xff] %vm5899_vm3, %v5880_v60  ;;  %v4982_v55 = vpop.permute.xlu1 %4981 }
 0x32c   : > { %5015 = vst.msk [vmem:[#allocation4 + $0x78] sm:$0xff] %vm4999_vm12, %v4982_v55  ;;  %vm11321_vm12 = vmmov %vm11320_vm0 }
 0x32d   : > { %v6169_v11 = vpop.permute.xlu0 %6168  ;;  %v7135_v39 = vld [vmem:[#allocation4 + $0x68] sm:$0xff] }
 0x32e   : > { %6203 = vst.msk [vmem:[#allocation4 + $0x70] sm:$0xff] %vm6188_vm14, %v6169_v11  ;;  %8751 = vmatmul.mubr.bf16.gmra.mrb[24].mxu1 %v7135_v39 }
 0x32f   : > { %v5271_v41 = vpop.permute.xlu1 %5270 }
 0x330   : > { %5304 = vst.msk [vmem:[#allocation4 + $0x78] sm:$0xff] %vm5288_vm13, %v5271_v41  ;;  %vm11322_vm13 = vmmov %vm11320_vm0 }
 0x331   : > { %v6347_v15 = vpop.permute.xlu0 %6346 }
 0x332   : > { %6381 = vst.msk [vmem:[#allocation4 + $0x70] sm:$0xff] %vm6366_vm9, %v6347_v15 }
 0x333   : > { %v5449_v16 = vpop.permute.xlu1 %5448 }
 0x334   : > { %5482 = vst.msk [vmem:[#allocation4 + $0x78] sm:$0xff] %vm5466_vm4, %v5449_v16  ;;  %vm11323_vm4 = vcmask 60416  }
 0x335   : > { %v6780_v18 = vpop.permute.xlu0 %6779 }
 0x336   : > { %6814 = vst.msk [vmem:[#allocation4 + $0x70] sm:$0xff] %vm6799_vm11, %v6780_v18 }
 0x337   : > { %v5882_v23 = vpop.permute.xlu1 %5881 }
 0x338   : > { %5915 = vst.msk [vmem:[#allocation4 + $0x78] sm:$0xff] %vm5899_vm3, %v5882_v23  ;;  %vm11324_vm3 = vmmov %vm11323_vm4 }
 0x339   : > { %v7069_v7 = vpop.permute.xlu0 %7068  ;;  %vm11329_vm8 = vmmov %vm11324_vm3 }
 0x33a   : > { %7103 = vst.msk [vmem:[#allocation4 + $0x70] sm:$0xff] %vm11321_vm12, %v7069_v7  ;;  %vm11330_vm7 = vmmov %vm11324_vm3 }
 0x33b   : > { %7120 = vst.msk [vmem:[#allocation4 + $0x70] sm:$0xff] %vm7105_vm15, %v9357_v53  ;;  %v6171_v52 = vpop.permute.xlu1 %6170  ;;  %vm11331_vm1 = vmmov %vm11324_vm3 }
 0x33c   : > { %6204 = vst.msk [vmem:[#allocation4 + $0x78] sm:$0xff] %vm6188_vm14, %v6171_v52  ;;  %vm11325_vm14 = vmmov %vm11324_vm3 }
 0x33d   : > { %vm11332_vm5 = vmmov %vm11331_vm1 }
 0x33e   : > { %vm11333_vm6 = vmmov %vm11331_vm1 }
 0x33f   : > { %vm11334_vm10 = vmmov %vm11331_vm1 }
 0x340   : > { %vm11335_vm2 = vmmov %vm11331_vm1 }
 0x341   : > { %vm11336_vm0 = vmmov %vm11331_vm1 }
 0x342   : > { %v7136_v43 = vld [vmem:[#allocation4 + $0x70] sm:$0xff]  ;;  %vm11337_vm12 = vmmov %vm11336_vm0 }
 0x343   : > { %8754 = vmatprep.mubr.bf16.mxu1 %v7136_v43 }
 0x347   : > { %v6349_v20 = vpop.permute.xlu1 %6348 }
 0x348   : > { %6382 = vst.msk [vmem:[#allocation4 + $0x78] sm:$0xff] %vm6366_vm9, %v6349_v20  ;;  %vm11326_vm9 = vmmov %vm11324_vm3 }
 0x34f   : > { %v6782_v24 = vpop.permute.xlu1 %6781 }
 0x350   : > { %6815 = vst.msk [vmem:[#allocation4 + $0x78] sm:$0xff] %vm6799_vm11, %v6782_v24  ;;  %vm11327_vm11 = vmmov %vm11324_vm3 }
 0x353   : > { %v7071_v19 = vpop.permute.xlu1 %7070 }
 0x354   : > { %7104 = vst.msk [vmem:[#allocation4 + $0x78] sm:$0xff] %vm11322_vm13, %v7071_v19  ;;  %vm11338_vm13 = vmmov %vm11336_vm0 }
 0x355   : > { %7121 = vst.msk [vmem:[#allocation4 + $0x78] sm:$0xff] %vm7105_vm15, %v9357_v53  ;;  %vm11328_vm15 = vmmov %vm11324_vm3 }
 0x35c   : > { %v7137_v25 = vld [vmem:[#allocation4 + $0x78] sm:$0xff] }
 0x35d   : > { %8755 = vmatmul.mubr.bf16.gmra.mrb[28].mxu1 %v7137_v25 }
 0x3a0   : > { %v8728_v27 = vpop.f32.mrb[0].mxu1 }
 0x3a1   : > { %v7252_v54 = vadd.f32 %v8728_v27, %v11070_v8  ;;  %v7243_v50 = vpop.f32.mrb[1].mxu1 }
 0x3a2   : > { %v7244_v47 = vadd.f32 %v11070_v8, %v7243_v50  ;;  %v8729_v28 = vpop.f32.mrb[2].mxu1 }
 0x3a3   : > { %v7372_v30 = vmax.f32 %v7252_v54, 0.0  ;;  %v7255_v32 = vadd.f32 %v8729_v28, %v11070_v8  ;;  %v7246_v1 = vpop.f32.mrb[3].mxu1 }
 0x3a4   : > { %v7370_v53 = vmax.f32 %v7244_v47, 0.0  ;;  %v7247_v35 = vadd.f32 %v11070_v8, %v7246_v1 }
 0x3a5   : > { %v8578_v40 = vpack.c.bf16 %v7372_v30, %v7372_v30  ;;  %v7373_v29 = vmax.f32 %v7255_v32, 0.0 }
 0x3a6   : > { %v8576_v45 = vpack.c.bf16 %v7370_v53, %v7370_v53  ;;  %v7371_v59 = vmax.f32 %v7247_v35, 0.0 }
 0x3a7   : > { %7532 = vst.msk [vmem:[%s11079_s28 + $0x8] sm:$0xf] %vm11323_vm4, %v8578_v40  ;;  %v8579_v3 = vpack.c.bf16 %v7373_v29, %v7373_v29  ;;  %vm11339_vm4 = vmmov %vm11336_vm0 }
 0x3a8   : > { %7530 = vst.msk [vmem:[%s11079_s28] sm:$0xf] %vm11324_vm3, %v8576_v45  ;;  %v8577_v56 = vpack.c.bf16 %v7371_v59, %v7371_v59  ;;  %v8732_v4 = vpop.f32.mrb[4].mxu1  ;;  %vm11340_vm3 = vmmov %vm11336_vm0 }
 0x3a9   : > { %7533 = vst.msk [vmem:[%s11079_s28 + $0xc] sm:$0xf] %vm11325_vm14, %v8579_v3  ;;  %v7268_v49 = vadd.f32 %v8732_v4, %v11070_v8  ;;  %v7259_v17 = vpop.f32.mrb[5].mxu1  ;;  %vm11341_vm14 = vmmov %vm11336_vm0 }
 0x3aa   : > { %7531 = vst.msk [vmem:[%s11079_s28 + $0x4] sm:$0xf] %vm11326_vm9, %v8577_v56  ;;  %v7260_v21 = vadd.f32 %v11070_v8, %v7259_v17  ;;  %v8733_v26 = vpop.f32.mrb[6].mxu1  ;;  %vm11342_vm9 = vmmov %vm11336_vm0 }
 0x3ab   : > { %v7376_v14 = vmax.f32 %v7268_v49, 0.0  ;;  %v7271_v5 = vadd.f32 %v8733_v26, %v11070_v8  ;;  %v7262_v46 = vpop.f32.mrb[7].mxu1 }
 0x3ac   : > { %v7374_v48 = vmax.f32 %v7260_v21, 0.0  ;;  %v7263_v34 = vadd.f32 %v11070_v8, %v7262_v46 }
 0x3ad   : > { %v8582_v2 = vpack.c.bf16 %v7376_v14, %v7376_v14  ;;  %v7377_v37 = vmax.f32 %v7271_v5, 0.0 }
 0x3ae   : > { %v8580_v38 = vpack.c.bf16 %v7374_v48, %v7374_v48  ;;  %v7375_v33 = vmax.f32 %v7263_v34, 0.0 }
 0x3af   : > { %7536 = vst.msk [vmem:[%s11079_s28 + $0x18] sm:$0xf] %vm11327_vm11, %v8582_v2  ;;  %v8583_v63 = vpack.c.bf16 %v7377_v37, %v7377_v37  ;;  %vm11343_vm11 = vmmov %vm11336_vm0 }
 0x3b0   : > { %7534 = vst.msk [vmem:[%s11079_s28 + $0x10] sm:$0xf] %vm11328_vm15, %v8580_v38  ;;  %v8581_v31 = vpack.c.bf16 %v7375_v33, %v7375_v33  ;;  %v8736_v44 = vpop.f32.mrb[8].mxu1  ;;  %vm11344_vm15 = vmmov %vm11336_vm0 }
 0x3b1   : > { %7537 = vst.msk [vmem:[%s11079_s28 + $0x1c] sm:$0xf] %vm11329_vm8, %v8583_v63  ;;  %v7284_v61 = vadd.f32 %v8736_v44, %v11070_v8  ;;  %v7275_v51 = vpop.f32.mrb[9].mxu1  ;;  %vm11345_vm8 = vmmov %vm11336_vm0 }
 0x3b2   : > { %7535 = vst.msk [vmem:[%s11079_s28 + $0x14] sm:$0xf] %vm11330_vm7, %v8581_v31  ;;  %v7276_v57 = vadd.f32 %v11070_v8, %v7275_v51  ;;  %v8737_v36 = vpop.f32.mrb[10].mxu1  ;;  %vm11346_vm7 = vmmov %vm11336_vm0 }
 0x3b3   : > { %v7380_v62 = vmax.f32 %v7284_v61, 0.0  ;;  %v7287_v0 = vadd.f32 %v8737_v36, %v11070_v8  ;;  %v7278_v6 = vpop.f32.mrb[11].mxu1 }
 0x3b4   : > { %v7378_v9 = vmax.f32 %v7276_v57, 0.0  ;;  %v7279_v22 = vadd.f32 %v11070_v8, %v7278_v6 }
 0x3b5   : > { %v8586_v10 = vpack.c.bf16 %v7380_v62, %v7380_v62  ;;  %v7381_v58 = vmax.f32 %v7287_v0, 0.0 }
 0x3b6   : > { %v8584_v12 = vpack.c.bf16 %v7378_v9, %v7378_v9  ;;  %v7379_v42 = vmax.f32 %v7279_v22, 0.0 }
 0x3b7   : > { %7540 = vst.msk [vmem:[%s11079_s28 + $0x28] sm:$0xf] %vm11331_vm1, %v8586_v10  ;;  %v8587_v13 = vpack.c.bf16 %v7381_v58, %v7381_v58  ;;  %vm11347_vm1 = vmmov %vm11336_vm0 }
 0x3b8   : > { %7538 = vst.msk [vmem:[%s11079_s28 + $0x20] sm:$0xf] %vm11332_vm5, %v8584_v12  ;;  %v8585_v60 = vpack.c.bf16 %v7379_v42, %v7379_v42  ;;  %v8740_v55 = vpop.f32.mrb[12].mxu1  ;;  %vm11348_vm5 = vmmov %vm11336_vm0 }
 0x3b9   : > { %7541 = vst.msk [vmem:[%s11079_s28 + $0x2c] sm:$0xf] %vm11333_vm6, %v8587_v13  ;;  %v7300_v11 = vadd.f32 %v8740_v55, %v11070_v8  ;;  %v7291_v39 = vpop.f32.mrb[13].mxu1  ;;  %vm11349_vm6 = vmmov %vm11336_vm0 }
 0x3ba   : > { %7539 = vst.msk [vmem:[%s11079_s28 + $0x24] sm:$0xf] %vm11334_vm10, %v8585_v60  ;;  %v7292_v41 = vadd.f32 %v11070_v8, %v7291_v39  ;;  %v8741_v15 = vpop.f32.mrb[14].mxu1  ;;  %vm11350_vm10 = vmmov %vm11336_vm0 }
 0x3bb   : > { %v7384_v16 = vmax.f32 %v7300_v11, 0.0  ;;  %v7303_v18 = vadd.f32 %v8741_v15, %v11070_v8  ;;  %v7294_v23 = vpop.f32.mrb[15].mxu1 }
 0x3bc   : > { %v7382_v7 = vmax.f32 %v7292_v41, 0.0  ;;  %v7295_v52 = vadd.f32 %v11070_v8, %v7294_v23 }
 0x3bd   : > { %v8590_v43 = vpack.c.bf16 %v7384_v16, %v7384_v16  ;;  %v7385_v20 = vmax.f32 %v7303_v18, 0.0 }
 0x3be   : > { %v8588_v24 = vpack.c.bf16 %v7382_v7, %v7382_v7  ;;  %v7383_v19 = vmax.f32 %v7295_v52, 0.0 }
 0x3bf   : > { %7544 = vst.msk [vmem:[%s11079_s28 + $0x38] sm:$0xf] %vm11335_vm2, %v8590_v43  ;;  %v8591_v25 = vpack.c.bf16 %v7385_v20, %v7385_v20  ;;  %vm11351_vm2 = vmmov %vm11336_vm0 }
 0x3c0   : > { %7542 = vst.msk [vmem:[%s11079_s28 + $0x30] sm:$0xf] %vm11336_vm0, %v8588_v24  ;;  %v8589_v27 = vpack.c.bf16 %v7383_v19, %v7383_v19  ;;  %v8744_v54 = vpop.f32.mrb[16].mxu1 }
 0x3c1   : > { %7545 = vst.msk [vmem:[%s11079_s28 + $0x3c] sm:$0xf] %vm11337_vm12, %v8591_v25  ;;  %v7316_v50 = vadd.f32 %v8744_v54, %v11070_v8  ;;  %v7307_v47 = vpop.f32.mrb[17].mxu1  ;;  %vm11352_vm12 = vmmov %vm11336_vm0 }
 0x3c2   : > { %7543 = vst.msk [vmem:[%s11079_s28 + $0x34] sm:$0xf] %vm11338_vm13, %v8589_v27  ;;  %v7308_v28 = vadd.f32 %v11070_v8, %v7307_v47  ;;  %v8745_v30 = vpop.f32.mrb[18].mxu1  ;;  %vm11353_vm13 = vmmov %vm11336_vm0 }
 0x3c3   : > { %v7388_v32 = vmax.f32 %v7316_v50, 0.0  ;;  %v7319_v1 = vadd.f32 %v8745_v30, %v11070_v8  ;;  %v7310_v53 = vpop.f32.mrb[19].mxu1 }
 0x3c4   : > { %v7386_v35 = vmax.f32 %v7308_v28, 0.0  ;;  %v7311_v40 = vadd.f32 %v11070_v8, %v7310_v53 }
 0x3c5   : > { %v8594_v29 = vpack.c.bf16 %v7388_v32, %v7388_v32  ;;  %v7389_v45 = vmax.f32 %v7319_v1, 0.0 }
 0x3c6   : > { %v8592_v59 = vpack.c.bf16 %v7386_v35, %v7386_v35  ;;  %v7387_v3 = vmax.f32 %v7311_v40, 0.0 }
 0x3c7   : > { %7548 = vst.msk [vmem:[%s11079_s28 + $0x48] sm:$0xf] %vm11339_vm4, %v8594_v29  ;;  %v8595_v56 = vpack.c.bf16 %v7389_v45, %v7389_v45 }
 0x3c8   : > { %7546 = vst.msk [vmem:[%s11079_s28 + $0x40] sm:$0xf] %vm11340_vm3, %v8592_v59  ;;  %v8593_v4 = vpack.c.bf16 %v7387_v3, %v7387_v3 }
 0x3c9   : > { %7549 = vst.msk [vmem:[%s11079_s28 + $0x4c] sm:$0xf] %vm11341_vm14, %v8595_v56 }
 0x3ca   : > { %7547 = vst.msk [vmem:[%s11079_s28 + $0x44] sm:$0xf] %vm11342_vm9, %v8593_v4 }
 0x3db   : > { %v8748_v49 = vpop.f32.mrb[20].mxu1 }
 0x3dc   : > { %v7332_v17 = vadd.f32 %v8748_v49, %v11070_v8  ;;  %v7323_v21 = vpop.f32.mrb[21].mxu1 }
 0x3dd   : > { %v7324_v26 = vadd.f32 %v11070_v8, %v7323_v21  ;;  %v8749_v14 = vpop.f32.mrb[22].mxu1 }
 0x3de   : > { %v7392_v5 = vmax.f32 %v7332_v17, 0.0  ;;  %v7335_v46 = vadd.f32 %v8749_v14, %v11070_v8  ;;  %v7326_v48 = vpop.f32.mrb[23].mxu1 }
 0x3df   : > { %v7390_v34 = vmax.f32 %v7324_v26, 0.0  ;;  %v7327_v2 = vadd.f32 %v11070_v8, %v7326_v48 }
 0x3e0   : > { %v8598_v37 = vpack.c.bf16 %v7392_v5, %v7392_v5  ;;  %v7393_v38 = vmax.f32 %v7335_v46, 0.0 }
 0x3e1   : > { %v8596_v33 = vpack.c.bf16 %v7390_v34, %v7390_v34  ;;  %v7391_v63 = vmax.f32 %v7327_v2, 0.0 }
 0x3e2   : > { %7552 = vst.msk [vmem:[%s11079_s28 + $0x58] sm:$0xf] %vm11343_vm11, %v8598_v37  ;;  %v8599_v31 = vpack.c.bf16 %v7393_v38, %v7393_v38 }
 0x3e3   : > { %7550 = vst.msk [vmem:[%s11079_s28 + $0x50] sm:$0xf] %vm11344_vm15, %v8596_v33  ;;  %v8597_v44 = vpack.c.bf16 %v7391_v63, %v7391_v63 }
 0x3e4   : > { %7553 = vst.msk [vmem:[%s11079_s28 + $0x5c] sm:$0xf] %vm11345_vm8, %v8599_v31 }
 0x3e5   : > { %7551 = vst.msk [vmem:[%s11079_s28 + $0x54] sm:$0xf] %vm11346_vm7, %v8597_v44 }
 0x401   : > { %v8752_v61 = vpop.f32.mrb[24].mxu1 }
 0x402   : > { %v7348_v51 = vadd.f32 %v8752_v61, %v11070_v8  ;;  %v7339_v57 = vpop.f32.mrb[25].mxu1 }
 0x403   : > { %v7340_v36 = vadd.f32 %v11070_v8, %v7339_v57  ;;  %v8753_v62 = vpop.f32.mrb[26].mxu1 }
 0x404   : > { %v7396_v0 = vmax.f32 %v7348_v51, 0.0  ;;  %v7351_v6 = vadd.f32 %v8753_v62, %v11070_v8  ;;  %v7342_v9 = vpop.f32.mrb[27].mxu1 }
 0x405   : > { %v7394_v22 = vmax.f32 %v7340_v36, 0.0  ;;  %v7343_v10 = vadd.f32 %v11070_v8, %v7342_v9 }
 0x406   : > { %v8602_v58 = vpack.c.bf16 %v7396_v0, %v7396_v0  ;;  %v7397_v12 = vmax.f32 %v7351_v6, 0.0 }
 0x407   : > { %v8600_v42 = vpack.c.bf16 %v7394_v22, %v7394_v22  ;;  %v7395_v13 = vmax.f32 %v7343_v10, 0.0 }
 0x408   : > { %7556 = vst.msk [vmem:[%s11079_s28 + $0x68] sm:$0xf] %vm11347_vm1, %v8602_v58  ;;  %v8603_v60 = vpack.c.bf16 %v7397_v12, %v7397_v12 }
 0x409   : > { %7554 = vst.msk [vmem:[%s11079_s28 + $0x60] sm:$0xf] %vm11348_vm5, %v8600_v42  ;;  %v8601_v55 = vpack.c.bf16 %v7395_v13, %v7395_v13 }
 0x40a   : > { %7557 = vst.msk [vmem:[%s11079_s28 + $0x6c] sm:$0xf] %vm11349_vm6, %v8603_v60 }
 0x40b   : > { %7555 = vst.msk [vmem:[%s11079_s28 + $0x64] sm:$0xf] %vm11350_vm10, %v8601_v55 }
 0x430   : > { %v8756_v11 = vpop.f32.mrb[28].mxu1 }
 0x431   : > { %v7364_v39 = vadd.f32 %v8756_v11, %v11070_v8  ;;  %v7355_v41 = vpop.f32.mrb[29].mxu1 }
 0x432   : > { %v7356_v15 = vadd.f32 %v11070_v8, %v7355_v41  ;;  %v8757_v16 = vpop.f32.mrb[30].mxu1 }
 0x433   : > { %v7400_v18 = vmax.f32 %v7364_v39, 0.0  ;;  %v7367_v23 = vadd.f32 %v8757_v16, %v11070_v8  ;;  %v7358_v7 = vpop.f32.mrb[31].mxu1 }
 0x434   : > { %v7398_v52 = vmax.f32 %v7356_v15, 0.0  ;;  %v7359_v43 = vadd.f32 %v11070_v8, %v7358_v7 }
 0x435   : > { %v8606_v20 = vpack.c.bf16 %v7400_v18, %v7400_v18  ;;  %v7401_v24 = vmax.f32 %v7367_v23, 0.0 }
 0x436   : > { %v8604_v19 = vpack.c.bf16 %v7398_v52, %v7398_v52  ;;  %v7399_v25 = vmax.f32 %v7359_v43, 0.0 }
 0x437   : > { %7560 = vst.msk [vmem:[%s11079_s28 + $0x78] sm:$0xf] %vm11351_vm2, %v8606_v20  ;;  %v8607_v27 = vpack.c.bf16 %v7401_v24, %v7401_v24 }
 0x438   : > { %7558 = vst.msk [vmem:[%s11079_s28 + $0x70] sm:$0xf] %vm11336_vm0, %v8604_v19  ;;  %v8605_v54 = vpack.c.bf16 %v7399_v25, %v7399_v25 }
 0x439   : > { %7561 = vst.msk [vmem:[%s11079_s28 + $0x7c] sm:$0xf] %vm11352_vm12, %v8607_v27 }
 0x43a   : > { %7559 = vst.msk [vmem:[%s11079_s28 + $0x74] sm:$0xf] %vm11353_vm13, %v8605_v54 }
 0x43b PF: > { %s15_s20 = sadd.s32 1, %s9347_s20   ;;  %s11354_s18 = smov %s9343_s19 }
 0x43c   : > { %p12_p5 = scmp.ge.s32.totalorder %s15_s20, 4   ;;  %s11355_s19 = smov %s11357_s21 }
 0x43e   :  { %14 = sbr.rel (!%p12_p5) target bundleno = 2 (0x2), region = 74 }

</bundles_post_ra>
